<compile_context>
chip_gen: v6e
topology: v6e:2x2x1
jax: 0.10.0
libtpu: 0.0.40
codegen_flags: <defaults>
</compile_context>

<pallas_src>
import functools
import math

import jax
import jax.numpy as jnp
from jax.experimental import pallas as pl
from jax.experimental.pallas import tpu as pltpu

_SQRT_HALF = math.sqrt(0.5)
_VMEM = pl.BlockSpec(memory_space=pltpu.MemorySpace.VMEM)


# ----------------------------------------------------------------------------
# Pallas kernels
# ----------------------------------------------------------------------------
def _mm_kernel(x_ref, w_ref, b_ref, o_ref, *, act_in, act_out):
    """o = act_out(act_in(x) @ w + b). Single block, everything in VMEM."""
    x = x_ref[...]
    if act_in == 'leaky_relu':
        x = jnp.where(x >= 0, x, 0.2 * x)
    acc = jnp.dot(x, w_ref[...], preferred_element_type=jnp.float32) + b_ref[...]
    if act_out == 'relu':
        acc = jnp.maximum(acc, 0.0)
    elif act_out == 'leaky_relu':
        acc = jnp.where(acc >= 0, acc, 0.2 * acc)
    o_ref[...] = acc.astype(o_ref.dtype)


def matmul_bias(x, w, b, *, act_in='none', act_out='none'):
    """(M, K) @ (K, N) + b(1, N) with fused activations, one Pallas call."""
    M = x.shape[0]
    N = w.shape[1]
    return pl.pallas_call(
        functools.partial(_mm_kernel, act_in=act_in, act_out=act_out),
        out_shape=jax.ShapeDtypeStruct((M, N), jnp.float32),
        in_specs=[_VMEM] * 3,
        out_specs=_VMEM,
    )(x, w, b)


def _enc_stack_kernel(*refs, B, T, eps, add_residual):
    """LeakyReLU -> conv(matmul) -> GroupNorm(groups=1) [-> +residual]."""
    if add_residual:
        x_ref, w_ref, b_ref, ga_ref, be_ref, res_ref, o_ref = refs
    else:
        x_ref, w_ref, b_ref, ga_ref, be_ref, o_ref = refs
        res_ref = None
    x = x_ref[...]
    x = jnp.where(x >= 0, x, 0.2 * x)                       # fused LeakyReLU
    acc = jnp.dot(x, w_ref[...], preferred_element_type=jnp.float32) + b_ref[...]
    M, C = acc.shape
    inv_n = 1.0 / float(T * C)
    row = jax.lax.broadcasted_iota(jnp.int32, (M, C), 0)
    mean = jnp.zeros_like(acc)
    var = jnp.zeros_like(acc)
    for s in range(B):                                      # static unroll over B
        msk = (row >= s * T) & (row < (s + 1) * T)
        xs = jnp.where(msk, acc, 0.0)
        m_s = jnp.sum(jnp.sum(xs, axis=1, keepdims=True), axis=0,
                      keepdims=True) * inv_n
        m2_s = jnp.sum(jnp.sum(xs * xs, axis=1, keepdims=True), axis=0,
                       keepdims=True) * inv_n
        v_s = m2_s - m_s * m_s
        mean = jnp.where(msk, m_s, mean)
        var = jnp.where(msk, v_s, var)
    out = (acc - mean) * jax.lax.rsqrt(var + eps) * ga_ref[...] + be_ref[...]
    if add_residual:
        out = out + res_ref[...]
    o_ref[...] = out.astype(o_ref.dtype)


def enc_stack_layer(patches, cp, *, B, T, residual=None):
    M = patches.shape[0]
    C = cp['w'].shape[1]
    args = [patches, cp['w'], cp['b'], cp['gamma'], cp['beta']]
    if residual is not None:
        args.append(residual)
    return pl.pallas_call(
        functools.partial(_enc_stack_kernel, B=B, T=T, eps=1e-5,
                          add_residual=residual is not None),
        out_shape=jax.ShapeDtypeStruct((M, C), jnp.float32),
        in_specs=[_VMEM] * len(args),
        out_specs=_VMEM,
    )(*args)


def _dec_stack_kernel(x_ref, wa_ref, wg_ref, ca_ref, cg_ref, ws_ref, bs_ref,
                      wo_ref, bo_ref, res_ref, skin_ref, out_ref, skout_ref):
    """Dilated conv -> +cond -> GLU -> skip/out 1x1 -> residual & skip accum."""
    x = x_ref[...]
    a = jnp.dot(x, wa_ref[...], preferred_element_type=jnp.float32) + ca_ref[...]
    g = jnp.dot(x, wg_ref[...], preferred_element_type=jnp.float32) + cg_ref[...]
    h = a * jax.nn.sigmoid(g)                               # GLU
    skip = jnp.dot(h, ws_ref[...], preferred_element_type=jnp.float32) + bs_ref[...]
    out = jnp.dot(h, wo_ref[...], preferred_element_type=jnp.float32) + bo_ref[...]
    out_ref[...] = ((out + res_ref[...]) * _SQRT_HALF).astype(out_ref.dtype)
    skout_ref[...] = (skin_ref[...] + skip).astype(skout_ref.dtype)


def dec_stack_call(patches, ca, cg, residual, skip_in, sp):
    M = patches.shape[0]
    C = sp['wo'].shape[1]
    S = sp['ws'].shape[1]
    return pl.pallas_call(
        _dec_stack_kernel,
        out_shape=(jax.ShapeDtypeStruct((M, C), jnp.float32),
                   jax.ShapeDtypeStruct((M, S), jnp.float32)),
        in_specs=[_VMEM] * 11,
        out_specs=(_VMEM, _VMEM),
    )(patches, sp['wa'], sp['wg'], ca, cg, sp['ws'], sp['bs'],
      sp['wo'], sp['bo'], residual, skip_in)


def _dec_final_kernel(x_ref, w1_ref, b1_ref, w2_ref, b2_ref, o_ref, *, scale):
    """x*scale -> ReLU -> 1x1 -> ReLU -> 1x1 (whole Decoder.final_layer)."""
    x = jnp.maximum(x_ref[...] * scale, 0.0)
    h = jnp.dot(x, w1_ref[...], preferred_element_type=jnp.float32) + b1_ref[...]
    h = jnp.maximum(h, 0.0)
    o = jnp.dot(h, w2_ref[...], preferred_element_type=jnp.float32) + b2_ref[...]
    o_ref[...] = o.astype(o_ref.dtype)


def dec_final_call(x, p1, p2, scale):
    M = x.shape[0]
    N = p2['w'].shape[1]
    return pl.pallas_call(
        functools.partial(_dec_final_kernel, scale=scale),
        out_shape=jax.ShapeDtypeStruct((M, N), jnp.float32),
        in_specs=[_VMEM] * 5,
        out_specs=_VMEM,
    )(x, p1['w'], p1['b'], p2['w'], p2['b'])


def _zvq_kernel(x_ref, w_ref, b_ref, e_ref, e2_ref, zq_ref):
    """LeakyReLU -> final 1x1 conv -> nearest-codebook lookup (eval VQ)."""
    x = x_ref[...]
    x = jnp.where(x >= 0, x, 0.2 * x)                       # trailing LeakyReLU
    z = jnp.dot(x, w_ref[...], preferred_element_type=jnp.float32) + b_ref[...]
    e = e_ref[...]
    z2 = jnp.sum(z * z, axis=1, keepdims=True)                       # (N, 1)
    ze = jax.lax.dot_general(z, e, (((1,), (1,)), ((), ())),
                             preferred_element_type=jnp.float32)     # (N, K)
    d = z2 - 2.0 * ze + e2_ref[...]
    n_codes = e.shape[0]
    ids = jax.lax.broadcasted_iota(jnp.int32, d.shape, 1)
    dmin = jnp.min(d, axis=1, keepdims=True)
    # tie-break: smallest index among minima (avoids argmin lowering issues)
    idx = jnp.min(jnp.where(d <= dmin, ids, n_codes), axis=1, keepdims=True)
    onehot = (ids == idx).astype(jnp.float32)
    zq_ref[...] = jnp.dot(onehot, e,
                          preferred_element_type=jnp.float32).astype(zq_ref.dtype)


def encode_final_vq(x, p_final, codebook, codebook_sq):
    """x: (B, T, C_last) pre-activation encoder output -> quantized z (B, T, D)."""
    B, T, C = x.shape
    D = codebook.shape[1]
    zq = pl.pallas_call(
        _zvq_kernel,
        out_shape=jax.ShapeDtypeStruct((B * T, D), jnp.float32),
        in_specs=[_VMEM] * 5,
        out_specs=_VMEM,
    )(x.reshape(B * T, C), p_final['w'], p_final['b'], codebook, codebook_sq)
    return zq.reshape(B, T, D)


# ----------------------------------------------------------------------------
# Conv1d (channels-last) = static-slice im2col glue + Pallas matmul
# ----------------------------------------------------------------------------
def make_patches(x, ksize, dilation, pad_amount, pad_mode):
    B, T, Cin = x.shape
    if pad_amount > 0:
        mode = 'reflect' if pad_mode == 'reflect' else 'constant'
        x = jnp.pad(x, ((0, 0), (pad_amount, pad_amount), (0, 0)), mode=mode)
    Tp = x.shape[1]
    T_out = Tp - dilation * (ksize - 1)
    if ksize == 1:
        return x[:, :T_out, :]
    return jnp.concatenate(
        [x[:, k * dilation:k * dilation + T_out, :] for k in range(ksize)],
        axis=-1)                                            # (B, T_out, ksize*Cin)


def conv1d_cl(x, wm, b, *, ksize, dilation=1, pad_amount=0, pad_mode='zero',
              act_in='none', act_out='none'):
    """x: (B, T, Cin); wm: (ksize*Cin, Cout) (k-major, pre-reshaped at init)."""
    B = x.shape[0]
    patches = make_patches(x, ksize, dilation, pad_amount, pad_mode)
    T_out = patches.shape[1]
    out = matmul_bias(patches.reshape(B * T_out, -1), wm, b,
                      act_in=act_in, act_out=act_out)
    return out.reshape(B, T_out, -1)


# ----------------------------------------------------------------------------
# Residual stacks
# ----------------------------------------------------------------------------
# TODO(synk): EncodeResidualStack source not provided; using a MelGAN-style
# residual stack: [LeakyReLU -> ReflectPad -> dilated Conv1d -> GroupNorm] x layers
# with an identity residual connection (all fused into one kernel per layer).
def encode_residual_stack(x, sp, *, dilation, ks):
    B, T, C = x.shape
    h = x
    n = len(sp['convs'])
    for i, cp in enumerate(sp['convs']):
        patches = make_patches(h, ks, dilation, dilation * (ks - 1) // 2, 'reflect')
        res = x.reshape(B * T, C) if i == n - 1 else None
        h = enc_stack_layer(patches.reshape(B * T, -1), cp, B=B, T=T,
                            residual=res).reshape(B, T, C)
    return h


# ----------------------------------------------------------------------------
# Encoder / Decoder / Model forward (eval path)
# ----------------------------------------------------------------------------
def encoder_forward(p, x, arch_e):
    ks = arch_e['kernel_size']
    sks = arch_e['stack_kernel_size']
    first = True
    for blk, n_stack in zip(p['blocks'], arch_e['stacks']):
        # Trailing LeakyReLU of the previous block fused as pre-activation here.
        x = conv1d_cl(x, blk['conv']['w'], blk['conv']['b'], ksize=ks,
                      pad_amount=(ks - 1) // 2, pad_mode='reflect',
                      act_in=('none' if first else 'leaky_relu'))
        first = False
        for j in range(n_stack):
            x = encode_residual_stack(x, blk['stacks'][j], dilation=2 ** j, ks=sks)
    # Last block's LeakyReLU + final 1x1 conv are fused into the VQ kernel.
    return x


# TODO(synk): DecodeResidualStack source not provided; using a WaveNet/GLU-style
# conditional residual block (dilated conv -> +cond -> GLU -> skip/out 1x1).
def decoder_forward(p, x, c1, arch_d):
    # c1: (B, cond_channels) single condition frame (Decoder uses c[:, :, :1]).
    ks = arch_d['kernel_size']
    sks = arch_d['stack_kernel_size']
    skip_ch = arch_d['skip_channels']
    B, T, _ = x.shape
    M = B * T

    # All per-stack conditioning 1x1 convs in one matmul (main-conv biases folded
    # into the cond bias at init), broadcast over the time axis exactly once.
    cond_all = matmul_bias(c1, p['cond_all']['w'], p['cond_all']['b'])   # (B, W)
    W = cond_all.shape[1]
    cond_rows = jnp.broadcast_to(cond_all[:, None, :], (B, T, W)).reshape(M, W)

    skip_acc = jnp.zeros((M, skip_ch), jnp.float32)
    n_layers = 0
    off = 0
    for blk, cout, n_stack in zip(p['blocks'], arch_d['out_channels'],
                                  arch_d['stacks']):
        # TODO(synk): upsample_scales > 1 (strided ConvTranspose1d) not implemented;
        # arch here uses stride=1 everywhere (matches the reference us_scale==1 path).
        x = conv1d_cl(x, blk['ct']['w'], blk['ct']['b'], ksize=ks,
                      pad_amount=(ks - 1) // 2, pad_mode='zero')
        n_layers += 1
        for j in range(n_stack):
            ca = cond_rows[:, off:off + cout]
            cg = cond_rows[:, off + cout:off + 2 * cout]
            off += 2 * cout
            d = 2 ** j
            patches = make_patches(x, sks, d, d * (sks - 1) // 2, 'reflect')
            x_rows, skip_acc = dec_stack_call(
                patches.reshape(M, -1), ca, cg, x.reshape(M, cout), skip_acc,
                blk['stacks'][j])
            x = x_rows.reshape(B, T, cout)
            n_layers += 1

    out = dec_final_call(skip_acc, p['final1'], p['final2'],
                         math.sqrt(1.0 / n_layers))          # (M, final_ch)
    return out.reshape(B, T, -1)


def model_forward(params, x_bct, y_idx, arch):
    # Internally channels-last; external interface keeps PyTorch (B, C, T).
    x = jnp.transpose(x_bct, (0, 2, 1))                      # (B, T, Cin)
    y = params['embeds'][y_idx]                              # (B, Ty, y_dim)
    c1 = y[:, 0, :]                                          # first condition frame
    h = encoder_forward(params['encoder'], x, arch['encoder'])
    z_vq = encode_final_vq(h, params['encoder']['final'],
                           params['codebook'], params['codebook_sq'])
    xhat = decoder_forward(params['decoder'], z_vq, c1, arch['decoder'])
    return jnp.transpose(xhat, (0, 2, 1))                    # (B, final_ch, T)


# ----------------------------------------------------------------------------
# Deterministic parameter init (all layout work done here, outside jit)
# ----------------------------------------------------------------------------
def _kaiming(key, shape, fan_in):
    return math.sqrt(2.0 / fan_in) * jax.random.normal(key, shape, jnp.float32)


def init_params(key, arch):
    enc, dec = arch['encoder'], arch['decoder']
    kiter = iter(jax.random.split(key, 1024))
    nk = lambda: next(kiter)

    def conv_w(cin, cout, ks):
        # PyTorch Conv1d weight (Cout, Cin, K) -> channels-last im2col matrix.
        w = _kaiming(nk(), (cout, cin, ks), cin * ks)
        return jnp.transpose(w, (2, 1, 0)).reshape(ks * cin, cout)

    def conv_mat(cin, cout, ks):
        return {'w': conv_w(cin, cout, ks),
                'b': jnp.zeros((1, cout), jnp.float32)}

    def convT_mat(cin, cout, ks):
        # PyTorch ConvTranspose1d weight (Cin, Cout, K); stride=1, pad=(K-1)//2
        # == Conv1d with flipped, transposed kernel (precomputed here).
        wt = _kaiming(nk(), (cin, cout, ks), cout * ks)
        w_eff = jnp.flip(jnp.transpose(wt, (1, 0, 2)), axis=2)     # (Cout, Cin, K)
        wm = jnp.transpose(w_eff, (2, 1, 0)).reshape(ks * cin, cout)
        return {'w': wm, 'b': jnp.zeros((1, cout), jnp.float32)}

    codebook = jax.random.normal(nk(), (arch['z_num'], arch['z_dim']), jnp.float32)
    params = {
        'embeds': jax.random.normal(nk(), (arch['y_num'], arch['y_dim']),
                                    jnp.float32),
        'codebook': codebook,
        'codebook_sq': jnp.sum(codebook * codebook, axis=1)[None, :],
    }

    # Encoder
    e_blocks = []
    for cin, cout, n_stack in zip(enc['in_channels'], enc['out_channels'],
                                  enc['stacks']):
        blk = {'conv': conv_mat(cin, cout, enc['kernel_size']), 'stacks': []}
        for _j in range(n_stack):
            convs = []
            for _ in range(enc['stack_layers']):
                cp = conv_mat(cout, cout, enc['stack_kernel_size'])
                cp['gamma'] = jnp.ones((1, cout), jnp.float32)
                cp['beta'] = jnp.zeros((1, cout), jnp.float32)
                convs.append(cp)
            blk['stacks'].append({'convs': convs})
        e_blocks.append(blk)
    params['encoder'] = {
        'blocks': e_blocks,
        'final': conv_mat(enc['out_channels'][-1], enc['z_channels'], 1),
    }

    # Decoder
    d_blocks = []
    cond_w_parts, cond_b_parts = [], []
    for cin, cout, n_stack in zip(dec['in_channels'], dec['out_channels'],
                                  dec['stacks']):
        blk = {'ct': convT_mat(cin, cout, dec['kernel_size']), 'stacks': []}
        for _j in range(n_stack):
            w_conv = conv_w(cout, 2 * cout, dec['stack_kernel_size'])
            b_conv = jnp.zeros((2 * cout,), jnp.float32)
            w_cond = conv_w(dec['cond_channels'], 2 * cout, 1)
            b_cond = jnp.zeros((2 * cout,), jnp.float32)
            stack = {
                # GLU gate halves pre-split (no in-kernel lane slicing).
                'wa': w_conv[:, :cout], 'wg': w_conv[:, cout:],
                'ws': conv_w(cout, dec['skip_channels'], 1),
                'bs': jnp.zeros((1, dec['skip_channels']), jnp.float32),
                'wo': conv_w(cout, cout, 1),
                'bo': jnp.zeros((1, cout), jnp.float32),
            }
            blk['stacks'].append(stack)
            cond_w_parts.append(w_cond)
            # Fold the main-conv bias into the conditioning bias.
            cond_b_parts.append((b_cond + b_conv)[None, :])
        d_blocks.append(blk)
    params['decoder'] = {
        'blocks': d_blocks,
        'cond_all': {'w': jnp.concatenate(cond_w_parts, axis=1),
                     'b': jnp.concatenate(cond_b_parts, axis=1)},
        'final1': conv_mat(dec['skip_channels'], dec['skip_channels'], 1),
        'final2': conv_mat(dec['skip_channels'], dec['final_channels'], 1),
    }
    return params


# ----------------------------------------------------------------------------
if __name__ == "__main__":
    arch = {
        'encoder': dict(in_channels=[16, 24], out_channels=[24, 16],
                        downsample_scales=[1, 1], kernel_size=5, z_channels=8,
                        stack_kernel_size=3, stack_layers=2, stacks=[1, 1]),
        'decoder': dict(in_channels=[8, 24], out_channels=[24, 16],
                        upsample_scales=[1, 1], cond_channels=8, skip_channels=16,
                        final_channels=16, kernel_size=5, stack_kernel_size=3,
                        stacks=[1, 1]),
        'z_num': 32, 'z_dim': 8, 'y_num': 4, 'y_dim': 8,
        'embed_norm': False, 'jitter_p': 0.0, 'beta': 0.25,
    }

    key = jax.random.PRNGKey(0)
    k_p, k_x, k_y = jax.random.split(key, 3)
    params = init_params(k_p, arch)

    B, Cin, T = 2, 16, 16
    x = jax.random.normal(k_x, (B, Cin, T), jnp.float32)           # (B, C, T)
    y_idx = jax.random.randint(k_y, (B, 4), 0, arch['y_num'])      # (B, Ty)

    fwd = jax.jit(functools.partial(model_forward, arch=arch))
    xhat = fwd(params, x, y_idx)
    jax.block_until_ready(xhat)
    assert xhat.shape == (B, arch['decoder']['final_channels'], T)
    print("KERNEL_OK")
</pallas_src>

<mosaic_0001>
module attributes {stable_mosaic.version = 11 : i64} {
  func.func @_mm_kernel(%arg0: memref<32x80xf32, #tpu.memory_space<vmem>>, %arg1: memref<80x24xf32, #tpu.memory_space<vmem>>, %arg2: memref<1x24xf32, #tpu.memory_space<vmem>>, %arg3: memref<32x24xf32, #tpu.memory_space<vmem>>) attributes {dimension_semantics = [], scalar_prefetch = 0 : i64, scratch_operands = 0 : i64, tpu.core_type = #tpu.core_type<tc>} {
    %c0 = arith.constant 0 : index
    %c0_0 = arith.constant 0 : index
    %0 = vector.load %arg0[%c0, %c0_0] : memref<32x80xf32, #tpu.memory_space<vmem>>, vector<32x80xf32>
    %c0_1 = arith.constant 0 : index
    %c0_2 = arith.constant 0 : index
    %1 = vector.load %arg1[%c0_1, %c0_2] : memref<80x24xf32, #tpu.memory_space<vmem>>, vector<80x24xf32>
    %cst = arith.constant dense<0.000000e+00> : vector<32x24xf32>
    %2 = tpu.matmul %0, %1, %cst {dimension_numbers = #tpu.dot_dimension_numbers<[1], [0], [0], [1], [0, 0, 1, 1], [], []>} : vector<32x80xf32>, vector<80x24xf32>, vector<32x24xf32> -> vector<32x24xf32>
    %c0_3 = arith.constant 0 : index
    %c0_4 = arith.constant 0 : index
    %3 = vector.load %arg2[%c0_3, %c0_4] : memref<1x24xf32, #tpu.memory_space<vmem>>, vector<1x24xf32>
    %4 = vector.broadcast %3 : vector<1x24xf32> to vector<32x24xf32>
    %5 = arith.addf %2, %4 : vector<32x24xf32>
    %c0_5 = arith.constant 0 : index
    %c0_6 = arith.constant 0 : index
    %6 = vector.load %arg3[%c0_5, %c0_6] : memref<32x24xf32, #tpu.memory_space<vmem>>, vector<32x24xf32>
    tpu.vector_store %arg3[%c0_5, %c0_6], %5 {strides = array<i32>} : memref<32x24xf32, #tpu.memory_space<vmem>>, vector<32x24xf32>,
    return
  }
}

module attributes {stable_mosaic.version = 11 : i64} {
  func.func @_enc_stack_kernel(%arg0: memref<32x72xf32, #tpu.memory_space<vmem>>, %arg1: memref<72x24xf32, #tpu.memory_space<vmem>>, %arg2: memref<1x24xf32, #tpu.memory_space<vmem>>, %arg3: memref<1x24xf32, #tpu.memory_space<vmem>>, %arg4: memref<1x24xf32, #tpu.memory_space<vmem>>, %arg5: memref<32x24xf32, #tpu.memory_space<vmem>>, %arg6: memref<32x24xf32, #tpu.memory_space<vmem>>) attributes {dimension_semantics = [], scalar_prefetch = 0 : i64, scratch_operands = 0 : i64, tpu.core_type = #tpu.core_type<tc>} {
    %c0 = arith.constant 0 : index
    %c0_0 = arith.constant 0 : index
    %0 = vector.load %arg0[%c0, %c0_0] : memref<32x72xf32, #tpu.memory_space<vmem>>, vector<32x72xf32>
    %cst = arith.constant 0.000000e+00 : f32
    %1 = vector.broadcast %cst : f32 to vector<32x72xf32>
    %2 = arith.cmpf oge, %0, %1 : vector<32x72xf32>
    %cst_1 = arith.constant 2.000000e-01 : f32
    %3 = vector.broadcast %cst_1 : f32 to vector<32x72xf32>
    %4 = arith.mulf %3, %0 : vector<32x72xf32>
    %5 = arith.select %2, %0, %4 : vector<32x72xi1>, vector<32x72xf32>
    %c0_2 = arith.constant 0 : index
    %c0_3 = arith.constant 0 : index
    %6 = vector.load %arg1[%c0_2, %c0_3] : memref<72x24xf32, #tpu.memory_space<vmem>>, vector<72x24xf32>
    %cst_4 = arith.constant dense<0.000000e+00> : vector<32x24xf32>
    %7 = tpu.matmul %5, %6, %cst_4 {dimension_numbers = #tpu.dot_dimension_numbers<[1], [0], [0], [1], [0, 0, 1, 1], [], []>} : vector<32x72xf32>, vector<72x24xf32>, vector<32x24xf32> -> vector<32x24xf32>
    %c0_5 = arith.constant 0 : index
    %c0_6 = arith.constant 0 : index
    %8 = vector.load %arg2[%c0_5, %c0_6] : memref<1x24xf32, #tpu.memory_space<vmem>>, vector<1x24xf32>
    %9 = vector.broadcast %8 : vector<1x24xf32> to vector<32x24xf32>
    %10 = arith.addf %7, %9 : vector<32x24xf32>
    %11 = tpu.iota {dimensions = array<i32: 0>} : vector<32x24xi32>
    %cst_7 = arith.constant 0.000000e+00 : f32
    %12 = vector.broadcast %cst_7 : f32 to vector<32x24xf32>
    %cst_8 = arith.constant 0.000000e+00 : f32
    %13 = vector.broadcast %cst_8 : f32 to vector<32x24xf32>
    %c0_i32 = arith.constant 0 : i32
    %14 = vector.broadcast %c0_i32 : i32 to vector<32x24xi32>
    %15 = arith.cmpi sge, %11, %14 : vector<32x24xi32>
    %c16_i32 = arith.constant 16 : i32
    %16 = vector.broadcast %c16_i32 : i32 to vector<32x24xi32>
    %17 = arith.cmpi slt, %11, %16 : vector<32x24xi32>
    %18 = arith.andi %15, %17 : vector<32x24xi1>
    %cst_9 = arith.constant 0.000000e+00 : f32
    %19 = vector.broadcast %cst_9 : f32 to vector<32x24xf32>
    %20 = arith.select %18, %10, %19 : vector<32x24xi1>, vector<32x24xf32>
    %cst_10 = arith.constant dense<0.000000e+00> : vector<32xf32>
    %21 = vector.multi_reduction <add>, %20, %cst_10 [1] : vector<32x24xf32> to vector<32xf32>
    %22 = vector.shape_cast %21 : vector<32xf32> to vector<32x1xf32>
    %cst_11 = arith.constant dense<0.000000e+00> : vector<1xf32>
    %23 = vector.multi_reduction <add>, %22, %cst_11 [0] : vector<32x1xf32> to vector<1xf32>
    %24 = vector.shape_cast %23 : vector<1xf32> to vector<1x1xf32>
    %cst_12 = arith.constant 0.00260416674 : f32
    %25 = vector.broadcast %cst_12 : f32 to vector<1x1xf32>
    %26 = arith.mulf %24, %25 : vector<1x1xf32>
    %27 = arith.mulf %20, %20 : vector<32x24xf32>
    %cst_13 = arith.constant dense<0.000000e+00> : vector<32xf32>
    %28 = vector.multi_reduction <add>, %27, %cst_13 [1] : vector<32x24xf32> to vector<32xf32>
    %29 = vector.shape_cast %28 : vector<32xf32> to vector<32x1xf32>
    %cst_14 = arith.constant dense<0.000000e+00> : vector<1xf32>
    %30 = vector.multi_reduction <add>, %29, %cst_14 [0] : vector<32x1xf32> to vector<1xf32>
    %31 = vector.shape_cast %30 : vector<1xf32> to vector<1x1xf32>
    %cst_15 = arith.constant 0.00260416674 : f32
    %32 = vector.broadcast %cst_15 : f32 to vector<1x1xf32>
    %33 = arith.mulf %31, %32 : vector<1x1xf32>
    %34 = arith.mulf %26, %26 : vector<1x1xf32>
    %35 = arith.subf %33, %34 : vector<1x1xf32>
    %36 = vector.shape_cast %26 : vector<1x1xf32> to vector<1x1xf32>
    %37 = vector.broadcast %36 : vector<1x1xf32> to vector<32x24xf32>
    %38 = arith.select %18, %37, %12 : vector<32x24xi1>, vector<32x24xf32>
    %39 = vector.shape_cast %35 : vector<1x1xf32> to vector<1x1xf32>
    %40 = vector.broadcast %39 : vector<1x1xf32> to vector<32x24xf32>
    %41 = arith.select %18, %40, %13 : vector<32x24xi1>, vector<32x24xf32>
    %c16_i32_16 = arith.constant 16 : i32
    %42 = vector.broadcast %c16_i32_16 : i32 to vector<32x24xi32>
    %43 = arith.cmpi sge, %11, %42 : vector<32x24xi32>
    %c32_i32 = arith.constant 32 : i32
    %44 = vector.broadcast %c32_i32 : i32 to vector<32x24xi32>
    %45 = arith.cmpi slt, %11, %44 : vector<32x24xi32>
    %46 = arith.andi %43, %45 : vector<32x24xi1>
    %cst_17 = arith.constant 0.000000e+00 : f32
    %47 = vector.broadcast %cst_17 : f32 to vector<32x24xf32>
    %48 = arith.select %46, %10, %47 : vector<32x24xi1>, vector<32x24xf32>
    %cst_18 = arith.constant dense<0.000000e+00> : vector<32xf32>
    %49 = vector.multi_reduction <add>, %48, %cst_18 [1] : vector<32x24xf32> to vector<32xf32>
    %50 = vector.shape_cast %49 : vector<32xf32> to vector<32x1xf32>
    %cst_19 = arith.constant dense<0.000000e+00> : vector<1xf32>
    %51 = vector.multi_reduction <add>, %50, %cst_19 [0] : vector<32x1xf32> to vector<1xf32>
    %52 = vector.shape_cast %51 : vector<1xf32> to vector<1x1xf32>
    %cst_20 = arith.constant 0.00260416674 : f32
    %53 = vector.broadcast %cst_20 : f32 to vector<1x1xf32>
    %54 = arith.mulf %52, %53 : vector<1x1xf32>
    %55 = arith.mulf %48, %48 : vector<32x24xf32>
    %cst_21 = arith.constant dense<0.000000e+00> : vector<32xf32>
    %56 = vector.multi_reduction <add>, %55, %cst_21 [1] : vector<32x24xf32> to vector<32xf32>
    %57 = vector.shape_cast %56 : vector<32xf32> to vector<32x1xf32>
    %cst_22 = arith.constant dense<0.000000e+00> : vector<1xf32>
    %58 = vector.multi_reduction <add>, %57, %cst_22 [0] : vector<32x1xf32> to vector<1xf32>
    %59 = vector.shape_cast %58 : vector<1xf32> to vector<1x1xf32>
    %cst_23 = arith.constant 0.00260416674 : f32
    %60 = vector.broadcast %cst_23 : f32 to vector<1x1xf32>
    %61 = arith.mulf %59, %60 : vector<1x1xf32>
    %62 = arith.mulf %54, %54 : vector<1x1xf32>
    %63 = arith.subf %61, %62 : vector<1x1xf32>
    %64 = vector.shape_cast %54 : vector<1x1xf32> to vector<1x1xf32>
    %65 = vector.broadcast %64 : vector<1x1xf32> to vector<32x24xf32>
    %66 = arith.select %46, %65, %38 : vector<32x24xi1>, vector<32x24xf32>
    %67 = vector.shape_cast %63 : vector<1x1xf32> to vector<1x1xf32>
    %68 = vector.broadcast %67 : vector<1x1xf32> to vector<32x24xf32>
    %69 = arith.select %46, %68, %41 : vector<32x24xi1>, vector<32x24xf32>
    %70 = arith.subf %10, %66 : vector<32x24xf32>
    %cst_24 = arith.constant 9.99999974E-6 : f32
    %71 = vector.broadcast %cst_24 : f32 to vector<32x24xf32>
    %72 = arith.addf %69, %71 : vector<32x24xf32>
    %73 = math.rsqrt %72 : vector<32x24xf32>
    %74 = arith.mulf %70, %73 : vector<32x24xf32>
    %c0_25 = arith.constant 0 : index
    %c0_26 = arith.constant 0 : index
    %75 = vector.load %arg3[%c0_25, %c0_26] : memref<1x24xf32, #tpu.memory_space<vmem>>, vector<1x24xf32>
    %76 = vector.broadcast %75 : vector<1x24xf32> to vector<32x24xf32>
    %77 = arith.mulf %74, %76 : vector<32x24xf32>
    %c0_27 = arith.constant 0 : index
    %c0_28 = arith.constant 0 : index
    %78 = vector.load %arg4[%c0_27, %c0_28] : memref<1x24xf32, #tpu.memory_space<vmem>>, vector<1x24xf32>
    %79 = vector.broadcast %78 : vector<1x24xf32> to vector<32x24xf32>
    %80 = arith.addf %77, %79 : vector<32x24xf32>
    %c0_29 = arith.constant 0 : index
    %c0_30 = arith.constant 0 : index
    %81 = vector.load %arg5[%c0_29, %c0_30] : memref<32x24xf32, #tpu.memory_space<vmem>>, vector<32x24xf32>
    %82 = arith.addf %80, %81 : vector<32x24xf32>
    %c0_31 = arith.constant 0 : index
    %c0_32 = arith.constant 0 : index
    %83 = vector.load %arg6[%c0_31, %c0_32] : memref<32x24xf32, #tpu.memory_space<vmem>>, vector<32x24xf32>
    tpu.vector_store %arg6[%c0_31, %c0_32], %82 {strides = array<i32>} : memref<32x24xf32, #tpu.memory_space<vmem>>, vector<32x24xf32>,
    return
  }
}

module attributes {stable_mosaic.version = 11 : i64} {
  func.func @_enc_stack_kernel(%arg0: memref<32x72xf32, #tpu.memory_space<vmem>>, %arg1: memref<72x24xf32, #tpu.memory_space<vmem>>, %arg2: memref<1x24xf32, #tpu.memory_space<vmem>>, %arg3: memref<1x24xf32, #tpu.memory_space<vmem>>, %arg4: memref<1x24xf32, #tpu.memory_space<vmem>>, %arg5: memref<32x24xf32, #tpu.memory_space<vmem>>) attributes {dimension_semantics = [], scalar_prefetch = 0 : i64, scratch_operands = 0 : i64, tpu.core_type = #tpu.core_type<tc>} {
    %c0 = arith.constant 0 : index
    %c0_0 = arith.constant 0 : index
    %0 = vector.load %arg0[%c0, %c0_0] : memref<32x72xf32, #tpu.memory_space<vmem>>, vector<32x72xf32>
    %cst = arith.constant 0.000000e+00 : f32
    %1 = vector.broadcast %cst : f32 to vector<32x72xf32>
    %2 = arith.cmpf oge, %0, %1 : vector<32x72xf32>
    %cst_1 = arith.constant 2.000000e-01 : f32
    %3 = vector.broadcast %cst_1 : f32 to vector<32x72xf32>
    %4 = arith.mulf %3, %0 : vector<32x72xf32>
    %5 = arith.select %2, %0, %4 : vector<32x72xi1>, vector<32x72xf32>
    %c0_2 = arith.constant 0 : index
    %c0_3 = arith.constant 0 : index
    %6 = vector.load %arg1[%c0_2, %c0_3] : memref<72x24xf32, #tpu.memory_space<vmem>>, vector<72x24xf32>
    %cst_4 = arith.constant dense<0.000000e+00> : vector<32x24xf32>
    %7 = tpu.matmul %5, %6, %cst_4 {dimension_numbers = #tpu.dot_dimension_numbers<[1], [0], [0], [1], [0, 0, 1, 1], [], []>} : vector<32x72xf32>, vector<72x24xf32>, vector<32x24xf32> -> vector<32x24xf32>
    %c0_5 = arith.constant 0 : index
    %c0_6 = arith.constant 0 : index
    %8 = vector.load %arg2[%c0_5, %c0_6] : memref<1x24xf32, #tpu.memory_space<vmem>>, vector<1x24xf32>
    %9 = vector.broadcast %8 : vector<1x24xf32> to vector<32x24xf32>
    %10 = arith.addf %7, %9 : vector<32x24xf32>
    %11 = tpu.iota {dimensions = array<i32: 0>} : vector<32x24xi32>
    %cst_7 = arith.constant 0.000000e+00 : f32
    %12 = vector.broadcast %cst_7 : f32 to vector<32x24xf32>
    %cst_8 = arith.constant 0.000000e+00 : f32
    %13 = vector.broadcast %cst_8 : f32 to vector<32x24xf32>
    %c0_i32 = arith.constant 0 : i32
    %14 = vector.broadcast %c0_i32 : i32 to vector<32x24xi32>
    %15 = arith.cmpi sge, %11, %14 : vector<32x24xi32>
    %c16_i32 = arith.constant 16 : i32
    %16 = vector.broadcast %c16_i32 : i32 to vector<32x24xi32>
    %17 = arith.cmpi slt, %11, %16 : vector<32x24xi32>
    %18 = arith.andi %15, %17 : vector<32x24xi1>
    %cst_9 = arith.constant 0.000000e+00 : f32
    %19 = vector.broadcast %cst_9 : f32 to vector<32x24xf32>
    %20 = arith.select %18, %10, %19 : vector<32x24xi1>, vector<32x24xf32>
    %cst_10 = arith.constant dense<0.000000e+00> : vector<32xf32>
    %21 = vector.multi_reduction <add>, %20, %cst_10 [1] : vector<32x24xf32> to vector<32xf32>
    %22 = vector.shape_cast %21 : vector<32xf32> to vector<32x1xf32>
    %cst_11 = arith.constant dense<0.000000e+00> : vector<1xf32>
    %23 = vector.multi_reduction <add>, %22, %cst_11 [0] : vector<32x1xf32> to vector<1xf32>
    %24 = vector.shape_cast %23 : vector<1xf32> to vector<1x1xf32>
    %cst_12 = arith.constant 0.00260416674 : f32
    %25 = vector.broadcast %cst_12 : f32 to vector<1x1xf32>
    %26 = arith.mulf %24, %25 : vector<1x1xf32>
    %27 = arith.mulf %20, %20 : vector<32x24xf32>
    %cst_13 = arith.constant dense<0.000000e+00> : vector<32xf32>
    %28 = vector.multi_reduction <add>, %27, %cst_13 [1] : vector<32x24xf32> to vector<32xf32>
    %29 = vector.shape_cast %28 : vector<32xf32> to vector<32x1xf32>
    %cst_14 = arith.constant dense<0.000000e+00> : vector<1xf32>
    %30 = vector.multi_reduction <add>, %29, %cst_14 [0] : vector<32x1xf32> to vector<1xf32>
    %31 = vector.shape_cast %30 : vector<1xf32> to vector<1x1xf32>
    %cst_15 = arith.constant 0.00260416674 : f32
    %32 = vector.broadcast %cst_15 : f32 to vector<1x1xf32>
    %33 = arith.mulf %31, %32 : vector<1x1xf32>
    %34 = arith.mulf %26, %26 : vector<1x1xf32>
    %35 = arith.subf %33, %34 : vector<1x1xf32>
    %36 = vector.shape_cast %26 : vector<1x1xf32> to vector<1x1xf32>
    %37 = vector.broadcast %36 : vector<1x1xf32> to vector<32x24xf32>
    %38 = arith.select %18, %37, %12 : vector<32x24xi1>, vector<32x24xf32>
    %39 = vector.shape_cast %35 : vector<1x1xf32> to vector<1x1xf32>
    %40 = vector.broadcast %39 : vector<1x1xf32> to vector<32x24xf32>
    %41 = arith.select %18, %40, %13 : vector<32x24xi1>, vector<32x24xf32>
    %c16_i32_16 = arith.constant 16 : i32
    %42 = vector.broadcast %c16_i32_16 : i32 to vector<32x24xi32>
    %43 = arith.cmpi sge, %11, %42 : vector<32x24xi32>
    %c32_i32 = arith.constant 32 : i32
    %44 = vector.broadcast %c32_i32 : i32 to vector<32x24xi32>
    %45 = arith.cmpi slt, %11, %44 : vector<32x24xi32>
    %46 = arith.andi %43, %45 : vector<32x24xi1>
    %cst_17 = arith.constant 0.000000e+00 : f32
    %47 = vector.broadcast %cst_17 : f32 to vector<32x24xf32>
    %48 = arith.select %46, %10, %47 : vector<32x24xi1>, vector<32x24xf32>
    %cst_18 = arith.constant dense<0.000000e+00> : vector<32xf32>
    %49 = vector.multi_reduction <add>, %48, %cst_18 [1] : vector<32x24xf32> to vector<32xf32>
    %50 = vector.shape_cast %49 : vector<32xf32> to vector<32x1xf32>
    %cst_19 = arith.constant dense<0.000000e+00> : vector<1xf32>
    %51 = vector.multi_reduction <add>, %50, %cst_19 [0] : vector<32x1xf32> to vector<1xf32>
    %52 = vector.shape_cast %51 : vector<1xf32> to vector<1x1xf32>
    %cst_20 = arith.constant 0.00260416674 : f32
    %53 = vector.broadcast %cst_20 : f32 to vector<1x1xf32>
    %54 = arith.mulf %52, %53 : vector<1x1xf32>
    %55 = arith.mulf %48, %48 : vector<32x24xf32>
    %cst_21 = arith.constant dense<0.000000e+00> : vector<32xf32>
    %56 = vector.multi_reduction <add>, %55, %cst_21 [1] : vector<32x24xf32> to vector<32xf32>
    %57 = vector.shape_cast %56 : vector<32xf32> to vector<32x1xf32>
    %cst_22 = arith.constant dense<0.000000e+00> : vector<1xf32>
    %58 = vector.multi_reduction <add>, %57, %cst_22 [0] : vector<32x1xf32> to vector<1xf32>
    %59 = vector.shape_cast %58 : vector<1xf32> to vector<1x1xf32>
    %cst_23 = arith.constant 0.00260416674 : f32
    %60 = vector.broadcast %cst_23 : f32 to vector<1x1xf32>
    %61 = arith.mulf %59, %60 : vector<1x1xf32>
    %62 = arith.mulf %54, %54 : vector<1x1xf32>
    %63 = arith.subf %61, %62 : vector<1x1xf32>
    %64 = vector.shape_cast %54 : vector<1x1xf32> to vector<1x1xf32>
    %65 = vector.broadcast %64 : vector<1x1xf32> to vector<32x24xf32>
    %66 = arith.select %46, %65, %38 : vector<32x24xi1>, vector<32x24xf32>
    %67 = vector.shape_cast %63 : vector<1x1xf32> to vector<1x1xf32>
    %68 = vector.broadcast %67 : vector<1x1xf32> to vector<32x24xf32>
    %69 = arith.select %46, %68, %41 : vector<32x24xi1>, vector<32x24xf32>
    %70 = arith.subf %10, %66 : vector<32x24xf32>
    %cst_24 = arith.constant 9.99999974E-6 : f32
    %71 = vector.broadcast %cst_24 : f32 to vector<32x24xf32>
    %72 = arith.addf %69, %71 : vector<32x24xf32>
    %73 = math.rsqrt %72 : vector<32x24xf32>
    %74 = arith.mulf %70, %73 : vector<32x24xf32>
    %c0_25 = arith.constant 0 : index
    %c0_26 = arith.constant 0 : index
    %75 = vector.load %arg3[%c0_25, %c0_26] : memref<1x24xf32, #tpu.memory_space<vmem>>, vector<1x24xf32>
    %76 = vector.broadcast %75 : vector<1x24xf32> to vector<32x24xf32>
    %77 = arith.mulf %74, %76 : vector<32x24xf32>
    %c0_27 = arith.constant 0 : index
    %c0_28 = arith.constant 0 : index
    %78 = vector.load %arg4[%c0_27, %c0_28] : memref<1x24xf32, #tpu.memory_space<vmem>>, vector<1x24xf32>
    %79 = vector.broadcast %78 : vector<1x24xf32> to vector<32x24xf32>
    %80 = arith.addf %77, %79 : vector<32x24xf32>
    %c0_29 = arith.constant 0 : index
    %c0_30 = arith.constant 0 : index
    %81 = vector.load %arg5[%c0_29, %c0_30] : memref<32x24xf32, #tpu.memory_space<vmem>>, vector<32x24xf32>
    tpu.vector_store %arg5[%c0_29, %c0_30], %80 {strides = array<i32>} : memref<32x24xf32, #tpu.memory_space<vmem>>, vector<32x24xf32>,
    return
  }
}

module attributes {stable_mosaic.version = 11 : i64} {
  func.func @_mm_kernel(%arg0: memref<32x120xf32, #tpu.memory_space<vmem>>, %arg1: memref<120x16xf32, #tpu.memory_space<vmem>>, %arg2: memref<1x16xf32, #tpu.memory_space<vmem>>, %arg3: memref<32x16xf32, #tpu.memory_space<vmem>>) attributes {dimension_semantics = [], scalar_prefetch = 0 : i64, scratch_operands = 0 : i64, tpu.core_type = #tpu.core_type<tc>} {
    %c0 = arith.constant 0 : index
    %c0_0 = arith.constant 0 : index
    %0 = vector.load %arg0[%c0, %c0_0] : memref<32x120xf32, #tpu.memory_space<vmem>>, vector<32x120xf32>
    %cst = arith.constant 0.000000e+00 : f32
    %1 = vector.broadcast %cst : f32 to vector<32x120xf32>
    %2 = arith.cmpf oge, %0, %1 : vector<32x120xf32>
    %cst_1 = arith.constant 2.000000e-01 : f32
    %3 = vector.broadcast %cst_1 : f32 to vector<32x120xf32>
    %4 = arith.mulf %3, %0 : vector<32x120xf32>
    %5 = arith.select %2, %0, %4 : vector<32x120xi1>, vector<32x120xf32>
    %c0_2 = arith.constant 0 : index
    %c0_3 = arith.constant 0 : index
    %6 = vector.load %arg1[%c0_2, %c0_3] : memref<120x16xf32, #tpu.memory_space<vmem>>, vector<120x16xf32>
    %cst_4 = arith.constant dense<0.000000e+00> : vector<32x16xf32>
    %7 = tpu.matmul %5, %6, %cst_4 {dimension_numbers = #tpu.dot_dimension_numbers<[1], [0], [0], [1], [0, 0, 1, 1], [], []>} : vector<32x120xf32>, vector<120x16xf32>, vector<32x16xf32> -> vector<32x16xf32>
    %c0_5 = arith.constant 0 : index
    %c0_6 = arith.constant 0 : index
    %8 = vector.load %arg2[%c0_5, %c0_6] : memref<1x16xf32, #tpu.memory_space<vmem>>, vector<1x16xf32>
    %9 = vector.broadcast %8 : vector<1x16xf32> to vector<32x16xf32>
    %10 = arith.addf %7, %9 : vector<32x16xf32>
    %c0_7 = arith.constant 0 : index
    %c0_8 = arith.constant 0 : index
    %11 = vector.load %arg3[%c0_7, %c0_8] : memref<32x16xf32, #tpu.memory_space<vmem>>, vector<32x16xf32>
    tpu.vector_store %arg3[%c0_7, %c0_8], %10 {strides = array<i32>} : memref<32x16xf32, #tpu.memory_space<vmem>>, vector<32x16xf32>,
    return
  }
}

module attributes {stable_mosaic.version = 11 : i64} {
  func.func @_enc_stack_kernel(%arg0: memref<32x48xf32, #tpu.memory_space<vmem>>, %arg1: memref<48x16xf32, #tpu.memory_space<vmem>>, %arg2: memref<1x16xf32, #tpu.memory_space<vmem>>, %arg3: memref<1x16xf32, #tpu.memory_space<vmem>>, %arg4: memref<1x16xf32, #tpu.memory_space<vmem>>, %arg5: memref<32x16xf32, #tpu.memory_space<vmem>>, %arg6: memref<32x16xf32, #tpu.memory_space<vmem>>) attributes {dimension_semantics = [], scalar_prefetch = 0 : i64, scratch_operands = 0 : i64, tpu.core_type = #tpu.core_type<tc>} {
    %c0 = arith.constant 0 : index
    %c0_0 = arith.constant 0 : index
    %0 = vector.load %arg0[%c0, %c0_0] : memref<32x48xf32, #tpu.memory_space<vmem>>, vector<32x48xf32>
    %cst = arith.constant 0.000000e+00 : f32
    %1 = vector.broadcast %cst : f32 to vector<32x48xf32>
    %2 = arith.cmpf oge, %0, %1 : vector<32x48xf32>
    %cst_1 = arith.constant 2.000000e-01 : f32
    %3 = vector.broadcast %cst_1 : f32 to vector<32x48xf32>
    %4 = arith.mulf %3, %0 : vector<32x48xf32>
    %5 = arith.select %2, %0, %4 : vector<32x48xi1>, vector<32x48xf32>
    %c0_2 = arith.constant 0 : index
    %c0_3 = arith.constant 0 : index
    %6 = vector.load %arg1[%c0_2, %c0_3] : memref<48x16xf32, #tpu.memory_space<vmem>>, vector<48x16xf32>
    %cst_4 = arith.constant dense<0.000000e+00> : vector<32x16xf32>
    %7 = tpu.matmul %5, %6, %cst_4 {dimension_numbers = #tpu.dot_dimension_numbers<[1], [0], [0], [1], [0, 0, 1, 1], [], []>} : vector<32x48xf32>, vector<48x16xf32>, vector<32x16xf32> -> vector<32x16xf32>
    %c0_5 = arith.constant 0 : index
    %c0_6 = arith.constant 0 : index
    %8 = vector.load %arg2[%c0_5, %c0_6] : memref<1x16xf32, #tpu.memory_space<vmem>>, vector<1x16xf32>
    %9 = vector.broadcast %8 : vector<1x16xf32> to vector<32x16xf32>
    %10 = arith.addf %7, %9 : vector<32x16xf32>
    %11 = tpu.iota {dimensions = array<i32: 0>} : vector<32x16xi32>
    %cst_7 = arith.constant 0.000000e+00 : f32
    %12 = vector.broadcast %cst_7 : f32 to vector<32x16xf32>
    %cst_8 = arith.constant 0.000000e+00 : f32
    %13 = vector.broadcast %cst_8 : f32 to vector<32x16xf32>
    %c0_i32 = arith.constant 0 : i32
    %14 = vector.broadcast %c0_i32 : i32 to vector<32x16xi32>
    %15 = arith.cmpi sge, %11, %14 : vector<32x16xi32>
    %c16_i32 = arith.constant 16 : i32
    %16 = vector.broadcast %c16_i32 : i32 to vector<32x16xi32>
    %17 = arith.cmpi slt, %11, %16 : vector<32x16xi32>
    %18 = arith.andi %15, %17 : vector<32x16xi1>
    %cst_9 = arith.constant 0.000000e+00 : f32
    %19 = vector.broadcast %cst_9 : f32 to vector<32x16xf32>
    %20 = arith.select %18, %10, %19 : vector<32x16xi1>, vector<32x16xf32>
    %cst_10 = arith.constant dense<0.000000e+00> : vector<32xf32>
    %21 = vector.multi_reduction <add>, %20, %cst_10 [1] : vector<32x16xf32> to vector<32xf32>
    %22 = vector.shape_cast %21 : vector<32xf32> to vector<32x1xf32>
    %cst_11 = arith.constant dense<0.000000e+00> : vector<1xf32>
    %23 = vector.multi_reduction <add>, %22, %cst_11 [0] : vector<32x1xf32> to vector<1xf32>
    %24 = vector.shape_cast %23 : vector<1xf32> to vector<1x1xf32>
    %cst_12 = arith.constant 3.906250e-03 : f32
    %25 = vector.broadcast %cst_12 : f32 to vector<1x1xf32>
    %26 = arith.mulf %24, %25 : vector<1x1xf32>
    %27 = arith.mulf %20, %20 : vector<32x16xf32>
    %cst_13 = arith.constant dense<0.000000e+00> : vector<32xf32>
    %28 = vector.multi_reduction <add>, %27, %cst_13 [1] : vector<32x16xf32> to vector<32xf32>
    %29 = vector.shape_cast %28 : vector<32xf32> to vector<32x1xf32>
    %cst_14 = arith.constant dense<0.000000e+00> : vector<1xf32>
    %30 = vector.multi_reduction <add>, %29, %cst_14 [0] : vector<32x1xf32> to vector<1xf32>
    %31 = vector.shape_cast %30 : vector<1xf32> to vector<1x1xf32>
    %cst_15 = arith.constant 3.906250e-03 : f32
    %32 = vector.broadcast %cst_15 : f32 to vector<1x1xf32>
    %33 = arith.mulf %31, %32 : vector<1x1xf32>
    %34 = arith.mulf %26, %26 : vector<1x1xf32>
    %35 = arith.subf %33, %34 : vector<1x1xf32>
    %36 = vector.shape_cast %26 : vector<1x1xf32> to vector<1x1xf32>
    %37 = vector.broadcast %36 : vector<1x1xf32> to vector<32x16xf32>
    %38 = arith.select %18, %37, %12 : vector<32x16xi1>, vector<32x16xf32>
    %39 = vector.shape_cast %35 : vector<1x1xf32> to vector<1x1xf32>
    %40 = vector.broadcast %39 : vector<1x1xf32> to vector<32x16xf32>
    %41 = arith.select %18, %40, %13 : vector<32x16xi1>, vector<32x16xf32>
    %c16_i32_16 = arith.constant 16 : i32
    %42 = vector.broadcast %c16_i32_16 : i32 to vector<32x16xi32>
    %43 = arith.cmpi sge, %11, %42 : vector<32x16xi32>
    %c32_i32 = arith.constant 32 : i32
    %44 = vector.broadcast %c32_i32 : i32 to vector<32x16xi32>
    %45 = arith.cmpi slt, %11, %44 : vector<32x16xi32>
    %46 = arith.andi %43, %45 : vector<32x16xi1>
    %cst_17 = arith.constant 0.000000e+00 : f32
    %47 = vector.broadcast %cst_17 : f32 to vector<32x16xf32>
    %48 = arith.select %46, %10, %47 : vector<32x16xi1>, vector<32x16xf32>
    %cst_18 = arith.constant dense<0.000000e+00> : vector<32xf32>
    %49 = vector.multi_reduction <add>, %48, %cst_18 [1] : vector<32x16xf32> to vector<32xf32>
    %50 = vector.shape_cast %49 : vector<32xf32> to vector<32x1xf32>
    %cst_19 = arith.constant dense<0.000000e+00> : vector<1xf32>
    %51 = vector.multi_reduction <add>, %50, %cst_19 [0] : vector<32x1xf32> to vector<1xf32>
    %52 = vector.shape_cast %51 : vector<1xf32> to vector<1x1xf32>
    %cst_20 = arith.constant 3.906250e-03 : f32
    %53 = vector.broadcast %cst_20 : f32 to vector<1x1xf32>
    %54 = arith.mulf %52, %53 : vector<1x1xf32>
    %55 = arith.mulf %48, %48 : vector<32x16xf32>
    %cst_21 = arith.constant dense<0.000000e+00> : vector<32xf32>
    %56 = vector.multi_reduction <add>, %55, %cst_21 [1] : vector<32x16xf32> to vector<32xf32>
    %57 = vector.shape_cast %56 : vector<32xf32> to vector<32x1xf32>
    %cst_22 = arith.constant dense<0.000000e+00> : vector<1xf32>
    %58 = vector.multi_reduction <add>, %57, %cst_22 [0] : vector<32x1xf32> to vector<1xf32>
    %59 = vector.shape_cast %58 : vector<1xf32> to vector<1x1xf32>
    %cst_23 = arith.constant 3.906250e-03 : f32
    %60 = vector.broadcast %cst_23 : f32 to vector<1x1xf32>
    %61 = arith.mulf %59, %60 : vector<1x1xf32>
    %62 = arith.mulf %54, %54 : vector<1x1xf32>
    %63 = arith.subf %61, %62 : vector<1x1xf32>
    %64 = vector.shape_cast %54 : vector<1x1xf32> to vector<1x1xf32>
    %65 = vector.broadcast %64 : vector<1x1xf32> to vector<32x16xf32>
    %66 = arith.select %46, %65, %38 : vector<32x16xi1>, vector<32x16xf32>
    %67 = vector.shape_cast %63 : vector<1x1xf32> to vector<1x1xf32>
    %68 = vector.broadcast %67 : vector<1x1xf32> to vector<32x16xf32>
    %69 = arith.select %46, %68, %41 : vector<32x16xi1>, vector<32x16xf32>
    %70 = arith.subf %10, %66 : vector<32x16xf32>
    %cst_24 = arith.constant 9.99999974E-6 : f32
    %71 = vector.broadcast %cst_24 : f32 to vector<32x16xf32>
    %72 = arith.addf %69, %71 : vector<32x16xf32>
    %73 = math.rsqrt %72 : vector<32x16xf32>
    %74 = arith.mulf %70, %73 : vector<32x16xf32>
    %c0_25 = arith.constant 0 : index
    %c0_26 = arith.constant 0 : index
    %75 = vector.load %arg3[%c0_25, %c0_26] : memref<1x16xf32, #tpu.memory_space<vmem>>, vector<1x16xf32>
    %76 = vector.broadcast %75 : vector<1x16xf32> to vector<32x16xf32>
    %77 = arith.mulf %74, %76 : vector<32x16xf32>
    %c0_27 = arith.constant 0 : index
    %c0_28 = arith.constant 0 : index
    %78 = vector.load %arg4[%c0_27, %c0_28] : memref<1x16xf32, #tpu.memory_space<vmem>>, vector<1x16xf32>
    %79 = vector.broadcast %78 : vector<1x16xf32> to vector<32x16xf32>
    %80 = arith.addf %77, %79 : vector<32x16xf32>
    %c0_29 = arith.constant 0 : index
    %c0_30 = arith.constant 0 : index
    %81 = vector.load %arg5[%c0_29, %c0_30] : memref<32x16xf32, #tpu.memory_space<vmem>>, vector<32x16xf32>
    %82 = arith.addf %80, %81 : vector<32x16xf32>
    %c0_31 = arith.constant 0 : index
    %c0_32 = arith.constant 0 : index
    %83 = vector.load %arg6[%c0_31, %c0_32] : memref<32x16xf32, #tpu.memory_space<vmem>>, vector<32x16xf32>
    tpu.vector_store %arg6[%c0_31, %c0_32], %82 {strides = array<i32>} : memref<32x16xf32, #tpu.memory_space<vmem>>, vector<32x16xf32>,
    return
  }
}

module attributes {stable_mosaic.version = 11 : i64} {
  func.func @_enc_stack_kernel(%arg0: memref<32x48xf32, #tpu.memory_space<vmem>>, %arg1: memref<48x16xf32, #tpu.memory_space<vmem>>, %arg2: memref<1x16xf32, #tpu.memory_space<vmem>>, %arg3: memref<1x16xf32, #tpu.memory_space<vmem>>, %arg4: memref<1x16xf32, #tpu.memory_space<vmem>>, %arg5: memref<32x16xf32, #tpu.memory_space<vmem>>) attributes {dimension_semantics = [], scalar_prefetch = 0 : i64, scratch_operands = 0 : i64, tpu.core_type = #tpu.core_type<tc>} {
    %c0 = arith.constant 0 : index
    %c0_0 = arith.constant 0 : index
    %0 = vector.load %arg0[%c0, %c0_0] : memref<32x48xf32, #tpu.memory_space<vmem>>, vector<32x48xf32>
    %cst = arith.constant 0.000000e+00 : f32
    %1 = vector.broadcast %cst : f32 to vector<32x48xf32>
    %2 = arith.cmpf oge, %0, %1 : vector<32x48xf32>
    %cst_1 = arith.constant 2.000000e-01 : f32
    %3 = vector.broadcast %cst_1 : f32 to vector<32x48xf32>
    %4 = arith.mulf %3, %0 : vector<32x48xf32>
    %5 = arith.select %2, %0, %4 : vector<32x48xi1>, vector<32x48xf32>
    %c0_2 = arith.constant 0 : index
    %c0_3 = arith.constant 0 : index
    %6 = vector.load %arg1[%c0_2, %c0_3] : memref<48x16xf32, #tpu.memory_space<vmem>>, vector<48x16xf32>
    %cst_4 = arith.constant dense<0.000000e+00> : vector<32x16xf32>
    %7 = tpu.matmul %5, %6, %cst_4 {dimension_numbers = #tpu.dot_dimension_numbers<[1], [0], [0], [1], [0, 0, 1, 1], [], []>} : vector<32x48xf32>, vector<48x16xf32>, vector<32x16xf32> -> vector<32x16xf32>
    %c0_5 = arith.constant 0 : index
    %c0_6 = arith.constant 0 : index
    %8 = vector.load %arg2[%c0_5, %c0_6] : memref<1x16xf32, #tpu.memory_space<vmem>>, vector<1x16xf32>
    %9 = vector.broadcast %8 : vector<1x16xf32> to vector<32x16xf32>
    %10 = arith.addf %7, %9 : vector<32x16xf32>
    %11 = tpu.iota {dimensions = array<i32: 0>} : vector<32x16xi32>
    %cst_7 = arith.constant 0.000000e+00 : f32
    %12 = vector.broadcast %cst_7 : f32 to vector<32x16xf32>
    %cst_8 = arith.constant 0.000000e+00 : f32
    %13 = vector.broadcast %cst_8 : f32 to vector<32x16xf32>
    %c0_i32 = arith.constant 0 : i32
    %14 = vector.broadcast %c0_i32 : i32 to vector<32x16xi32>
    %15 = arith.cmpi sge, %11, %14 : vector<32x16xi32>
    %c16_i32 = arith.constant 16 : i32
    %16 = vector.broadcast %c16_i32 : i32 to vector<32x16xi32>
    %17 = arith.cmpi slt, %11, %16 : vector<32x16xi32>
    %18 = arith.andi %15, %17 : vector<32x16xi1>
    %cst_9 = arith.constant 0.000000e+00 : f32
    %19 = vector.broadcast %cst_9 : f32 to vector<32x16xf32>
    %20 = arith.select %18, %10, %19 : vector<32x16xi1>, vector<32x16xf32>
    %cst_10 = arith.constant dense<0.000000e+00> : vector<32xf32>
    %21 = vector.multi_reduction <add>, %20, %cst_10 [1] : vector<32x16xf32> to vector<32xf32>
    %22 = vector.shape_cast %21 : vector<32xf32> to vector<32x1xf32>
    %cst_11 = arith.constant dense<0.000000e+00> : vector<1xf32>
    %23 = vector.multi_reduction <add>, %22, %cst_11 [0] : vector<32x1xf32> to vector<1xf32>
    %24 = vector.shape_cast %23 : vector<1xf32> to vector<1x1xf32>
    %cst_12 = arith.constant 3.906250e-03 : f32
    %25 = vector.broadcast %cst_12 : f32 to vector<1x1xf32>
    %26 = arith.mulf %24, %25 : vector<1x1xf32>
    %27 = arith.mulf %20, %20 : vector<32x16xf32>
    %cst_13 = arith.constant dense<0.000000e+00> : vector<32xf32>
    %28 = vector.multi_reduction <add>, %27, %cst_13 [1] : vector<32x16xf32> to vector<32xf32>
    %29 = vector.shape_cast %28 : vector<32xf32> to vector<32x1xf32>
    %cst_14 = arith.constant dense<0.000000e+00> : vector<1xf32>
    %30 = vector.multi_reduction <add>, %29, %cst_14 [0] : vector<32x1xf32> to vector<1xf32>
    %31 = vector.shape_cast %30 : vector<1xf32> to vector<1x1xf32>
    %cst_15 = arith.constant 3.906250e-03 : f32
    %32 = vector.broadcast %cst_15 : f32 to vector<1x1xf32>
    %33 = arith.mulf %31, %32 : vector<1x1xf32>
    %34 = arith.mulf %26, %26 : vector<1x1xf32>
    %35 = arith.subf %33, %34 : vector<1x1xf32>
    %36 = vector.shape_cast %26 : vector<1x1xf32> to vector<1x1xf32>
    %37 = vector.broadcast %36 : vector<1x1xf32> to vector<32x16xf32>
    %38 = arith.select %18, %37, %12 : vector<32x16xi1>, vector<32x16xf32>
    %39 = vector.shape_cast %35 : vector<1x1xf32> to vector<1x1xf32>
    %40 = vector.broadcast %39 : vector<1x1xf32> to vector<32x16xf32>
    %41 = arith.select %18, %40, %13 : vector<32x16xi1>, vector<32x16xf32>
    %c16_i32_16 = arith.constant 16 : i32
    %42 = vector.broadcast %c16_i32_16 : i32 to vector<32x16xi32>
    %43 = arith.cmpi sge, %11, %42 : vector<32x16xi32>
    %c32_i32 = arith.constant 32 : i32
    %44 = vector.broadcast %c32_i32 : i32 to vector<32x16xi32>
    %45 = arith.cmpi slt, %11, %44 : vector<32x16xi32>
    %46 = arith.andi %43, %45 : vector<32x16xi1>
    %cst_17 = arith.constant 0.000000e+00 : f32
    %47 = vector.broadcast %cst_17 : f32 to vector<32x16xf32>
    %48 = arith.select %46, %10, %47 : vector<32x16xi1>, vector<32x16xf32>
    %cst_18 = arith.constant dense<0.000000e+00> : vector<32xf32>
    %49 = vector.multi_reduction <add>, %48, %cst_18 [1] : vector<32x16xf32> to vector<32xf32>
    %50 = vector.shape_cast %49 : vector<32xf32> to vector<32x1xf32>
    %cst_19 = arith.constant dense<0.000000e+00> : vector<1xf32>
    %51 = vector.multi_reduction <add>, %50, %cst_19 [0] : vector<32x1xf32> to vector<1xf32>
    %52 = vector.shape_cast %51 : vector<1xf32> to vector<1x1xf32>
    %cst_20 = arith.constant 3.906250e-03 : f32
    %53 = vector.broadcast %cst_20 : f32 to vector<1x1xf32>
    %54 = arith.mulf %52, %53 : vector<1x1xf32>
    %55 = arith.mulf %48, %48 : vector<32x16xf32>
    %cst_21 = arith.constant dense<0.000000e+00> : vector<32xf32>
    %56 = vector.multi_reduction <add>, %55, %cst_21 [1] : vector<32x16xf32> to vector<32xf32>
    %57 = vector.shape_cast %56 : vector<32xf32> to vector<32x1xf32>
    %cst_22 = arith.constant dense<0.000000e+00> : vector<1xf32>
    %58 = vector.multi_reduction <add>, %57, %cst_22 [0] : vector<32x1xf32> to vector<1xf32>
    %59 = vector.shape_cast %58 : vector<1xf32> to vector<1x1xf32>
    %cst_23 = arith.constant 3.906250e-03 : f32
    %60 = vector.broadcast %cst_23 : f32 to vector<1x1xf32>
    %61 = arith.mulf %59, %60 : vector<1x1xf32>
    %62 = arith.mulf %54, %54 : vector<1x1xf32>
    %63 = arith.subf %61, %62 : vector<1x1xf32>
    %64 = vector.shape_cast %54 : vector<1x1xf32> to vector<1x1xf32>
    %65 = vector.broadcast %64 : vector<1x1xf32> to vector<32x16xf32>
    %66 = arith.select %46, %65, %38 : vector<32x16xi1>, vector<32x16xf32>
    %67 = vector.shape_cast %63 : vector<1x1xf32> to vector<1x1xf32>
    %68 = vector.broadcast %67 : vector<1x1xf32> to vector<32x16xf32>
    %69 = arith.select %46, %68, %41 : vector<32x16xi1>, vector<32x16xf32>
    %70 = arith.subf %10, %66 : vector<32x16xf32>
    %cst_24 = arith.constant 9.99999974E-6 : f32
    %71 = vector.broadcast %cst_24 : f32 to vector<32x16xf32>
    %72 = arith.addf %69, %71 : vector<32x16xf32>
    %73 = math.rsqrt %72 : vector<32x16xf32>
    %74 = arith.mulf %70, %73 : vector<32x16xf32>
    %c0_25 = arith.constant 0 : index
    %c0_26 = arith.constant 0 : index
    %75 = vector.load %arg3[%c0_25, %c0_26] : memref<1x16xf32, #tpu.memory_space<vmem>>, vector<1x16xf32>
    %76 = vector.broadcast %75 : vector<1x16xf32> to vector<32x16xf32>
    %77 = arith.mulf %74, %76 : vector<32x16xf32>
    %c0_27 = arith.constant 0 : index
    %c0_28 = arith.constant 0 : index
    %78 = vector.load %arg4[%c0_27, %c0_28] : memref<1x16xf32, #tpu.memory_space<vmem>>, vector<1x16xf32>
    %79 = vector.broadcast %78 : vector<1x16xf32> to vector<32x16xf32>
    %80 = arith.addf %77, %79 : vector<32x16xf32>
    %c0_29 = arith.constant 0 : index
    %c0_30 = arith.constant 0 : index
    %81 = vector.load %arg5[%c0_29, %c0_30] : memref<32x16xf32, #tpu.memory_space<vmem>>, vector<32x16xf32>
    tpu.vector_store %arg5[%c0_29, %c0_30], %80 {strides = array<i32>} : memref<32x16xf32, #tpu.memory_space<vmem>>, vector<32x16xf32>,
    return
  }
}

module attributes {stable_mosaic.version = 11 : i64} {
  func.func @_zvq_kernel(%arg0: memref<32x16xf32, #tpu.memory_space<vmem>>, %arg1: memref<16x8xf32, #tpu.memory_space<vmem>>, %arg2: memref<1x8xf32, #tpu.memory_space<vmem>>, %arg3: memref<32x8xf32, #tpu.memory_space<vmem>>, %arg4: memref<1x32xf32, #tpu.memory_space<vmem>>, %arg5: memref<32x8xf32, #tpu.memory_space<vmem>>) attributes {dimension_semantics = [], scalar_prefetch = 0 : i64, scratch_operands = 0 : i64, tpu.core_type = #tpu.core_type<tc>} {
    %c0 = arith.constant 0 : index
    %c0_0 = arith.constant 0 : index
    %0 = vector.load %arg0[%c0, %c0_0] : memref<32x16xf32, #tpu.memory_space<vmem>>, vector<32x16xf32>
    %cst = arith.constant 0.000000e+00 : f32
    %1 = vector.broadcast %cst : f32 to vector<32x16xf32>
    %2 = arith.cmpf oge, %0, %1 : vector<32x16xf32>
    %cst_1 = arith.constant 2.000000e-01 : f32
    %3 = vector.broadcast %cst_1 : f32 to vector<32x16xf32>
    %4 = arith.mulf %3, %0 : vector<32x16xf32>
    %5 = arith.select %2, %0, %4 : vector<32x16xi1>, vector<32x16xf32>
    %c0_2 = arith.constant 0 : index
    %c0_3 = arith.constant 0 : index
    %6 = vector.load %arg1[%c0_2, %c0_3] : memref<16x8xf32, #tpu.memory_space<vmem>>, vector<16x8xf32>
    %cst_4 = arith.constant dense<0.000000e+00> : vector<32x8xf32>
    %7 = tpu.matmul %5, %6, %cst_4 {dimension_numbers = #tpu.dot_dimension_numbers<[1], [0], [0], [1], [0, 0, 1, 1], [], []>} : vector<32x16xf32>, vector<16x8xf32>, vector<32x8xf32> -> vector<32x8xf32>
    %c0_5 = arith.constant 0 : index
    %c0_6 = arith.constant 0 : index
    %8 = vector.load %arg2[%c0_5, %c0_6] : memref<1x8xf32, #tpu.memory_space<vmem>>, vector<1x8xf32>
    %9 = vector.broadcast %8 : vector<1x8xf32> to vector<32x8xf32>
    %10 = arith.addf %7, %9 : vector<32x8xf32>
    %c0_7 = arith.constant 0 : index
    %c0_8 = arith.constant 0 : index
    %11 = vector.load %arg3[%c0_7, %c0_8] : memref<32x8xf32, #tpu.memory_space<vmem>>, vector<32x8xf32>
    %12 = arith.mulf %10, %10 : vector<32x8xf32>
    %cst_9 = arith.constant dense<0.000000e+00> : vector<32xf32>
    %13 = vector.multi_reduction <add>, %12, %cst_9 [1] : vector<32x8xf32> to vector<32xf32>
    %14 = vector.shape_cast %13 : vector<32xf32> to vector<32x1xf32>
    %cst_10 = arith.constant dense<0.000000e+00> : vector<32x32xf32>
    %15 = tpu.matmul %10, %11, %cst_10 {dimension_numbers = #tpu.dot_dimension_numbers<[1], [1], [0], [0], [0, 0, 1, 0], [], []>} : vector<32x8xf32>, vector<32x8xf32>, vector<32x32xf32> -> vector<32x32xf32>
    %cst_11 = arith.constant 2.000000e+00 : f32
    %16 = vector.broadcast %cst_11 : f32 to vector<32x32xf32>
    %17 = arith.mulf %16, %15 : vector<32x32xf32>
    %18 = vector.broadcast %14 : vector<32x1xf32> to vector<32x32xf32>
    %19 = arith.subf %18, %17 : vector<32x32xf32>
    %c0_12 = arith.constant 0 : index
    %c0_13 = arith.constant 0 : index
    %20 = vector.load %arg4[%c0_12, %c0_13] : memref<1x32xf32, #tpu.memory_space<vmem>>, vector<1x32xf32>
    %21 = vector.broadcast %20 : vector<1x32xf32> to vector<32x32xf32>
    %22 = arith.addf %19, %21 : vector<32x32xf32>
    %23 = tpu.iota {dimensions = array<i32: 1>} : vector<32x32xi32>
    %cst_14 = arith.constant dense<0x7F800000> : vector<32xf32>
    %24 = vector.multi_reduction <minimumf>, %22, %cst_14 [1] : vector<32x32xf32> to vector<32xf32>
    %25 = vector.shape_cast %24 : vector<32xf32> to vector<32x1xf32>
    %26 = vector.broadcast %25 : vector<32x1xf32> to vector<32x32xf32>
    %27 = arith.cmpf ole, %22, %26 : vector<32x32xf32>
    %c32_i32 = arith.constant 32 : i32
    %28 = vector.broadcast %c32_i32 : i32 to vector<32x32xi32>
    %29 = arith.select %27, %23, %28 : vector<32x32xi1>, vector<32x32xi32>
    %cst_15 = arith.constant dense<2147483647> : vector<32xi32>
    %30 = vector.multi_reduction <minsi>, %29, %cst_15 [1] : vector<32x32xi32> to vector<32xi32>
    %31 = vector.shape_cast %30 : vector<32xi32> to vector<32x1xi32>
    %32 = vector.broadcast %31 : vector<32x1xi32> to vector<32x32xi32>
    %33 = arith.cmpi eq, %23, %32 : vector<32x32xi32>
    %34 = arith.extui %33 : vector<32x32xi1> to vector<32x32xi32>
    %35 = arith.sitofp %34 : vector<32x32xi32> to vector<32x32xf32>
    %cst_16 = arith.constant dense<0.000000e+00> : vector<32x8xf32>
    %36 = tpu.matmul %35, %11, %cst_16 {dimension_numbers = #tpu.dot_dimension_numbers<[1], [0], [0], [1], [0, 0, 1, 1], [], []>} : vector<32x32xf32>, vector<32x8xf32>, vector<32x8xf32> -> vector<32x8xf32>
    %c0_17 = arith.constant 0 : index
    %c0_18 = arith.constant 0 : index
    %37 = vector.load %arg5[%c0_17, %c0_18] : memref<32x8xf32, #tpu.memory_space<vmem>>, vector<32x8xf32>
    tpu.vector_store %arg5[%c0_17, %c0_18], %36 {strides = array<i32>} : memref<32x8xf32, #tpu.memory_space<vmem>>, vector<32x8xf32>,
    return
  }
}

module attributes {stable_mosaic.version = 11 : i64} {
  func.func @_mm_kernel(%arg0: memref<32x40xf32, #tpu.memory_space<vmem>>, %arg1: memref<40x24xf32, #tpu.memory_space<vmem>>, %arg2: memref<1x24xf32, #tpu.memory_space<vmem>>, %arg3: memref<32x24xf32, #tpu.memory_space<vmem>>) attributes {dimension_semantics = [], scalar_prefetch = 0 : i64, scratch_operands = 0 : i64, tpu.core_type = #tpu.core_type<tc>} {
    %c0 = arith.constant 0 : index
    %c0_0 = arith.constant 0 : index
    %0 = vector.load %arg0[%c0, %c0_0] : memref<32x40xf32, #tpu.memory_space<vmem>>, vector<32x40xf32>
    %c0_1 = arith.constant 0 : index
    %c0_2 = arith.constant 0 : index
    %1 = vector.load %arg1[%c0_1, %c0_2] : memref<40x24xf32, #tpu.memory_space<vmem>>, vector<40x24xf32>
    %cst = arith.constant dense<0.000000e+00> : vector<32x24xf32>
    %2 = tpu.matmul %0, %1, %cst {dimension_numbers = #tpu.dot_dimension_numbers<[1], [0], [0], [1], [0, 0, 1, 1], [], []>} : vector<32x40xf32>, vector<40x24xf32>, vector<32x24xf32> -> vector<32x24xf32>
    %c0_3 = arith.constant 0 : index
    %c0_4 = arith.constant 0 : index
    %3 = vector.load %arg2[%c0_3, %c0_4] : memref<1x24xf32, #tpu.memory_space<vmem>>, vector<1x24xf32>
    %4 = vector.broadcast %3 : vector<1x24xf32> to vector<32x24xf32>
    %5 = arith.addf %2, %4 : vector<32x24xf32>
    %c0_5 = arith.constant 0 : index
    %c0_6 = arith.constant 0 : index
    %6 = vector.load %arg3[%c0_5, %c0_6] : memref<32x24xf32, #tpu.memory_space<vmem>>, vector<32x24xf32>
    tpu.vector_store %arg3[%c0_5, %c0_6], %5 {strides = array<i32>} : memref<32x24xf32, #tpu.memory_space<vmem>>, vector<32x24xf32>,
    return
  }
}

module attributes {stable_mosaic.version = 11 : i64} {
  func.func @_mm_kernel(%arg0: memref<2x8xf32, #tpu.memory_space<vmem>>, %arg1: memref<8x80xf32, #tpu.memory_space<vmem>>, %arg2: memref<1x80xf32, #tpu.memory_space<vmem>>, %arg3: memref<2x80xf32, #tpu.memory_space<vmem>>) attributes {dimension_semantics = [], scalar_prefetch = 0 : i64, scratch_operands = 0 : i64, tpu.core_type = #tpu.core_type<tc>} {
    %c0 = arith.constant 0 : index
    %c0_0 = arith.constant 0 : index
    %0 = vector.load %arg0[%c0, %c0_0] : memref<2x8xf32, #tpu.memory_space<vmem>>, vector<2x8xf32>
    %c0_1 = arith.constant 0 : index
    %c0_2 = arith.constant 0 : index
    %1 = vector.load %arg1[%c0_1, %c0_2] : memref<8x80xf32, #tpu.memory_space<vmem>>, vector<8x80xf32>
    %cst = arith.constant dense<0.000000e+00> : vector<2x80xf32>
    %2 = tpu.matmul %0, %1, %cst {dimension_numbers = #tpu.dot_dimension_numbers<[1], [0], [0], [1], [0, 0, 1, 1], [], []>} : vector<2x8xf32>, vector<8x80xf32>, vector<2x80xf32> -> vector<2x80xf32>
    %c0_3 = arith.constant 0 : index
    %c0_4 = arith.constant 0 : index
    %3 = vector.load %arg2[%c0_3, %c0_4] : memref<1x80xf32, #tpu.memory_space<vmem>>, vector<1x80xf32>
    %4 = vector.broadcast %3 : vector<1x80xf32> to vector<2x80xf32>
    %5 = arith.addf %2, %4 : vector<2x80xf32>
    %c0_5 = arith.constant 0 : index
    %c0_6 = arith.constant 0 : index
    %6 = vector.load %arg3[%c0_5, %c0_6] : memref<2x80xf32, #tpu.memory_space<vmem>>, vector<2x80xf32>
    tpu.vector_store %arg3[%c0_5, %c0_6], %5 {strides = array<i32>} : memref<2x80xf32, #tpu.memory_space<vmem>>, vector<2x80xf32>,
    return
  }
}

module attributes {stable_mosaic.version = 11 : i64} {
  func.func @_dec_stack_kernel(%arg0: memref<32x72xf32, #tpu.memory_space<vmem>>, %arg1: memref<72x24xf32, #tpu.memory_space<vmem>>, %arg2: memref<72x24xf32, #tpu.memory_space<vmem>>, %arg3: memref<32x24xf32, #tpu.memory_space<vmem>>, %arg4: memref<32x24xf32, #tpu.memory_space<vmem>>, %arg5: memref<24x16xf32, #tpu.memory_space<vmem>>, %arg6: memref<1x16xf32, #tpu.memory_space<vmem>>, %arg7: memref<24x24xf32, #tpu.memory_space<vmem>>, %arg8: memref<1x24xf32, #tpu.memory_space<vmem>>, %arg9: memref<32x24xf32, #tpu.memory_space<vmem>>, %arg10: memref<32x16xf32, #tpu.memory_space<vmem>>, %arg11: memref<32x24xf32, #tpu.memory_space<vmem>>, %arg12: memref<32x16xf32, #tpu.memory_space<vmem>>) attributes {dimension_semantics = [], scalar_prefetch = 0 : i64, scratch_operands = 0 : i64, tpu.core_type = #tpu.core_type<tc>} {
    %c0 = arith.constant 0 : index
    %c0_0 = arith.constant 0 : index
    %0 = vector.load %arg0[%c0, %c0_0] : memref<32x72xf32, #tpu.memory_space<vmem>>, vector<32x72xf32>
    %c0_1 = arith.constant 0 : index
    %c0_2 = arith.constant 0 : index
    %1 = vector.load %arg1[%c0_1, %c0_2] : memref<72x24xf32, #tpu.memory_space<vmem>>, vector<72x24xf32>
    %cst = arith.constant dense<0.000000e+00> : vector<32x24xf32>
    %2 = tpu.matmul %0, %1, %cst {dimension_numbers = #tpu.dot_dimension_numbers<[1], [0], [0], [1], [0, 0, 1, 1], [], []>} : vector<32x72xf32>, vector<72x24xf32>, vector<32x24xf32> -> vector<32x24xf32>
    %c0_3 = arith.constant 0 : index
    %c0_4 = arith.constant 0 : index
    %3 = vector.load %arg3[%c0_3, %c0_4] : memref<32x24xf32, #tpu.memory_space<vmem>>, vector<32x24xf32>
    %4 = arith.addf %2, %3 : vector<32x24xf32>
    %c0_5 = arith.constant 0 : index
    %c0_6 = arith.constant 0 : index
    %5 = vector.load %arg2[%c0_5, %c0_6] : memref<72x24xf32, #tpu.memory_space<vmem>>, vector<72x24xf32>
    %cst_7 = arith.constant dense<0.000000e+00> : vector<32x24xf32>
    %6 = tpu.matmul %0, %5, %cst_7 {dimension_numbers = #tpu.dot_dimension_numbers<[1], [0], [0], [1], [0, 0, 1, 1], [], []>} : vector<32x72xf32>, vector<72x24xf32>, vector<32x24xf32> -> vector<32x24xf32>
    %c0_8 = arith.constant 0 : index
    %c0_9 = arith.constant 0 : index
    %7 = vector.load %arg4[%c0_8, %c0_9] : memref<32x24xf32, #tpu.memory_space<vmem>>, vector<32x24xf32>
    %8 = arith.addf %6, %7 : vector<32x24xf32>
    %9 = arith.negf %8 : vector<32x24xf32>
    %10 = math.exp %9 : vector<32x24xf32>
    %cst_10 = arith.constant 1.000000e+00 : f32
    %11 = vector.broadcast %cst_10 : f32 to vector<32x24xf32>
    %12 = arith.addf %11, %10 : vector<32x24xf32>
    %13 = arith.divf %11, %12 : vector<32x24xf32>
    %14 = arith.mulf %4, %13 : vector<32x24xf32>
    %c0_11 = arith.constant 0 : index
    %c0_12 = arith.constant 0 : index
    %15 = vector.load %arg5[%c0_11, %c0_12] : memref<24x16xf32, #tpu.memory_space<vmem>>, vector<24x16xf32>
    %cst_13 = arith.constant dense<0.000000e+00> : vector<32x16xf32>
    %16 = tpu.matmul %14, %15, %cst_13 {dimension_numbers = #tpu.dot_dimension_numbers<[1], [0], [0], [1], [0, 0, 1, 1], [], []>} : vector<32x24xf32>, vector<24x16xf32>, vector<32x16xf32> -> vector<32x16xf32>
    %c0_14 = arith.constant 0 : index
    %c0_15 = arith.constant 0 : index
    %17 = vector.load %arg6[%c0_14, %c0_15] : memref<1x16xf32, #tpu.memory_space<vmem>>, vector<1x16xf32>
    %18 = vector.broadcast %17 : vector<1x16xf32> to vector<32x16xf32>
    %19 = arith.addf %16, %18 : vector<32x16xf32>
    %c0_16 = arith.constant 0 : index
    %c0_17 = arith.constant 0 : index
    %20 = vector.load %arg7[%c0_16, %c0_17] : memref<24x24xf32, #tpu.memory_space<vmem>>, vector<24x24xf32>
    %cst_18 = arith.constant dense<0.000000e+00> : vector<32x24xf32>
    %21 = tpu.matmul %14, %20, %cst_18 {dimension_numbers = #tpu.dot_dimension_numbers<[1], [0], [0], [1], [0, 0, 1, 1], [], []>} : vector<32x24xf32>, vector<24x24xf32>, vector<32x24xf32> -> vector<32x24xf32>
    %c0_19 = arith.constant 0 : index
    %c0_20 = arith.constant 0 : index
    %22 = vector.load %arg8[%c0_19, %c0_20] : memref<1x24xf32, #tpu.memory_space<vmem>>, vector<1x24xf32>
    %23 = vector.broadcast %22 : vector<1x24xf32> to vector<32x24xf32>
    %24 = arith.addf %21, %23 : vector<32x24xf32>
    %c0_21 = arith.constant 0 : index
    %c0_22 = arith.constant 0 : index
    %25 = vector.load %arg9[%c0_21, %c0_22] : memref<32x24xf32, #tpu.memory_space<vmem>>, vector<32x24xf32>
    %26 = arith.addf %24, %25 : vector<32x24xf32>
    %cst_23 = arith.constant 0.707106769 : f32
    %27 = vector.broadcast %cst_23 : f32 to vector<32x24xf32>
    %28 = arith.mulf %26, %27 : vector<32x24xf32>
    %c0_24 = arith.constant 0 : index
    %c0_25 = arith.constant 0 : index
    %29 = vector.load %arg11[%c0_24, %c0_25] : memref<32x24xf32, #tpu.memory_space<vmem>>, vector<32x24xf32>
    tpu.vector_store %arg11[%c0_24, %c0_25], %28 {strides = array<i32>} : memref<32x24xf32, #tpu.memory_space<vmem>>, vector<32x24xf32>,
    %c0_26 = arith.constant 0 : index
    %c0_27 = arith.constant 0 : index
    %30 = vector.load %arg10[%c0_26, %c0_27] : memref<32x16xf32, #tpu.memory_space<vmem>>, vector<32x16xf32>
    %31 = arith.addf %30, %19 : vector<32x16xf32>
    %c0_28 = arith.constant 0 : index
    %c0_29 = arith.constant 0 : index
    %32 = vector.load %arg12[%c0_28, %c0_29] : memref<32x16xf32, #tpu.memory_space<vmem>>, vector<32x16xf32>
    tpu.vector_store %arg12[%c0_28, %c0_29], %31 {strides = array<i32>} : memref<32x16xf32, #tpu.memory_space<vmem>>, vector<32x16xf32>,
    return
  }
}

module attributes {stable_mosaic.version = 11 : i64} {
  func.func @_mm_kernel(%arg0: memref<32x120xf32, #tpu.memory_space<vmem>>, %arg1: memref<120x16xf32, #tpu.memory_space<vmem>>, %arg2: memref<1x16xf32, #tpu.memory_space<vmem>>, %arg3: memref<32x16xf32, #tpu.memory_space<vmem>>) attributes {dimension_semantics = [], scalar_prefetch = 0 : i64, scratch_operands = 0 : i64, tpu.core_type = #tpu.core_type<tc>} {
    %c0 = arith.constant 0 : index
    %c0_0 = arith.constant 0 : index
    %0 = vector.load %arg0[%c0, %c0_0] : memref<32x120xf32, #tpu.memory_space<vmem>>, vector<32x120xf32>
    %c0_1 = arith.constant 0 : index
    %c0_2 = arith.constant 0 : index
    %1 = vector.load %arg1[%c0_1, %c0_2] : memref<120x16xf32, #tpu.memory_space<vmem>>, vector<120x16xf32>
    %cst = arith.constant dense<0.000000e+00> : vector<32x16xf32>
    %2 = tpu.matmul %0, %1, %cst {dimension_numbers = #tpu.dot_dimension_numbers<[1], [0], [0], [1], [0, 0, 1, 1], [], []>} : vector<32x120xf32>, vector<120x16xf32>, vector<32x16xf32> -> vector<32x16xf32>
    %c0_3 = arith.constant 0 : index
    %c0_4 = arith.constant 0 : index
    %3 = vector.load %arg2[%c0_3, %c0_4] : memref<1x16xf32, #tpu.memory_space<vmem>>, vector<1x16xf32>
    %4 = vector.broadcast %3 : vector<1x16xf32> to vector<32x16xf32>
    %5 = arith.addf %2, %4 : vector<32x16xf32>
    %c0_5 = arith.constant 0 : index
    %c0_6 = arith.constant 0 : index
    %6 = vector.load %arg3[%c0_5, %c0_6] : memref<32x16xf32, #tpu.memory_space<vmem>>, vector<32x16xf32>
    tpu.vector_store %arg3[%c0_5, %c0_6], %5 {strides = array<i32>} : memref<32x16xf32, #tpu.memory_space<vmem>>, vector<32x16xf32>,
    return
  }
}

module attributes {stable_mosaic.version = 11 : i64} {
  func.func @_dec_stack_kernel(%arg0: memref<32x48xf32, #tpu.memory_space<vmem>>, %arg1: memref<48x16xf32, #tpu.memory_space<vmem>>, %arg2: memref<48x16xf32, #tpu.memory_space<vmem>>, %arg3: memref<32x16xf32, #tpu.memory_space<vmem>>, %arg4: memref<32x16xf32, #tpu.memory_space<vmem>>, %arg5: memref<16x16xf32, #tpu.memory_space<vmem>>, %arg6: memref<1x16xf32, #tpu.memory_space<vmem>>, %arg7: memref<16x16xf32, #tpu.memory_space<vmem>>, %arg8: memref<1x16xf32, #tpu.memory_space<vmem>>, %arg9: memref<32x16xf32, #tpu.memory_space<vmem>>, %arg10: memref<32x16xf32, #tpu.memory_space<vmem>>, %arg11: memref<32x16xf32, #tpu.memory_space<vmem>>, %arg12: memref<32x16xf32, #tpu.memory_space<vmem>>) attributes {dimension_semantics = [], scalar_prefetch = 0 : i64, scratch_operands = 0 : i64, tpu.core_type = #tpu.core_type<tc>} {
    %c0 = arith.constant 0 : index
    %c0_0 = arith.constant 0 : index
    %0 = vector.load %arg0[%c0, %c0_0] : memref<32x48xf32, #tpu.memory_space<vmem>>, vector<32x48xf32>
    %c0_1 = arith.constant 0 : index
    %c0_2 = arith.constant 0 : index
    %1 = vector.load %arg1[%c0_1, %c0_2] : memref<48x16xf32, #tpu.memory_space<vmem>>, vector<48x16xf32>
    %cst = arith.constant dense<0.000000e+00> : vector<32x16xf32>
    %2 = tpu.matmul %0, %1, %cst {dimension_numbers = #tpu.dot_dimension_numbers<[1], [0], [0], [1], [0, 0, 1, 1], [], []>} : vector<32x48xf32>, vector<48x16xf32>, vector<32x16xf32> -> vector<32x16xf32>
    %c0_3 = arith.constant 0 : index
    %c0_4 = arith.constant 0 : index
    %3 = vector.load %arg3[%c0_3, %c0_4] : memref<32x16xf32, #tpu.memory_space<vmem>>, vector<32x16xf32>
    %4 = arith.addf %2, %3 : vector<32x16xf32>
    %c0_5 = arith.constant 0 : index
    %c0_6 = arith.constant 0 : index
    %5 = vector.load %arg2[%c0_5, %c0_6] : memref<48x16xf32, #tpu.memory_space<vmem>>, vector<48x16xf32>
    %cst_7 = arith.constant dense<0.000000e+00> : vector<32x16xf32>
    %6 = tpu.matmul %0, %5, %cst_7 {dimension_numbers = #tpu.dot_dimension_numbers<[1], [0], [0], [1], [0, 0, 1, 1], [], []>} : vector<32x48xf32>, vector<48x16xf32>, vector<32x16xf32> -> vector<32x16xf32>
    %c0_8 = arith.constant 0 : index
    %c0_9 = arith.constant 0 : index
    %7 = vector.load %arg4[%c0_8, %c0_9] : memref<32x16xf32, #tpu.memory_space<vmem>>, vector<32x16xf32>
    %8 = arith.addf %6, %7 : vector<32x16xf32>
    %9 = arith.negf %8 : vector<32x16xf32>
    %10 = math.exp %9 : vector<32x16xf32>
    %cst_10 = arith.constant 1.000000e+00 : f32
    %11 = vector.broadcast %cst_10 : f32 to vector<32x16xf32>
    %12 = arith.addf %11, %10 : vector<32x16xf32>
    %13 = arith.divf %11, %12 : vector<32x16xf32>
    %14 = arith.mulf %4, %13 : vector<32x16xf32>
    %c0_11 = arith.constant 0 : index
    %c0_12 = arith.constant 0 : index
    %15 = vector.load %arg5[%c0_11, %c0_12] : memref<16x16xf32, #tpu.memory_space<vmem>>, vector<16x16xf32>
    %cst_13 = arith.constant dense<0.000000e+00> : vector<32x16xf32>
    %16 = tpu.matmul %14, %15, %cst_13 {dimension_numbers = #tpu.dot_dimension_numbers<[1], [0], [0], [1], [0, 0, 1, 1], [], []>} : vector<32x16xf32>, vector<16x16xf32>, vector<32x16xf32> -> vector<32x16xf32>
    %c0_14 = arith.constant 0 : index
    %c0_15 = arith.constant 0 : index
    %17 = vector.load %arg6[%c0_14, %c0_15] : memref<1x16xf32, #tpu.memory_space<vmem>>, vector<1x16xf32>
    %18 = vector.broadcast %17 : vector<1x16xf32> to vector<32x16xf32>
    %19 = arith.addf %16, %18 : vector<32x16xf32>
    %c0_16 = arith.constant 0 : index
    %c0_17 = arith.constant 0 : index
    %20 = vector.load %arg7[%c0_16, %c0_17] : memref<16x16xf32, #tpu.memory_space<vmem>>, vector<16x16xf32>
    %cst_18 = arith.constant dense<0.000000e+00> : vector<32x16xf32>
    %21 = tpu.matmul %14, %20, %cst_18 {dimension_numbers = #tpu.dot_dimension_numbers<[1], [0], [0], [1], [0, 0, 1, 1], [], []>} : vector<32x16xf32>, vector<16x16xf32>, vector<32x16xf32> -> vector<32x16xf32>
    %c0_19 = arith.constant 0 : index
    %c0_20 = arith.constant 0 : index
    %22 = vector.load %arg8[%c0_19, %c0_20] : memref<1x16xf32, #tpu.memory_space<vmem>>, vector<1x16xf32>
    %23 = vector.broadcast %22 : vector<1x16xf32> to vector<32x16xf32>
    %24 = arith.addf %21, %23 : vector<32x16xf32>
    %c0_21 = arith.constant 0 : index
    %c0_22 = arith.constant 0 : index
    %25 = vector.load %arg9[%c0_21, %c0_22] : memref<32x16xf32, #tpu.memory_space<vmem>>, vector<32x16xf32>
    %26 = arith.addf %24, %25 : vector<32x16xf32>
    %cst_23 = arith.constant 0.707106769 : f32
    %27 = vector.broadcast %cst_23 : f32 to vector<32x16xf32>
    %28 = arith.mulf %26, %27 : vector<32x16xf32>
    %c0_24 = arith.constant 0 : index
    %c0_25 = arith.constant 0 : index
    %29 = vector.load %arg11[%c0_24, %c0_25] : memref<32x16xf32, #tpu.memory_space<vmem>>, vector<32x16xf32>
    tpu.vector_store %arg11[%c0_24, %c0_25], %28 {strides = array<i32>} : memref<32x16xf32, #tpu.memory_space<vmem>>, vector<32x16xf32>,
    %c0_26 = arith.constant 0 : index
    %c0_27 = arith.constant 0 : index
    %30 = vector.load %arg10[%c0_26, %c0_27] : memref<32x16xf32, #tpu.memory_space<vmem>>, vector<32x16xf32>
    %31 = arith.addf %30, %19 : vector<32x16xf32>
    %c0_28 = arith.constant 0 : index
    %c0_29 = arith.constant 0 : index
    %32 = vector.load %arg12[%c0_28, %c0_29] : memref<32x16xf32, #tpu.memory_space<vmem>>, vector<32x16xf32>
    tpu.vector_store %arg12[%c0_28, %c0_29], %31 {strides = array<i32>} : memref<32x16xf32, #tpu.memory_space<vmem>>, vector<32x16xf32>,
    return
  }
}

module attributes {stable_mosaic.version = 11 : i64} {
  func.func @_dec_final_kernel(%arg0: memref<32x16xf32, #tpu.memory_space<vmem>>, %arg1: memref<16x16xf32, #tpu.memory_space<vmem>>, %arg2: memref<1x16xf32, #tpu.memory_space<vmem>>, %arg3: memref<16x16xf32, #tpu.memory_space<vmem>>, %arg4: memref<1x16xf32, #tpu.memory_space<vmem>>, %arg5: memref<32x16xf32, #tpu.memory_space<vmem>>) attributes {dimension_semantics = [], scalar_prefetch = 0 : i64, scratch_operands = 0 : i64, tpu.core_type = #tpu.core_type<tc>} {
    %c0 = arith.constant 0 : index
    %c0_0 = arith.constant 0 : index
    %0 = vector.load %arg0[%c0, %c0_0] : memref<32x16xf32, #tpu.memory_space<vmem>>, vector<32x16xf32>
    %cst = arith.constant 5.000000e-01 : f32
    %1 = vector.broadcast %cst : f32 to vector<32x16xf32>
    %2 = arith.mulf %0, %1 : vector<32x16xf32>
    %cst_1 = arith.constant 0.000000e+00 : f32
    %3 = vector.broadcast %cst_1 : f32 to vector<32x16xf32>
    %4 = arith.maximumf %2, %3 : vector<32x16xf32>
    %c0_2 = arith.constant 0 : index
    %c0_3 = arith.constant 0 : index
    %5 = vector.load %arg1[%c0_2, %c0_3] : memref<16x16xf32, #tpu.memory_space<vmem>>, vector<16x16xf32>
    %cst_4 = arith.constant dense<0.000000e+00> : vector<32x16xf32>
    %6 = tpu.matmul %4, %5, %cst_4 {dimension_numbers = #tpu.dot_dimension_numbers<[1], [0], [0], [1], [0, 0, 1, 1], [], []>} : vector<32x16xf32>, vector<16x16xf32>, vector<32x16xf32> -> vector<32x16xf32>
    %c0_5 = arith.constant 0 : index
    %c0_6 = arith.constant 0 : index
    %7 = vector.load %arg2[%c0_5, %c0_6] : memref<1x16xf32, #tpu.memory_space<vmem>>, vector<1x16xf32>
    %8 = vector.broadcast %7 : vector<1x16xf32> to vector<32x16xf32>
    %9 = arith.addf %6, %8 : vector<32x16xf32>
    %cst_7 = arith.constant 0.000000e+00 : f32
    %10 = vector.broadcast %cst_7 : f32 to vector<32x16xf32>
    %11 = arith.maximumf %9, %10 : vector<32x16xf32>
    %c0_8 = arith.constant 0 : index
    %c0_9 = arith.constant 0 : index
    %12 = vector.load %arg3[%c0_8, %c0_9] : memref<16x16xf32, #tpu.memory_space<vmem>>, vector<16x16xf32>
    %cst_10 = arith.constant dense<0.000000e+00> : vector<32x16xf32>
    %13 = tpu.matmul %11, %12, %cst_10 {dimension_numbers = #tpu.dot_dimension_numbers<[1], [0], [0], [1], [0, 0, 1, 1], [], []>} : vector<32x16xf32>, vector<16x16xf32>, vector<32x16xf32> -> vector<32x16xf32>
    %c0_11 = arith.constant 0 : index
    %c0_12 = arith.constant 0 : index
    %14 = vector.load %arg4[%c0_11, %c0_12] : memref<1x16xf32, #tpu.memory_space<vmem>>, vector<1x16xf32>
    %15 = vector.broadcast %14 : vector<1x16xf32> to vector<32x16xf32>
    %16 = arith.addf %13, %15 : vector<32x16xf32>
    %c0_13 = arith.constant 0 : index
    %c0_14 = arith.constant 0 : index
    %17 = vector.load %arg5[%c0_13, %c0_14] : memref<32x16xf32, #tpu.memory_space<vmem>>, vector<32x16xf32>
    tpu.vector_store %arg5[%c0_13, %c0_14], %16 {strides = array<i32>} : memref<32x16xf32, #tpu.memory_space<vmem>>, vector<32x16xf32>,
    return
  }
}

</mosaic_0001>

<bundles_post_ra>
// kernel: model_forward.13
= control target key start
LH: loop header
LB: loop body
LE: loop exit
PB: predicated region body
PF: predicated region fallthrough
CT: control target
= control target key end

     0   :  { %vm35_vm0 = vcmask 654336   ;;  %vm133_vm1 = vcmask 195584   ;;  %s284_s1 = inlined_call_operand.vmem [shape: f32[80,24], index: 1, kind: input, shape index: {}]   ;;  %s285_s0 = inlined_call_operand.vmem [shape: f32[32,80], index: 0, kind: input, shape index: {}]   ;;  %s286_s2 = inlined_call_operand.vmem [shape: f32[1,24], index: 2, kind: input, shape index: {}]   ;;  %s287_s3 = inlined_call_operand.vmem [shape: f32[32,24], index: 3, kind: output, shape index: {}]  }
   0x1   :  { %v27_v0 = vld [vmem:[%s284_s1 + $0x48] sm:$0xff]  ;;  %v26_v1 = vld [vmem:[%s284_s1 + $0x40] sm:$0xff]  ;;  %v25_v2 = vld [vmem:[%s284_s1 + $0x38] sm:$0xff] }
   0x2   :  { %161 = vmatprep.subr.mxu0 %v27_v0  ;;  %187 = vmatprep.subr.mxu1 %v27_v0  ;;  %v24_v3 = vld [vmem:[%s284_s1 + $0x30] sm:$0xff]  ;;  %v23_v4 = vld [vmem:[%s284_s1 + $0x28] sm:$0xff]  ;;  %v22_v5 = vld [vmem:[%s284_s1 + $0x20] sm:$0xff] }
   0x3   :  { %162 = vmatpush3.msra.mxu0 %v27_v0  ;;  %197 = vmatpush3.msra.mxu1 %v27_v0  ;;  %v21_v6 = vld [vmem:[%s284_s1 + $0x18] sm:$0xff]  ;;  %v20_v7 = vld [vmem:[%s284_s1 + $0x10] sm:$0xff]  ;;  %v19_v8 = vld [vmem:[%s284_s1 + $0x8] sm:$0xff] }
   0x4   :  { %163 = vmatprep.subr.mxu0 %v26_v1  ;;  %188 = vmatprep.subr.mxu1 %v26_v1  ;;  %v18_v9 = vld [vmem:[%s284_s1] sm:$0xff]  ;;  %v16_v11 = vld [vmem:[%s285_s0 + $0x10] sm:$0xff]  ;;  %v15_v12 = vld [vmem:[%s285_s0 + $0x8] sm:$0xff] }
   0x5   :  { %164 = vmatpush3.msra.mxu0 %v26_v1  ;;  %198 = vmatpush3.msra.mxu1 %v26_v1  ;;  %v14_v10 = vld [vmem:[%s285_s0] sm:$0xff]  ;;  %v17_v13 = vld [vmem:[%s285_s0 + $0x18] sm:$0xff] }
   0x6   :  { %165 = vmatprep.subr.mxu0 %v25_v2  ;;  %189 = vmatprep.subr.mxu1 %v25_v2  ;;  %v142_v14 = vld [vmem:[%s286_s2] ss:$0 sm:$0xff] }
   0x7   :  { %166 = vmatpush3.msra.mxu0 %v25_v2  ;;  %199 = vmatpush3.msra.mxu1 %v25_v2 }
   0x8   :  { %167 = vmatprep.subr.mxu0 %v24_v3  ;;  %190 = vmatprep.subr.mxu1 %v24_v3 }
   0x9   :  { %168 = vmatpush3.msra.mxu0 %v24_v3  ;;  %200 = vmatpush3.msra.mxu1 %v24_v3 }
   0xa   :  { %169 = vmatprep.subr.mxu0 %v23_v4  ;;  %191 = vmatprep.subr.mxu1 %v23_v4 }
   0xb   :  { %170 = vmatpush3.msra.mxu0 %v23_v4  ;;  %201 = vmatpush3.msra.mxu1 %v23_v4 }
   0xc   :  { %171 = vmatprep.subr.mxu0 %v22_v5  ;;  %192 = vmatprep.subr.mxu1 %v22_v5 }
   0xd   :  { %172 = vmatpush3.msra.mxu0 %v22_v5  ;;  %202 = vmatpush3.msra.mxu1 %v22_v5 }
   0xe   :  { %173 = vmatprep.subr.mxu0 %v21_v6  ;;  %193 = vmatprep.subr.mxu1 %v21_v6 }
   0xf   :  { %174 = vmatpush3.msra.mxu0 %v21_v6  ;;  %203 = vmatpush3.msra.mxu1 %v21_v6 }
  0x10   :  { %175 = vmatprep.subr.mxu0 %v20_v7  ;;  %194 = vmatprep.subr.mxu1 %v20_v7 }
  0x11   :  { %176 = vmatpush3.msra.mxu0 %v20_v7  ;;  %204 = vmatpush3.msra.mxu1 %v20_v7 }
  0x12   :  { %177 = vmatprep.subr.mxu0 %v19_v8  ;;  %195 = vmatprep.subr.mxu1 %v19_v8 }
  0x13   :  { %178 = vmatpush3.msra.mxu0 %v19_v8  ;;  %205 = vmatpush3.msra.mxu1 %v19_v8 }
  0x14   :  { %179 = vmatprep.subr.mxu0 %v18_v9  ;;  %196 = vmatprep.subr.mxu1 %v18_v9 }
  0x15   :  { %180 = vmatpush3.msra.mxu0 %v18_v9  ;;  %206 = vmatpush3.msra.mxu1 %v18_v9 }
  0x16   :  { %181 = vmatprep.mubr.msk.f32.mxu0 %vm35_vm0, %v14_v10  ;;  %184 = vmatprep.mubr.msk.f32.mxu1 %vm35_vm0, %v16_v11 }
  0x17   :  { %182 = vmatmul.mubr.msk.f32.vlgmr.msra.gmra.mxu0 %vm35_vm0, %v15_v12  ;;  %185 = vmatmul.mubr.msk.f32.vlgmr.msra.gmra.mxu1 %vm35_vm0, %v17_v13 }
  0xd7   :  { %v183_v15 = vpop.f32.mrf.mxu0  ;;  %v186_v16 = vpop.f32.mrf.mxu1 }
  0xd8   :  { %v120_v17 = vadd.f32 %v183_v15, %v142_v14  ;;  %v130_v18 = vadd.f32 %v186_v16, %v142_v14 }
  0xd9   :  { %v114_v19 = vpop.f32.mrf.mxu0  ;;  %v124_v20 = vpop.f32.mrf.mxu1 }
  0xda   :  { %135 = vst.msk [vmem:[%s287_s3 + $0x8] sm:$0xff] %vm133_vm1, %v120_v17  ;;  %137 = vst.msk [vmem:[%s287_s3 + $0x18] sm:$0xff] %vm133_vm1, %v130_v18  ;;  %v115_v21 = vadd.f32 %v142_v14, %v114_v19  ;;  %v125_v22 = vadd.f32 %v142_v14, %v124_v20 }
  0xdc   :  { %134 = vst.msk [vmem:[%s287_s3] sm:$0xff] %vm133_vm1, %v115_v21  ;;  %136 = vst.msk [vmem:[%s287_s3 + $0x10] sm:$0xff] %vm133_vm1, %v125_v22 }

// kernel: model_forward.15
= control target key start
LH: loop header
LB: loop body
LE: loop exit
PB: predicated region body
PF: predicated region fallthrough
CT: control target
= control target key end

     0   :  { %v428_v2 = vmov 0.0   ;;  %vm55_vm4 = vcmask 588800   ;;  %vm174_vm5 = vcmask 195584   ;;  %s580_s1 = inlined_call_operand.vmem [shape: f32[72,24], index: 1, kind: input, shape index: {}]   ;;  %s581_s0 = inlined_call_operand.vmem [shape: f32[32,72], index: 0, kind: input, shape index: {}]   ;;  %s582_s2 = inlined_call_operand.vmem [shape: f32[1,24], index: 2, kind: input, shape index: {}]   ;;  %s583_s3 = inlined_call_operand.vmem [shape: f32[1,24], index: 3, kind: input, shape index: {}]   ;;  %s584_s4 = inlined_call_operand.vmem [shape: f32[1,24], index: 4, kind: input, shape index: {}]   ;;  %s585_s5 = inlined_call_operand.vmem [shape: f32[32,24], index: 5, kind: input, shape index: {}]   ;;  %s586_s6 = inlined_call_operand.vmem [shape: f32[32,24], index: 6, kind: output, shape index: {}]  }
   0x1   :  { %v47_v0 = vld [vmem:[%s580_s1 + $0x40] sm:$0xff]  ;;  %v46_v1 = vld [vmem:[%s580_s1 + $0x38] sm:$0xff]  ;;  %250 = vadd.xlane.f32.xlu1 %v428_v2  ;;  %182 = vadd.xlane.f32.xlu0 %v428_v2  ;;  %v45_v3 = vld [vmem:[%s580_s1 + $0x30] sm:$0xff] }
   0x2   :  { %381 = vmatprep.subr.mxu0 %v47_v0  ;;  %405 = vmatprep.subr.mxu1 %v47_v0  ;;  %v44_v4 = vld [vmem:[%s580_s1 + $0x28] sm:$0xff]  ;;  %v43_v5 = vld [vmem:[%s580_s1 + $0x20] sm:$0xff]  ;;  %v42_v6 = vld [vmem:[%s580_s1 + $0x18] sm:$0xff] }
   0x3   :  { %382 = vmatpush3.msra.mxu0 %v47_v0  ;;  %414 = vmatpush3.msra.mxu1 %v47_v0  ;;  %v23_v7 = vld [vmem:[%s581_s0] sm:$0xff]  ;;  %v25_v8 = vld [vmem:[%s581_s0 + $0x10] sm:$0xff]  ;;  %v24_v10 = vld [vmem:[%s581_s0 + $0x8] sm:$0xff] }
   0x4   :  { %383 = vmatprep.subr.mxu0 %v46_v1  ;;  %406 = vmatprep.subr.mxu1 %v46_v1  ;;  %v41_v9 = vld [vmem:[%s580_s1 + $0x10] sm:$0xff]  ;;  %v26_v11 = vld [vmem:[%s581_s0 + $0x18] sm:$0xff]  ;;  %v40_v12 = vld [vmem:[%s580_s1 + $0x8] sm:$0xff]  ;;  %v31_v13 = vmul.f32 0.2, %v23_v7  ;;  %vm27_vm0 = vcmp.ge.f32.partialorder %v23_v7, 0.0 }
   0x5   :  { %384 = vmatpush3.msra.mxu0 %v46_v1  ;;  %415 = vmatpush3.msra.mxu1 %v46_v1  ;;  %v33_v14 = vmul.f32 0.2, %v25_v8  ;;  %vm29_vm1 = vcmp.ge.f32.partialorder %v25_v8, 0.0  ;;  %v32_v15 = vmul.f32 0.2, %v24_v10  ;;  %v39_v17 = vld [vmem:[%s580_s1] sm:$0xff] }
   0x6   :  { %385 = vmatprep.subr.mxu0 %v45_v3  ;;  %407 = vmatprep.subr.mxu1 %v45_v3  ;;  %v34_v16 = vmul.f32 0.2, %v26_v11  ;;  %vm28_vm2 = vcmp.ge.f32.partialorder %v24_v10, 0.0  ;;  %vm30_vm3 = vcmp.ge.f32.partialorder %v26_v11, 0.0  ;;  %v35_v18 = vsel %vm27_vm0, %v23_v7, %v31_v13  ;;  %v361_v22 = vld [vmem:[%s582_s2] ss:$0 sm:$0xff] }
   0x7   :  { %386 = vmatpush3.msra.mxu0 %v45_v3  ;;  %416 = vmatpush3.msra.mxu1 %v45_v3  ;;  %v37_v19 = vsel %vm29_vm1, %v25_v8, %v33_v14  ;;  %v36_v20 = vsel %vm28_vm2, %v24_v10, %v32_v15 }
   0x8   :  { %387 = vmatprep.subr.mxu0 %v44_v4  ;;  %408 = vmatprep.subr.mxu1 %v44_v4  ;;  %v38_v21 = vsel %vm30_vm3, %v26_v11, %v34_v16 }
   0x9   :  { %388 = vmatpush3.msra.mxu0 %v44_v4  ;;  %417 = vmatpush3.msra.mxu1 %v44_v4 }
   0xa   :  { %389 = vmatprep.subr.mxu0 %v43_v5  ;;  %409 = vmatprep.subr.mxu1 %v43_v5 }
   0xb   :  { %390 = vmatpush3.msra.mxu0 %v43_v5  ;;  %418 = vmatpush3.msra.mxu1 %v43_v5 }
   0xc   :  { %391 = vmatprep.subr.mxu0 %v42_v6  ;;  %410 = vmatprep.subr.mxu1 %v42_v6 }
   0xd   :  { %392 = vmatpush3.msra.mxu0 %v42_v6  ;;  %419 = vmatpush3.msra.mxu1 %v42_v6 }
   0xe   :  { %393 = vmatprep.subr.mxu0 %v41_v9  ;;  %411 = vmatprep.subr.mxu1 %v41_v9 }
   0xf   :  { %394 = vmatpush3.msra.mxu0 %v41_v9  ;;  %420 = vmatpush3.msra.mxu1 %v41_v9 }
  0x10   :  { %395 = vmatprep.subr.mxu0 %v40_v12  ;;  %412 = vmatprep.subr.mxu1 %v40_v12 }
  0x11   :  { %396 = vmatpush3.msra.mxu0 %v40_v12  ;;  %421 = vmatpush3.msra.mxu1 %v40_v12 }
  0x12   :  { %397 = vmatprep.subr.mxu0 %v39_v17  ;;  %413 = vmatprep.subr.mxu1 %v39_v17 }
  0x13   :  { %398 = vmatpush3.msra.mxu0 %v39_v17  ;;  %422 = vmatpush3.msra.mxu1 %v39_v17 }
  0x14   :  { %399 = vmatprep.mubr.msk.f32.mxu0 %vm55_vm4, %v35_v18  ;;  %402 = vmatprep.mubr.msk.f32.mxu1 %vm55_vm4, %v37_v19 }
  0x15   :  { %400 = vmatmul.mubr.msk.f32.vlgmr.msra.gmra.mxu0 %vm55_vm4, %v36_v20  ;;  %403 = vmatmul.mubr.msk.f32.vlgmr.msra.gmra.mxu1 %vm55_vm4, %v38_v21 }
  0x16   :  { %253 = vadd.xlane.f32.xlu1 %v428_v2  ;;  %276 = vadd.xlane.f32.xlu0 %v428_v2 }
  0x1a   :  { %279 = vadd.xlane.f32.xlu1 %v428_v2  ;;  %185 = vadd.xlane.f32.xlu0 %v428_v2 }
  0x1e   :  { %208 = vadd.xlane.f32.xlu1 %v428_v2 }
  0x8a   :  { %v251_v43 = vpop.xlane.xlu1 %250  ;;  %v183_v44 = vpop.xlane.xlu0 %182 }
  0x9f   :  { %v254_v45 = vpop.xlane.xlu1 %253  ;;  %v277_v46 = vpop.xlane.xlu0 %276 }
  0xa0   :  { %v261_v51 = vadd.f32 %v254_v45, %v251_v43 }
  0xa3   :  { %v280_v47 = vpop.xlane.xlu1 %279  ;;  %v186_v48 = vpop.xlane.xlu0 %185 }
  0xa4   :  { %v287_v62 = vadd.f32 %v280_v47, %v277_v46 }
  0xa7   :  { %v209_v49 = vpop.xlane.xlu1 %208 }
  0xd5   :  { %v401_v23 = vpop.f32.mrf.mxu0  ;;  %v404_v24 = vpop.f32.mrf.mxu1 }
  0xd6   :  { %v513_v25 = vadd.f32 %v401_v23, %v361_v22  ;;  %v515_v28 = vadd.f32 %v404_v24, %v361_v22 }
  0xd7   :  { %v134_v26 = vpop.f32.mrf.mxu0  ;;  %v144_v27 = vpop.f32.mrf.mxu1 }
  0xd8   :  { %v517_v29 = vadd.f32 %v361_v22, %v134_v26  ;;  %v519_v30 = vadd.f32 %v361_v22, %v144_v27  ;;  %v178_v31 = vsel %vm174_vm5, %v513_v25, 0.0  ;;  %v258_v34 = vsel %vm174_vm5, %v515_v28, 0.0 }
  0xd9   :  { %179 = vadd.xlane.f32.xlu0 %v178_v31  ;;  %v198_v38 = vmul.f32 %v513_v25, %v513_v25  ;;  %v274_v40 = vmul.f32 %v515_v28, %v515_v28 }
  0xda   :  { %v255_v32 = vsel %vm174_vm5, %v519_v30, 0.0  ;;  %v197_v33 = vmul.f32 %v517_v29, %v517_v29  ;;  %v273_v36 = vmul.f32 %v519_v30, %v519_v30  ;;  %v175_v37 = vsel %vm174_vm5, %v517_v29, 0.0 }
  0xdb   :  { %256 = vadd.xlane.f32.xlu1 %v255_v32  ;;  %v204_v41 = vsel %vm174_vm5, %v198_v38, 0.0  ;;  %v284_v42 = vsel %vm174_vm5, %v274_v40, 0.0 }
  0xdc   :  { %v201_v35 = vsel %vm174_vm5, %v197_v33, 0.0  ;;  %v281_v39 = vsel %vm174_vm5, %v273_v36, 0.0 }
  0xdd   :  { %259 = vadd.xlane.f32.xlu0 %v258_v34 }
  0xdf   :  { %202 = vadd.xlane.f32.xlu1 %v201_v35 }
  0xe1   :  { %176 = vadd.xlane.f32.xlu0 %v175_v37 }
  0xe3   :  { %282 = vadd.xlane.f32.xlu1 %v281_v39 }
  0xe5   :  { %205 = vadd.xlane.f32.xlu0 %v204_v41 }
  0xe7   :  { %285 = vadd.xlane.f32.xlu1 %v284_v42 }
  0xe9   :  { %211 = vadd.xlane.f32.xlu0 %v428_v2 }
 0x162   :  { %v180_v50 = vpop.xlane.xlu0 %179 }
 0x164   :  { %v257_v52 = vpop.xlane.xlu1 %256 }
 0x165   :  { %v262_v53 = vadd.f32 %v261_v51, %v257_v52 }
 0x166   :  { %v260_v54 = vpop.xlane.xlu0 %259 }
 0x167   :  { %v263_v55 = vadd.f32 %v262_v53, %v260_v54  ;;  %v367_v54 = vld [vmem:[%s584_s4] ss:$0 sm:$0xff] }
 0x168   :  { %v203_v56 = vpop.xlane.xlu1 %202 }
 0x169   :  { %v264_v57 = vrot.slane %v263_v55, 4 }
 0x16a   :  { %v177_v58 = vpop.xlane.xlu0 %176 }
 0x16b   :  { %v265_v59 = vadd.f32 %v264_v57, %v263_v55  ;;  %v187_v60 = vadd.f32 %v180_v50, %v177_v58  ;;  %v347_v57 = vld [vmem:[%s585_s5 + $0x10] sm:$0xff] }
 0x16c   :  { %v283_v61 = vpop.xlane.xlu1 %282 }
 0x16d   :  { %v266_v63 = vrot.slane %v265_v59, 2  ;;  %v188_v0 = vadd.f32 %v187_v60, %v183_v44  ;;  %v288_v3 = vadd.f32 %v287_v62, %v283_v61  ;;  %v345_v61 = vld [vmem:[%s585_s5] sm:$0xff]  ;;  %v346_v62 = vld [vmem:[%s585_s5 + $0x8] sm:$0xff] }
 0x16e   :  { %v206_v1 = vpop.xlane.xlu0 %205 }
 0x16f   :  { %v189_v2 = vadd.f32 %v188_v0, %v186_v48  ;;  %v213_v4 = vadd.f32 %v206_v1, %v203_v56  ;;  %v267_v5 = vadd.f32 %v266_v63, %v265_v59  ;;  %v366_v48 = vld [vmem:[%s583_s3] ss:$0 sm:$0xff] }
 0x170   :  { %v286_v6 = vpop.xlane.xlu1 %285 }
 0x171   :  { %v190_v7 = vrot.slane %v189_v2, 4  ;;  %v289_v8 = vadd.f32 %v288_v3, %v286_v6  ;;  %v214_v9 = vadd.f32 %v213_v4, %v209_v49  ;;  %v268_v14 = vrot.slane %v267_v5, 1 }
 0x172   :  { %v212_v10 = vpop.xlane.xlu0 %211 }
 0x173   :  { %v191_v11 = vadd.f32 %v190_v7, %v189_v2  ;;  %v290_v12 = vrot.slane %v289_v8, 4  ;;  %v215_v13 = vadd.f32 %v214_v9, %v212_v10  ;;  %v269_v19 = vadd.f32 %v268_v14, %v267_v5 }
 0x175   :  { %v192_v15 = vrot.slane %v191_v11, 2  ;;  %v291_v16 = vadd.f32 %v290_v12, %v289_v8  ;;  %v216_v17 = vrot.slane %v215_v13, 4  ;;  %v270_v27 = vmul.f32 0.0026041667, %v269_v19 }
 0x177   :  { %v193_v18 = vadd.f32 %v192_v15, %v191_v11  ;;  %v292_v20 = vrot.slane %v291_v16, 2  ;;  %v217_v21 = vadd.f32 %v216_v17, %v215_v13  ;;  %v297_v36 = vmul.f32 %v270_v27, %v270_v27 }
 0x178   :  { %v309_v45 = vsub.f32 %v519_v30, %v270_v27  ;;  %v310_v46 = vsub.f32 %v515_v28, %v270_v27 }
 0x179   :  { %v194_v22 = vrot.slane %v193_v18, 1  ;;  %v293_v23 = vadd.f32 %v292_v20, %v291_v16  ;;  %v218_v24 = vrot.slane %v217_v21, 2 }
 0x17b   :  { %v195_v26 = vadd.f32 %v194_v22, %v193_v18  ;;  %v294_v31 = vrot.slane %v293_v23, 1  ;;  %v219_v32 = vadd.f32 %v218_v24, %v217_v21 }
 0x17d   :  { %v196_v33 = vmul.f32 0.0026041667, %v195_v26  ;;  %v295_v34 = vadd.f32 %v294_v31, %v293_v23  ;;  %v220_v35 = vrot.slane %v219_v32, 1 }
 0x17f   :  { %v296_v37 = vmul.f32 0.0026041667, %v295_v34  ;;  %v221_v38 = vadd.f32 %v220_v35, %v219_v32  ;;  %v223_v40 = vmul.f32 %v196_v33, %v196_v33  ;;  %v307_v49 = vsub.f32 %v517_v29, %v196_v33  ;;  %v348_v29 = vld [vmem:[%s585_s5 + $0x18] sm:$0xff] }
 0x180   :  { %v308_v50 = vsub.f32 %v513_v25, %v196_v33 }
 0x181   :  { %v298_v39 = vsub.f32 %v296_v37, %v297_v36  ;;  %v222_v41 = vmul.f32 0.0026041667, %v221_v38 }
 0x183   :  { %v313_v42 = vadd.f32 1e-05, %v298_v39  ;;  %v224_v43 = vsub.f32 %v222_v41, %v223_v40 }
 0x185   :  { %424 = vrsqrt.f32 %v313_v42  ;;  %v311_v44 = vadd.f32 1e-05, %v224_v43 }
 0x187   :  { %426 = vrsqrt.f32 %v311_v44 }
 0x192   :  { %v425_v47 = vpop.eup %424 }
 0x193   :  { %v321_v51 = vmul.f32 %v425_v47, %v309_v45  ;;  %v322_v52 = vmul.f32 %v425_v47, %v310_v46 }
 0x194   :  { %v427_v53 = vpop.eup %426 }
 0x195   :  { %v332_v55 = vmul.f32 %v366_v48, %v321_v51  ;;  %v333_v30 = vmul.f32 %v366_v48, %v322_v52  ;;  %v319_v56 = vmul.f32 %v427_v53, %v307_v49  ;;  %v320_v28 = vmul.f32 %v427_v53, %v308_v50 }
 0x197   :  { %v343_v25 = vadd.f32 %v367_v54, %v332_v55  ;;  %v344_v58 = vadd.f32 %v367_v54, %v333_v30  ;;  %v330_v59 = vmul.f32 %v366_v48, %v319_v56  ;;  %v331_v60 = vmul.f32 %v366_v48, %v320_v28 }
 0x199   :  { %v351_v63 = vadd.f32 %v347_v57, %v343_v25  ;;  %v352_v0 = vadd.f32 %v348_v29, %v344_v58  ;;  %v341_v1 = vadd.f32 %v367_v54, %v330_v59  ;;  %v342_v2 = vadd.f32 %v367_v54, %v331_v60 }
 0x19b   :  { %355 = vst.msk [vmem:[%s586_s6 + $0x10] sm:$0xff] %vm174_vm5, %v351_v63  ;;  %356 = vst.msk [vmem:[%s586_s6 + $0x18] sm:$0xff] %vm174_vm5, %v352_v0  ;;  %v349_v3 = vadd.f32 %v345_v61, %v341_v1  ;;  %v350_v4 = vadd.f32 %v346_v62, %v342_v2 }
 0x19d   :  { %353 = vst.msk [vmem:[%s586_s6] sm:$0xff] %vm174_vm5, %v349_v3  ;;  %354 = vst.msk [vmem:[%s586_s6 + $0x8] sm:$0xff] %vm174_vm5, %v350_v4 }

// kernel: model_forward.14
= control target key start
LH: loop header
LB: loop body
LE: loop exit
PB: predicated region body
PF: predicated region fallthrough
CT: control target
= control target key end

     0   :  { %v417_v2 = vmov 0.0   ;;  %vm52_vm4 = vcmask 588800   ;;  %vm171_vm5 = vcmask 195584   ;;  %s552_s1 = inlined_call_operand.vmem [shape: f32[72,24], index: 1, kind: input, shape index: {}]   ;;  %s553_s0 = inlined_call_operand.vmem [shape: f32[32,72], index: 0, kind: input, shape index: {}]   ;;  %s554_s2 = inlined_call_operand.vmem [shape: f32[1,24], index: 2, kind: input, shape index: {}]   ;;  %s555_s3 = inlined_call_operand.vmem [shape: f32[1,24], index: 3, kind: input, shape index: {}]   ;;  %s556_s4 = inlined_call_operand.vmem [shape: f32[1,24], index: 4, kind: input, shape index: {}]   ;;  %s557_s5 = inlined_call_operand.vmem [shape: f32[32,24], index: 5, kind: output, shape index: {}]  }
   0x1   :  { %v44_v0 = vld [vmem:[%s552_s1 + $0x40] sm:$0xff]  ;;  %v43_v1 = vld [vmem:[%s552_s1 + $0x38] sm:$0xff]  ;;  %247 = vadd.xlane.f32.xlu1 %v417_v2  ;;  %179 = vadd.xlane.f32.xlu0 %v417_v2  ;;  %v42_v3 = vld [vmem:[%s552_s1 + $0x30] sm:$0xff] }
   0x2   :  { %370 = vmatprep.subr.mxu0 %v44_v0  ;;  %394 = vmatprep.subr.mxu1 %v44_v0  ;;  %v41_v4 = vld [vmem:[%s552_s1 + $0x28] sm:$0xff]  ;;  %v40_v5 = vld [vmem:[%s552_s1 + $0x20] sm:$0xff]  ;;  %v39_v6 = vld [vmem:[%s552_s1 + $0x18] sm:$0xff] }
   0x3   :  { %371 = vmatpush3.msra.mxu0 %v44_v0  ;;  %403 = vmatpush3.msra.mxu1 %v44_v0  ;;  %v20_v7 = vld [vmem:[%s553_s0] sm:$0xff]  ;;  %v22_v8 = vld [vmem:[%s553_s0 + $0x10] sm:$0xff]  ;;  %v21_v10 = vld [vmem:[%s553_s0 + $0x8] sm:$0xff] }
   0x4   :  { %372 = vmatprep.subr.mxu0 %v43_v1  ;;  %395 = vmatprep.subr.mxu1 %v43_v1  ;;  %v38_v9 = vld [vmem:[%s552_s1 + $0x10] sm:$0xff]  ;;  %v23_v11 = vld [vmem:[%s553_s0 + $0x18] sm:$0xff]  ;;  %v37_v12 = vld [vmem:[%s552_s1 + $0x8] sm:$0xff]  ;;  %v28_v13 = vmul.f32 0.2, %v20_v7  ;;  %vm24_vm0 = vcmp.ge.f32.partialorder %v20_v7, 0.0 }
   0x5   :  { %373 = vmatpush3.msra.mxu0 %v43_v1  ;;  %404 = vmatpush3.msra.mxu1 %v43_v1  ;;  %v30_v14 = vmul.f32 0.2, %v22_v8  ;;  %vm26_vm1 = vcmp.ge.f32.partialorder %v22_v8, 0.0  ;;  %v29_v15 = vmul.f32 0.2, %v21_v10  ;;  %v36_v17 = vld [vmem:[%s552_s1] sm:$0xff] }
   0x6   :  { %374 = vmatprep.subr.mxu0 %v42_v3  ;;  %396 = vmatprep.subr.mxu1 %v42_v3  ;;  %v31_v16 = vmul.f32 0.2, %v23_v11  ;;  %vm25_vm2 = vcmp.ge.f32.partialorder %v21_v10, 0.0  ;;  %vm27_vm3 = vcmp.ge.f32.partialorder %v23_v11, 0.0  ;;  %v32_v18 = vsel %vm24_vm0, %v20_v7, %v28_v13  ;;  %v350_v22 = vld [vmem:[%s554_s2] ss:$0 sm:$0xff] }
   0x7   :  { %375 = vmatpush3.msra.mxu0 %v42_v3  ;;  %405 = vmatpush3.msra.mxu1 %v42_v3  ;;  %v34_v19 = vsel %vm26_vm1, %v22_v8, %v30_v14  ;;  %v33_v20 = vsel %vm25_vm2, %v21_v10, %v29_v15 }
   0x8   :  { %376 = vmatprep.subr.mxu0 %v41_v4  ;;  %397 = vmatprep.subr.mxu1 %v41_v4  ;;  %v35_v21 = vsel %vm27_vm3, %v23_v11, %v31_v16 }
   0x9   :  { %377 = vmatpush3.msra.mxu0 %v41_v4  ;;  %406 = vmatpush3.msra.mxu1 %v41_v4 }
   0xa   :  { %378 = vmatprep.subr.mxu0 %v40_v5  ;;  %398 = vmatprep.subr.mxu1 %v40_v5 }
   0xb   :  { %379 = vmatpush3.msra.mxu0 %v40_v5  ;;  %407 = vmatpush3.msra.mxu1 %v40_v5 }
   0xc   :  { %380 = vmatprep.subr.mxu0 %v39_v6  ;;  %399 = vmatprep.subr.mxu1 %v39_v6 }
   0xd   :  { %381 = vmatpush3.msra.mxu0 %v39_v6  ;;  %408 = vmatpush3.msra.mxu1 %v39_v6 }
   0xe   :  { %382 = vmatprep.subr.mxu0 %v38_v9  ;;  %400 = vmatprep.subr.mxu1 %v38_v9 }
   0xf   :  { %383 = vmatpush3.msra.mxu0 %v38_v9  ;;  %409 = vmatpush3.msra.mxu1 %v38_v9 }
  0x10   :  { %384 = vmatprep.subr.mxu0 %v37_v12  ;;  %401 = vmatprep.subr.mxu1 %v37_v12 }
  0x11   :  { %385 = vmatpush3.msra.mxu0 %v37_v12  ;;  %410 = vmatpush3.msra.mxu1 %v37_v12 }
  0x12   :  { %386 = vmatprep.subr.mxu0 %v36_v17  ;;  %402 = vmatprep.subr.mxu1 %v36_v17 }
  0x13   :  { %387 = vmatpush3.msra.mxu0 %v36_v17  ;;  %411 = vmatpush3.msra.mxu1 %v36_v17 }
  0x14   :  { %388 = vmatprep.mubr.msk.f32.mxu0 %vm52_vm4, %v32_v18  ;;  %391 = vmatprep.mubr.msk.f32.mxu1 %vm52_vm4, %v34_v19 }
  0x15   :  { %389 = vmatmul.mubr.msk.f32.vlgmr.msra.gmra.mxu0 %vm52_vm4, %v33_v20  ;;  %392 = vmatmul.mubr.msk.f32.vlgmr.msra.gmra.mxu1 %vm52_vm4, %v35_v21 }
  0x16   :  { %250 = vadd.xlane.f32.xlu1 %v417_v2  ;;  %273 = vadd.xlane.f32.xlu0 %v417_v2 }
  0x1a   :  { %276 = vadd.xlane.f32.xlu1 %v417_v2  ;;  %182 = vadd.xlane.f32.xlu0 %v417_v2 }
  0x1e   :  { %205 = vadd.xlane.f32.xlu1 %v417_v2 }
  0x8a   :  { %v248_v43 = vpop.xlane.xlu1 %247  ;;  %v180_v44 = vpop.xlane.xlu0 %179 }
  0x9f   :  { %v251_v45 = vpop.xlane.xlu1 %250  ;;  %v274_v46 = vpop.xlane.xlu0 %273 }
  0xa0   :  { %v258_v51 = vadd.f32 %v251_v45, %v248_v43 }
  0xa3   :  { %v277_v47 = vpop.xlane.xlu1 %276  ;;  %v183_v48 = vpop.xlane.xlu0 %182 }
  0xa4   :  { %v284_v62 = vadd.f32 %v277_v47, %v274_v46 }
  0xa7   :  { %v206_v49 = vpop.xlane.xlu1 %205 }
  0xd5   :  { %v390_v23 = vpop.f32.mrf.mxu0  ;;  %v393_v24 = vpop.f32.mrf.mxu1 }
  0xd6   :  { %v497_v25 = vadd.f32 %v390_v23, %v350_v22  ;;  %v499_v28 = vadd.f32 %v393_v24, %v350_v22 }
  0xd7   :  { %v131_v26 = vpop.f32.mrf.mxu0  ;;  %v141_v27 = vpop.f32.mrf.mxu1 }
  0xd8   :  { %v501_v29 = vadd.f32 %v350_v22, %v131_v26  ;;  %v503_v30 = vadd.f32 %v350_v22, %v141_v27  ;;  %v175_v31 = vsel %vm171_vm5, %v497_v25, 0.0  ;;  %v255_v34 = vsel %vm171_vm5, %v499_v28, 0.0 }
  0xd9   :  { %176 = vadd.xlane.f32.xlu0 %v175_v31  ;;  %v195_v38 = vmul.f32 %v497_v25, %v497_v25  ;;  %v271_v40 = vmul.f32 %v499_v28, %v499_v28 }
  0xda   :  { %v252_v32 = vsel %vm171_vm5, %v503_v30, 0.0  ;;  %v194_v33 = vmul.f32 %v501_v29, %v501_v29  ;;  %v270_v36 = vmul.f32 %v503_v30, %v503_v30  ;;  %v172_v37 = vsel %vm171_vm5, %v501_v29, 0.0 }
  0xdb   :  { %253 = vadd.xlane.f32.xlu1 %v252_v32  ;;  %v201_v41 = vsel %vm171_vm5, %v195_v38, 0.0  ;;  %v281_v42 = vsel %vm171_vm5, %v271_v40, 0.0 }
  0xdc   :  { %v198_v35 = vsel %vm171_vm5, %v194_v33, 0.0  ;;  %v278_v39 = vsel %vm171_vm5, %v270_v36, 0.0 }
  0xdd   :  { %256 = vadd.xlane.f32.xlu0 %v255_v34 }
  0xdf   :  { %199 = vadd.xlane.f32.xlu1 %v198_v35 }
  0xe1   :  { %173 = vadd.xlane.f32.xlu0 %v172_v37 }
  0xe3   :  { %279 = vadd.xlane.f32.xlu1 %v278_v39 }
  0xe5   :  { %202 = vadd.xlane.f32.xlu0 %v201_v41 }
  0xe7   :  { %282 = vadd.xlane.f32.xlu1 %v281_v42 }
  0xe9   :  { %208 = vadd.xlane.f32.xlu0 %v417_v2 }
 0x162   :  { %v177_v50 = vpop.xlane.xlu0 %176 }
 0x164   :  { %v254_v52 = vpop.xlane.xlu1 %253 }
 0x165   :  { %v259_v53 = vadd.f32 %v258_v51, %v254_v52 }
 0x166   :  { %v257_v54 = vpop.xlane.xlu0 %256 }
 0x167   :  { %v260_v55 = vadd.f32 %v259_v53, %v257_v54  ;;  %v356_v54 = vld [vmem:[%s556_s4] ss:$0 sm:$0xff] }
 0x168   :  { %v200_v56 = vpop.xlane.xlu1 %199 }
 0x169   :  { %v261_v57 = vrot.slane %v260_v55, 4 }
 0x16a   :  { %v174_v58 = vpop.xlane.xlu0 %173 }
 0x16b   :  { %v262_v59 = vadd.f32 %v261_v57, %v260_v55  ;;  %v184_v60 = vadd.f32 %v177_v50, %v174_v58 }
 0x16c   :  { %v280_v61 = vpop.xlane.xlu1 %279 }
 0x16d   :  { %v263_v63 = vrot.slane %v262_v59, 2  ;;  %v185_v0 = vadd.f32 %v184_v60, %v180_v44  ;;  %v285_v3 = vadd.f32 %v284_v62, %v280_v61 }
 0x16e   :  { %v203_v1 = vpop.xlane.xlu0 %202 }
 0x16f   :  { %v186_v2 = vadd.f32 %v185_v0, %v183_v48  ;;  %v210_v4 = vadd.f32 %v203_v1, %v200_v56  ;;  %v264_v5 = vadd.f32 %v263_v63, %v262_v59  ;;  %v355_v48 = vld [vmem:[%s555_s3] ss:$0 sm:$0xff] }
 0x170   :  { %v283_v6 = vpop.xlane.xlu1 %282 }
 0x171   :  { %v187_v7 = vrot.slane %v186_v2, 4  ;;  %v286_v8 = vadd.f32 %v285_v3, %v283_v6  ;;  %v211_v9 = vadd.f32 %v210_v4, %v206_v49  ;;  %v265_v14 = vrot.slane %v264_v5, 1 }
 0x172   :  { %v209_v10 = vpop.xlane.xlu0 %208 }
 0x173   :  { %v188_v11 = vadd.f32 %v187_v7, %v186_v2  ;;  %v287_v12 = vrot.slane %v286_v8, 4  ;;  %v212_v13 = vadd.f32 %v211_v9, %v209_v10  ;;  %v266_v19 = vadd.f32 %v265_v14, %v264_v5 }
 0x175   :  { %v189_v15 = vrot.slane %v188_v11, 2  ;;  %v288_v16 = vadd.f32 %v287_v12, %v286_v8  ;;  %v213_v17 = vrot.slane %v212_v13, 4  ;;  %v267_v27 = vmul.f32 0.0026041667, %v266_v19 }
 0x177   :  { %v190_v18 = vadd.f32 %v189_v15, %v188_v11  ;;  %v289_v20 = vrot.slane %v288_v16, 2  ;;  %v214_v21 = vadd.f32 %v213_v17, %v212_v13  ;;  %v294_v36 = vmul.f32 %v267_v27, %v267_v27 }
 0x178   :  { %v306_v45 = vsub.f32 %v503_v30, %v267_v27  ;;  %v307_v46 = vsub.f32 %v499_v28, %v267_v27 }
 0x179   :  { %v191_v22 = vrot.slane %v190_v18, 1  ;;  %v290_v23 = vadd.f32 %v289_v20, %v288_v16  ;;  %v215_v24 = vrot.slane %v214_v21, 2 }
 0x17b   :  { %v192_v26 = vadd.f32 %v191_v22, %v190_v18  ;;  %v291_v31 = vrot.slane %v290_v23, 1  ;;  %v216_v32 = vadd.f32 %v215_v24, %v214_v21 }
 0x17d   :  { %v193_v33 = vmul.f32 0.0026041667, %v192_v26  ;;  %v292_v34 = vadd.f32 %v291_v31, %v290_v23  ;;  %v217_v35 = vrot.slane %v216_v32, 1 }
 0x17f   :  { %v293_v37 = vmul.f32 0.0026041667, %v292_v34  ;;  %v218_v38 = vadd.f32 %v217_v35, %v216_v32  ;;  %v220_v40 = vmul.f32 %v193_v33, %v193_v33  ;;  %v304_v49 = vsub.f32 %v501_v29, %v193_v33 }
 0x180   :  { %v305_v50 = vsub.f32 %v497_v25, %v193_v33 }
 0x181   :  { %v295_v39 = vsub.f32 %v293_v37, %v294_v36  ;;  %v219_v41 = vmul.f32 0.0026041667, %v218_v38 }
 0x183   :  { %v310_v42 = vadd.f32 1e-05, %v295_v39  ;;  %v221_v43 = vsub.f32 %v219_v41, %v220_v40 }
 0x185   :  { %413 = vrsqrt.f32 %v310_v42  ;;  %v308_v44 = vadd.f32 1e-05, %v221_v43 }
 0x187   :  { %415 = vrsqrt.f32 %v308_v44 }
 0x192   :  { %v414_v47 = vpop.eup %413 }
 0x193   :  { %v318_v51 = vmul.f32 %v414_v47, %v306_v45  ;;  %v319_v52 = vmul.f32 %v414_v47, %v307_v46 }
 0x194   :  { %v416_v53 = vpop.eup %415 }
 0x195   :  { %v329_v55 = vmul.f32 %v355_v48, %v318_v51  ;;  %v330_v30 = vmul.f32 %v355_v48, %v319_v52  ;;  %v316_v56 = vmul.f32 %v416_v53, %v304_v49  ;;  %v317_v28 = vmul.f32 %v416_v53, %v305_v50 }
 0x197   :  { %v340_v57 = vadd.f32 %v356_v54, %v329_v55  ;;  %v341_v58 = vadd.f32 %v356_v54, %v330_v30  ;;  %v327_v59 = vmul.f32 %v355_v48, %v316_v56  ;;  %v328_v60 = vmul.f32 %v355_v48, %v317_v28 }
 0x199   :  { %344 = vst.msk [vmem:[%s557_s5 + $0x10] sm:$0xff] %vm171_vm5, %v340_v57  ;;  %345 = vst.msk [vmem:[%s557_s5 + $0x18] sm:$0xff] %vm171_vm5, %v341_v58  ;;  %v338_v25 = vadd.f32 %v356_v54, %v327_v59  ;;  %v339_v29 = vadd.f32 %v356_v54, %v328_v60 }
 0x19b   :  { %342 = vst.msk [vmem:[%s557_s5] sm:$0xff] %vm171_vm5, %v338_v25  ;;  %343 = vst.msk [vmem:[%s557_s5 + $0x8] sm:$0xff] %vm171_vm5, %v339_v29 }

// kernel: model_forward.16
= control target key start
LH: loop header
LB: loop body
LE: loop exit
PB: predicated region body
PF: predicated region fallthrough
CT: control target
= control target key end

     0   :  { %vm52_vm4 = vcmask 982016   ;;  %vm150_vm5 = vcmask 130048   ;;  %s341_s1 = inlined_call_operand.vmem [shape: f32[120,16], index: 1, kind: input, shape index: {}]   ;;  %s342_s0 = inlined_call_operand.vmem [shape: f32[32,120], index: 0, kind: input, shape index: {}]   ;;  %s343_s2 = inlined_call_operand.vmem [shape: f32[1,16], index: 2, kind: input, shape index: {}]   ;;  %s344_s3 = inlined_call_operand.vmem [shape: f32[32,16], index: 3, kind: output, shape index: {}]  }
   0x1   :  { %v44_v0 = vld [vmem:[%s341_s1 + $0x70] sm:$0xff]  ;;  %v43_v1 = vld [vmem:[%s341_s1 + $0x68] sm:$0xff]  ;;  %v42_v2 = vld [vmem:[%s341_s1 + $0x60] sm:$0xff] }
   0x2   :  { %183 = vmatprep.subr.mxu0 %v44_v0  ;;  %219 = vmatprep.subr.mxu1 %v44_v0  ;;  %v41_v3 = vld [vmem:[%s341_s1 + $0x58] sm:$0xff]  ;;  %v40_v4 = vld [vmem:[%s341_s1 + $0x50] sm:$0xff]  ;;  %v39_v5 = vld [vmem:[%s341_s1 + $0x48] sm:$0xff] }
   0x3   :  { %184 = vmatpush3.msra.mxu0 %v44_v0  ;;  %234 = vmatpush3.msra.mxu1 %v44_v0  ;;  %v38_v6 = vld [vmem:[%s341_s1 + $0x40] sm:$0xff]  ;;  %v37_v7 = vld [vmem:[%s341_s1 + $0x38] sm:$0xff]  ;;  %v36_v8 = vld [vmem:[%s341_s1 + $0x30] sm:$0xff] }
   0x4   :  { %185 = vmatprep.subr.mxu0 %v43_v1  ;;  %220 = vmatprep.subr.mxu1 %v43_v1  ;;  %v35_v9 = vld [vmem:[%s341_s1 + $0x28] sm:$0xff]  ;;  %v34_v10 = vld [vmem:[%s341_s1 + $0x20] sm:$0xff]  ;;  %v33_v11 = vld [vmem:[%s341_s1 + $0x18] sm:$0xff] }
   0x5   :  { %186 = vmatpush3.msra.mxu0 %v43_v1  ;;  %235 = vmatpush3.msra.mxu1 %v43_v1  ;;  %v14_v12 = vld [vmem:[%s342_s0] sm:$0xff]  ;;  %v16_v13 = vld [vmem:[%s342_s0 + $0x10] sm:$0xff]  ;;  %v15_v15 = vld [vmem:[%s342_s0 + $0x8] sm:$0xff] }
   0x6   :  { %187 = vmatprep.subr.mxu0 %v42_v2  ;;  %221 = vmatprep.subr.mxu1 %v42_v2  ;;  %v32_v14 = vld [vmem:[%s341_s1 + $0x10] sm:$0xff]  ;;  %v17_v16 = vld [vmem:[%s342_s0 + $0x18] sm:$0xff]  ;;  %v31_v17 = vld [vmem:[%s341_s1 + $0x8] sm:$0xff]  ;;  %v22_v18 = vmul.f32 0.2, %v14_v12  ;;  %vm18_vm0 = vcmp.ge.f32.partialorder %v14_v12, 0.0 }
   0x7   :  { %188 = vmatpush3.msra.mxu0 %v42_v2  ;;  %236 = vmatpush3.msra.mxu1 %v42_v2  ;;  %v24_v19 = vmul.f32 0.2, %v16_v13  ;;  %vm20_vm1 = vcmp.ge.f32.partialorder %v16_v13, 0.0  ;;  %v23_v20 = vmul.f32 0.2, %v15_v15  ;;  %v30_v22 = vld [vmem:[%s341_s1] sm:$0xff] }
   0x8   :  { %189 = vmatprep.subr.mxu0 %v41_v3  ;;  %222 = vmatprep.subr.mxu1 %v41_v3  ;;  %v25_v21 = vmul.f32 0.2, %v17_v16  ;;  %vm19_vm2 = vcmp.ge.f32.partialorder %v15_v15, 0.0  ;;  %vm21_vm3 = vcmp.ge.f32.partialorder %v17_v16, 0.0  ;;  %v26_v23 = vsel %vm18_vm0, %v14_v12, %v22_v18  ;;  %v159_v27 = vld [vmem:[%s343_s2] ss:$0 sm:$0xff] }
   0x9   :  { %190 = vmatpush3.msra.mxu0 %v41_v3  ;;  %237 = vmatpush3.msra.mxu1 %v41_v3  ;;  %v28_v24 = vsel %vm20_vm1, %v16_v13, %v24_v19  ;;  %v27_v25 = vsel %vm19_vm2, %v15_v15, %v23_v20 }
   0xa   :  { %191 = vmatprep.subr.mxu0 %v40_v4  ;;  %223 = vmatprep.subr.mxu1 %v40_v4  ;;  %v29_v26 = vsel %vm21_vm3, %v17_v16, %v25_v21 }
   0xb   :  { %192 = vmatpush3.msra.mxu0 %v40_v4  ;;  %238 = vmatpush3.msra.mxu1 %v40_v4 }
   0xc   :  { %193 = vmatprep.subr.mxu0 %v39_v5  ;;  %224 = vmatprep.subr.mxu1 %v39_v5 }
   0xd   :  { %194 = vmatpush3.msra.mxu0 %v39_v5  ;;  %239 = vmatpush3.msra.mxu1 %v39_v5 }
   0xe   :  { %195 = vmatprep.subr.mxu0 %v38_v6  ;;  %225 = vmatprep.subr.mxu1 %v38_v6 }
   0xf   :  { %196 = vmatpush3.msra.mxu0 %v38_v6  ;;  %240 = vmatpush3.msra.mxu1 %v38_v6 }
  0x10   :  { %197 = vmatprep.subr.mxu0 %v37_v7  ;;  %226 = vmatprep.subr.mxu1 %v37_v7 }
  0x11   :  { %198 = vmatpush3.msra.mxu0 %v37_v7  ;;  %241 = vmatpush3.msra.mxu1 %v37_v7 }
  0x12   :  { %199 = vmatprep.subr.mxu0 %v36_v8  ;;  %227 = vmatprep.subr.mxu1 %v36_v8 }
  0x13   :  { %200 = vmatpush3.msra.mxu0 %v36_v8  ;;  %242 = vmatpush3.msra.mxu1 %v36_v8 }
  0x14   :  { %201 = vmatprep.subr.mxu0 %v35_v9  ;;  %228 = vmatprep.subr.mxu1 %v35_v9 }
  0x15   :  { %202 = vmatpush3.msra.mxu0 %v35_v9  ;;  %243 = vmatpush3.msra.mxu1 %v35_v9 }
  0x16   :  { %203 = vmatprep.subr.mxu0 %v34_v10  ;;  %229 = vmatprep.subr.mxu1 %v34_v10 }
  0x17   :  { %204 = vmatpush3.msra.mxu0 %v34_v10  ;;  %244 = vmatpush3.msra.mxu1 %v34_v10 }
  0x18   :  { %205 = vmatprep.subr.mxu0 %v33_v11  ;;  %230 = vmatprep.subr.mxu1 %v33_v11 }
  0x19   :  { %206 = vmatpush3.msra.mxu0 %v33_v11  ;;  %245 = vmatpush3.msra.mxu1 %v33_v11 }
  0x1a   :  { %207 = vmatprep.subr.mxu0 %v32_v14  ;;  %231 = vmatprep.subr.mxu1 %v32_v14 }
  0x1b   :  { %208 = vmatpush3.msra.mxu0 %v32_v14  ;;  %246 = vmatpush3.msra.mxu1 %v32_v14 }
  0x1c   :  { %209 = vmatprep.subr.mxu0 %v31_v17  ;;  %232 = vmatprep.subr.mxu1 %v31_v17 }
  0x1d   :  { %210 = vmatpush3.msra.mxu0 %v31_v17  ;;  %247 = vmatpush3.msra.mxu1 %v31_v17 }
  0x1e   :  { %211 = vmatprep.subr.mxu0 %v30_v22  ;;  %233 = vmatprep.subr.mxu1 %v30_v22 }
  0x1f   :  { %212 = vmatpush3.msra.mxu0 %v30_v22  ;;  %248 = vmatpush3.msra.mxu1 %v30_v22 }
  0x20   :  { %213 = vmatprep.mubr.msk.f32.mxu0 %vm52_vm4, %v26_v23  ;;  %216 = vmatprep.mubr.msk.f32.mxu1 %vm52_vm4, %v28_v24 }
  0x21   :  { %214 = vmatmul.mubr.msk.f32.vlgmr.msra.gmra.mxu0 %vm52_vm4, %v27_v25  ;;  %217 = vmatmul.mubr.msk.f32.vlgmr.msra.gmra.mxu1 %vm52_vm4, %v29_v26 }
  0xe1   :  { %v215_v28 = vpop.f32.mrf.mxu0  ;;  %v218_v29 = vpop.f32.mrf.mxu1 }
  0xe2   :  { %v137_v30 = vadd.f32 %v215_v28, %v159_v27  ;;  %v147_v31 = vadd.f32 %v218_v29, %v159_v27 }
  0xe3   :  { %v131_v32 = vpop.f32.mrf.mxu0  ;;  %v141_v33 = vpop.f32.mrf.mxu1 }
  0xe4   :  { %152 = vst.msk [vmem:[%s344_s3 + $0x8] sm:$0xff] %vm150_vm5, %v137_v30  ;;  %154 = vst.msk [vmem:[%s344_s3 + $0x18] sm:$0xff] %vm150_vm5, %v147_v31  ;;  %v132_v34 = vadd.f32 %v159_v27, %v131_v32  ;;  %v142_v35 = vadd.f32 %v159_v27, %v141_v33 }
  0xe6   :  { %151 = vst.msk [vmem:[%s344_s3] sm:$0xff] %vm150_vm5, %v132_v34  ;;  %153 = vst.msk [vmem:[%s344_s3 + $0x10] sm:$0xff] %vm150_vm5, %v142_v35 }

// kernel: model_forward.18
= control target key start
LH: loop header
LB: loop body
LE: loop exit
PB: predicated region body
PF: predicated region fallthrough
CT: control target
= control target key end

     0   :  { %v410_v2 = vmov 0.0   ;;  %vm52_vm4 = vcmask 392192   ;;  %vm171_vm5 = vcmask 130048   ;;  %s553_s1 = inlined_call_operand.vmem [shape: f32[48,16], index: 1, kind: input, shape index: {}]   ;;  %s554_s0 = inlined_call_operand.vmem [shape: f32[32,48], index: 0, kind: input, shape index: {}]   ;;  %s555_s2 = inlined_call_operand.vmem [shape: f32[1,16], index: 2, kind: input, shape index: {}]   ;;  %s556_s3 = inlined_call_operand.vmem [shape: f32[1,16], index: 3, kind: input, shape index: {}]   ;;  %s557_s4 = inlined_call_operand.vmem [shape: f32[1,16], index: 4, kind: input, shape index: {}]   ;;  %s558_s5 = inlined_call_operand.vmem [shape: f32[32,16], index: 5, kind: input, shape index: {}]   ;;  %s559_s6 = inlined_call_operand.vmem [shape: f32[32,16], index: 6, kind: output, shape index: {}]  }
   0x1   :  { %v44_v0 = vld [vmem:[%s553_s1 + $0x28] sm:$0xff]  ;;  %v43_v1 = vld [vmem:[%s553_s1 + $0x20] sm:$0xff]  ;;  %247 = vadd.xlane.f32.xlu1 %v410_v2  ;;  %179 = vadd.xlane.f32.xlu0 %v410_v2  ;;  %v42_v3 = vld [vmem:[%s553_s1 + $0x18] sm:$0xff] }
   0x2   :  { %375 = vmatprep.subr.mxu0 %v44_v0  ;;  %393 = vmatprep.subr.mxu1 %v44_v0  ;;  %v23_v4 = vld [vmem:[%s554_s0] sm:$0xff]  ;;  %v25_v5 = vld [vmem:[%s554_s0 + $0x10] sm:$0xff]  ;;  %v24_v7 = vld [vmem:[%s554_s0 + $0x8] sm:$0xff] }
   0x3   :  { %376 = vmatpush3.msra.mxu0 %v44_v0  ;;  %399 = vmatpush3.msra.mxu1 %v44_v0  ;;  %v41_v6 = vld [vmem:[%s553_s1 + $0x10] sm:$0xff]  ;;  %v26_v8 = vld [vmem:[%s554_s0 + $0x18] sm:$0xff]  ;;  %v40_v9 = vld [vmem:[%s553_s1 + $0x8] sm:$0xff]  ;;  %v31_v10 = vmul.f32 0.2, %v23_v4  ;;  %vm27_vm0 = vcmp.ge.f32.partialorder %v23_v4, 0.0 }
   0x4   :  { %377 = vmatprep.subr.mxu0 %v43_v1  ;;  %394 = vmatprep.subr.mxu1 %v43_v1  ;;  %v33_v11 = vmul.f32 0.2, %v25_v5  ;;  %vm29_vm1 = vcmp.ge.f32.partialorder %v25_v5, 0.0  ;;  %v32_v12 = vmul.f32 0.2, %v24_v7  ;;  %v39_v14 = vld [vmem:[%s553_s1] sm:$0xff] }
   0x5   :  { %378 = vmatpush3.msra.mxu0 %v43_v1  ;;  %400 = vmatpush3.msra.mxu1 %v43_v1  ;;  %v34_v13 = vmul.f32 0.2, %v26_v8  ;;  %vm28_vm2 = vcmp.ge.f32.partialorder %v24_v7, 0.0  ;;  %vm30_vm3 = vcmp.ge.f32.partialorder %v26_v8, 0.0  ;;  %v35_v15 = vsel %vm27_vm0, %v23_v4, %v31_v10  ;;  %v358_v19 = vld [vmem:[%s555_s2] ss:$0 sm:$0xff] }
   0x6   :  { %379 = vmatprep.subr.mxu0 %v42_v3  ;;  %395 = vmatprep.subr.mxu1 %v42_v3  ;;  %v37_v16 = vsel %vm29_vm1, %v25_v5, %v33_v11  ;;  %v36_v17 = vsel %vm28_vm2, %v24_v7, %v32_v12 }
   0x7   :  { %380 = vmatpush3.msra.mxu0 %v42_v3  ;;  %401 = vmatpush3.msra.mxu1 %v42_v3  ;;  %v38_v18 = vsel %vm30_vm3, %v26_v8, %v34_v13 }
   0x8   :  { %381 = vmatprep.subr.mxu0 %v41_v6  ;;  %396 = vmatprep.subr.mxu1 %v41_v6 }
   0x9   :  { %382 = vmatpush3.msra.mxu0 %v41_v6  ;;  %402 = vmatpush3.msra.mxu1 %v41_v6 }
   0xa   :  { %383 = vmatprep.subr.mxu0 %v40_v9  ;;  %397 = vmatprep.subr.mxu1 %v40_v9 }
   0xb   :  { %384 = vmatpush3.msra.mxu0 %v40_v9  ;;  %403 = vmatpush3.msra.mxu1 %v40_v9 }
   0xc   :  { %385 = vmatprep.subr.mxu0 %v39_v14  ;;  %398 = vmatprep.subr.mxu1 %v39_v14 }
   0xd   :  { %386 = vmatpush3.msra.mxu0 %v39_v14  ;;  %404 = vmatpush3.msra.mxu1 %v39_v14 }
   0xe   :  { %387 = vmatprep.mubr.msk.f32.mxu0 %vm52_vm4, %v35_v15  ;;  %390 = vmatprep.mubr.msk.f32.mxu1 %vm52_vm4, %v37_v16 }
   0xf   :  { %388 = vmatmul.mubr.msk.f32.vlgmr.msra.gmra.mxu0 %vm52_vm4, %v36_v17  ;;  %391 = vmatmul.mubr.msk.f32.vlgmr.msra.gmra.mxu1 %vm52_vm4, %v38_v18 }
  0x10   :  { %250 = vadd.xlane.f32.xlu1 %v410_v2  ;;  %273 = vadd.xlane.f32.xlu0 %v410_v2 }
  0x14   :  { %276 = vadd.xlane.f32.xlu1 %v410_v2  ;;  %182 = vadd.xlane.f32.xlu0 %v410_v2 }
  0x18   :  { %205 = vadd.xlane.f32.xlu1 %v410_v2 }
  0x8a   :  { %v248_v40 = vpop.xlane.xlu1 %247  ;;  %v180_v41 = vpop.xlane.xlu0 %179 }
  0x99   :  { %v251_v42 = vpop.xlane.xlu1 %250  ;;  %v274_v43 = vpop.xlane.xlu0 %273 }
  0x9a   :  { %v258_v48 = vadd.f32 %v251_v42, %v248_v40 }
  0x9d   :  { %v277_v44 = vpop.xlane.xlu1 %276  ;;  %v183_v45 = vpop.xlane.xlu0 %182 }
  0x9e   :  { %v284_v59 = vadd.f32 %v277_v44, %v274_v43 }
  0xa1   :  { %v206_v46 = vpop.xlane.xlu1 %205 }
  0xcf   :  { %v389_v20 = vpop.f32.mrf.mxu0  ;;  %v392_v21 = vpop.f32.mrf.mxu1 }
  0xd0   :  { %v486_v22 = vadd.f32 %v389_v20, %v358_v19  ;;  %v488_v25 = vadd.f32 %v392_v21, %v358_v19 }
  0xd1   :  { %v131_v23 = vpop.f32.mrf.mxu0  ;;  %v141_v24 = vpop.f32.mrf.mxu1 }
  0xd2   :  { %v490_v26 = vadd.f32 %v358_v19, %v131_v23  ;;  %v492_v27 = vadd.f32 %v358_v19, %v141_v24  ;;  %v175_v28 = vsel %vm171_vm5, %v486_v22, 0.0  ;;  %v255_v31 = vsel %vm171_vm5, %v488_v25, 0.0 }
  0xd3   :  { %176 = vadd.xlane.f32.xlu0 %v175_v28  ;;  %v195_v35 = vmul.f32 %v486_v22, %v486_v22  ;;  %v271_v37 = vmul.f32 %v488_v25, %v488_v25 }
  0xd4   :  { %v252_v29 = vsel %vm171_vm5, %v492_v27, 0.0  ;;  %v194_v30 = vmul.f32 %v490_v26, %v490_v26  ;;  %v270_v33 = vmul.f32 %v492_v27, %v492_v27  ;;  %v172_v34 = vsel %vm171_vm5, %v490_v26, 0.0 }
  0xd5   :  { %253 = vadd.xlane.f32.xlu1 %v252_v29  ;;  %v201_v38 = vsel %vm171_vm5, %v195_v35, 0.0  ;;  %v281_v39 = vsel %vm171_vm5, %v271_v37, 0.0 }
  0xd6   :  { %v198_v32 = vsel %vm171_vm5, %v194_v30, 0.0  ;;  %v278_v36 = vsel %vm171_vm5, %v270_v33, 0.0 }
  0xd7   :  { %256 = vadd.xlane.f32.xlu0 %v255_v31 }
  0xd9   :  { %199 = vadd.xlane.f32.xlu1 %v198_v32 }
  0xdb   :  { %173 = vadd.xlane.f32.xlu0 %v172_v34 }
  0xdd   :  { %279 = vadd.xlane.f32.xlu1 %v278_v36 }
  0xdf   :  { %202 = vadd.xlane.f32.xlu0 %v201_v38 }
  0xe1   :  { %282 = vadd.xlane.f32.xlu1 %v281_v39 }
  0xe3   :  { %208 = vadd.xlane.f32.xlu0 %v410_v2 }
 0x15c   :  { %v177_v47 = vpop.xlane.xlu0 %176 }
 0x15e   :  { %v254_v49 = vpop.xlane.xlu1 %253 }
 0x15f   :  { %v259_v50 = vadd.f32 %v258_v48, %v254_v49 }
 0x160   :  { %v257_v51 = vpop.xlane.xlu0 %256 }
 0x161   :  { %v260_v52 = vadd.f32 %v259_v50, %v257_v51  ;;  %v364_v51 = vld [vmem:[%s557_s4] ss:$0 sm:$0xff] }
 0x162   :  { %v200_v53 = vpop.xlane.xlu1 %199 }
 0x163   :  { %v261_v54 = vrot.slane %v260_v52, 4 }
 0x164   :  { %v174_v55 = vpop.xlane.xlu0 %173 }
 0x165   :  { %v262_v56 = vadd.f32 %v261_v54, %v260_v52  ;;  %v184_v57 = vadd.f32 %v177_v47, %v174_v55  ;;  %v344_v54 = vld [vmem:[%s558_s5 + $0x10] sm:$0xff] }
 0x166   :  { %v280_v58 = vpop.xlane.xlu1 %279 }
 0x167   :  { %v263_v60 = vrot.slane %v262_v56, 2  ;;  %v185_v61 = vadd.f32 %v184_v57, %v180_v41  ;;  %v285_v0 = vadd.f32 %v284_v59, %v280_v58  ;;  %v342_v58 = vld [vmem:[%s558_s5] sm:$0xff]  ;;  %v343_v59 = vld [vmem:[%s558_s5 + $0x8] sm:$0xff] }
 0x168   :  { %v203_v62 = vpop.xlane.xlu0 %202 }
 0x169   :  { %v186_v63 = vadd.f32 %v185_v61, %v183_v45  ;;  %v210_v1 = vadd.f32 %v203_v62, %v200_v53  ;;  %v264_v2 = vadd.f32 %v263_v60, %v262_v56  ;;  %v363_v45 = vld [vmem:[%s556_s3] ss:$0 sm:$0xff] }
 0x16a   :  { %v283_v3 = vpop.xlane.xlu1 %282 }
 0x16b   :  { %v187_v4 = vrot.slane %v186_v63, 4  ;;  %v286_v5 = vadd.f32 %v285_v0, %v283_v3  ;;  %v211_v6 = vadd.f32 %v210_v1, %v206_v46  ;;  %v265_v11 = vrot.slane %v264_v2, 1 }
 0x16c   :  { %v209_v7 = vpop.xlane.xlu0 %208 }
 0x16d   :  { %v188_v8 = vadd.f32 %v187_v4, %v186_v63  ;;  %v287_v9 = vrot.slane %v286_v5, 4  ;;  %v212_v10 = vadd.f32 %v211_v6, %v209_v7  ;;  %v266_v16 = vadd.f32 %v265_v11, %v264_v2 }
 0x16f   :  { %v189_v12 = vrot.slane %v188_v8, 2  ;;  %v288_v13 = vadd.f32 %v287_v9, %v286_v5  ;;  %v213_v14 = vrot.slane %v212_v10, 4  ;;  %v267_v24 = vmul.f32 0.00390625, %v266_v16 }
 0x171   :  { %v190_v15 = vadd.f32 %v189_v12, %v188_v8  ;;  %v289_v17 = vrot.slane %v288_v13, 2  ;;  %v214_v18 = vadd.f32 %v213_v14, %v212_v10  ;;  %v294_v33 = vmul.f32 %v267_v24, %v267_v24 }
 0x172   :  { %v306_v42 = vsub.f32 %v492_v27, %v267_v24  ;;  %v307_v43 = vsub.f32 %v488_v25, %v267_v24 }
 0x173   :  { %v191_v19 = vrot.slane %v190_v15, 1  ;;  %v290_v20 = vadd.f32 %v289_v17, %v288_v13  ;;  %v215_v21 = vrot.slane %v214_v18, 2 }
 0x175   :  { %v192_v23 = vadd.f32 %v191_v19, %v190_v15  ;;  %v291_v28 = vrot.slane %v290_v20, 1  ;;  %v216_v29 = vadd.f32 %v215_v21, %v214_v18 }
 0x177   :  { %v193_v30 = vmul.f32 0.00390625, %v192_v23  ;;  %v292_v31 = vadd.f32 %v291_v28, %v290_v20  ;;  %v217_v32 = vrot.slane %v216_v29, 1 }
 0x179   :  { %v293_v34 = vmul.f32 0.00390625, %v292_v31  ;;  %v218_v35 = vadd.f32 %v217_v32, %v216_v29  ;;  %v220_v37 = vmul.f32 %v193_v30, %v193_v30  ;;  %v304_v46 = vsub.f32 %v490_v26, %v193_v30  ;;  %v345_v26 = vld [vmem:[%s558_s5 + $0x18] sm:$0xff] }
 0x17a   :  { %v305_v47 = vsub.f32 %v486_v22, %v193_v30 }
 0x17b   :  { %v295_v36 = vsub.f32 %v293_v34, %v294_v33  ;;  %v219_v38 = vmul.f32 0.00390625, %v218_v35 }
 0x17d   :  { %v310_v39 = vadd.f32 1e-05, %v295_v36  ;;  %v221_v40 = vsub.f32 %v219_v38, %v220_v37 }
 0x17f   :  { %406 = vrsqrt.f32 %v310_v39  ;;  %v308_v41 = vadd.f32 1e-05, %v221_v40 }
 0x181   :  { %408 = vrsqrt.f32 %v308_v41 }
 0x18c   :  { %v407_v44 = vpop.eup %406 }
 0x18d   :  { %v318_v48 = vmul.f32 %v407_v44, %v306_v42  ;;  %v319_v49 = vmul.f32 %v407_v44, %v307_v43 }
 0x18e   :  { %v409_v50 = vpop.eup %408 }
 0x18f   :  { %v329_v52 = vmul.f32 %v363_v45, %v318_v48  ;;  %v330_v27 = vmul.f32 %v363_v45, %v319_v49  ;;  %v316_v53 = vmul.f32 %v409_v50, %v304_v46  ;;  %v317_v25 = vmul.f32 %v409_v50, %v305_v47 }
 0x191   :  { %v340_v22 = vadd.f32 %v364_v51, %v329_v52  ;;  %v341_v55 = vadd.f32 %v364_v51, %v330_v27  ;;  %v327_v56 = vmul.f32 %v363_v45, %v316_v53  ;;  %v328_v57 = vmul.f32 %v363_v45, %v317_v25 }
 0x193   :  { %v348_v60 = vadd.f32 %v344_v54, %v340_v22  ;;  %v349_v61 = vadd.f32 %v345_v26, %v341_v55  ;;  %v338_v62 = vadd.f32 %v364_v51, %v327_v56  ;;  %v339_v63 = vadd.f32 %v364_v51, %v328_v57 }
 0x195   :  { %352 = vst.msk [vmem:[%s559_s6 + $0x10] sm:$0xff] %vm171_vm5, %v348_v60  ;;  %353 = vst.msk [vmem:[%s559_s6 + $0x18] sm:$0xff] %vm171_vm5, %v349_v61  ;;  %v346_v0 = vadd.f32 %v342_v58, %v338_v62  ;;  %v347_v1 = vadd.f32 %v343_v59, %v339_v63 }
 0x197   :  { %350 = vst.msk [vmem:[%s559_s6] sm:$0xff] %vm171_vm5, %v346_v0  ;;  %351 = vst.msk [vmem:[%s559_s6 + $0x8] sm:$0xff] %vm171_vm5, %v347_v1 }

// kernel: model_forward.17
= control target key start
LH: loop header
LB: loop body
LE: loop exit
PB: predicated region body
PF: predicated region fallthrough
CT: control target
= control target key end

     0   :  { %v399_v2 = vmov 0.0   ;;  %vm49_vm4 = vcmask 392192   ;;  %vm168_vm5 = vcmask 130048   ;;  %s525_s1 = inlined_call_operand.vmem [shape: f32[48,16], index: 1, kind: input, shape index: {}]   ;;  %s526_s0 = inlined_call_operand.vmem [shape: f32[32,48], index: 0, kind: input, shape index: {}]   ;;  %s527_s2 = inlined_call_operand.vmem [shape: f32[1,16], index: 2, kind: input, shape index: {}]   ;;  %s528_s3 = inlined_call_operand.vmem [shape: f32[1,16], index: 3, kind: input, shape index: {}]   ;;  %s529_s4 = inlined_call_operand.vmem [shape: f32[1,16], index: 4, kind: input, shape index: {}]   ;;  %s530_s5 = inlined_call_operand.vmem [shape: f32[32,16], index: 5, kind: output, shape index: {}]  }
   0x1   :  { %v41_v0 = vld [vmem:[%s525_s1 + $0x28] sm:$0xff]  ;;  %v40_v1 = vld [vmem:[%s525_s1 + $0x20] sm:$0xff]  ;;  %244 = vadd.xlane.f32.xlu1 %v399_v2  ;;  %176 = vadd.xlane.f32.xlu0 %v399_v2  ;;  %v39_v3 = vld [vmem:[%s525_s1 + $0x18] sm:$0xff] }
   0x2   :  { %364 = vmatprep.subr.mxu0 %v41_v0  ;;  %382 = vmatprep.subr.mxu1 %v41_v0  ;;  %v20_v4 = vld [vmem:[%s526_s0] sm:$0xff]  ;;  %v22_v5 = vld [vmem:[%s526_s0 + $0x10] sm:$0xff]  ;;  %v21_v7 = vld [vmem:[%s526_s0 + $0x8] sm:$0xff] }
   0x3   :  { %365 = vmatpush3.msra.mxu0 %v41_v0  ;;  %388 = vmatpush3.msra.mxu1 %v41_v0  ;;  %v38_v6 = vld [vmem:[%s525_s1 + $0x10] sm:$0xff]  ;;  %v23_v8 = vld [vmem:[%s526_s0 + $0x18] sm:$0xff]  ;;  %v37_v9 = vld [vmem:[%s525_s1 + $0x8] sm:$0xff]  ;;  %v28_v10 = vmul.f32 0.2, %v20_v4  ;;  %vm24_vm0 = vcmp.ge.f32.partialorder %v20_v4, 0.0 }
   0x4   :  { %366 = vmatprep.subr.mxu0 %v40_v1  ;;  %383 = vmatprep.subr.mxu1 %v40_v1  ;;  %v30_v11 = vmul.f32 0.2, %v22_v5  ;;  %vm26_vm1 = vcmp.ge.f32.partialorder %v22_v5, 0.0  ;;  %v29_v12 = vmul.f32 0.2, %v21_v7  ;;  %v36_v14 = vld [vmem:[%s525_s1] sm:$0xff] }
   0x5   :  { %367 = vmatpush3.msra.mxu0 %v40_v1  ;;  %389 = vmatpush3.msra.mxu1 %v40_v1  ;;  %v31_v13 = vmul.f32 0.2, %v23_v8  ;;  %vm25_vm2 = vcmp.ge.f32.partialorder %v21_v7, 0.0  ;;  %vm27_vm3 = vcmp.ge.f32.partialorder %v23_v8, 0.0  ;;  %v32_v15 = vsel %vm24_vm0, %v20_v4, %v28_v10  ;;  %v347_v19 = vld [vmem:[%s527_s2] ss:$0 sm:$0xff] }
   0x6   :  { %368 = vmatprep.subr.mxu0 %v39_v3  ;;  %384 = vmatprep.subr.mxu1 %v39_v3  ;;  %v34_v16 = vsel %vm26_vm1, %v22_v5, %v30_v11  ;;  %v33_v17 = vsel %vm25_vm2, %v21_v7, %v29_v12 }
   0x7   :  { %369 = vmatpush3.msra.mxu0 %v39_v3  ;;  %390 = vmatpush3.msra.mxu1 %v39_v3  ;;  %v35_v18 = vsel %vm27_vm3, %v23_v8, %v31_v13 }
   0x8   :  { %370 = vmatprep.subr.mxu0 %v38_v6  ;;  %385 = vmatprep.subr.mxu1 %v38_v6 }
   0x9   :  { %371 = vmatpush3.msra.mxu0 %v38_v6  ;;  %391 = vmatpush3.msra.mxu1 %v38_v6 }
   0xa   :  { %372 = vmatprep.subr.mxu0 %v37_v9  ;;  %386 = vmatprep.subr.mxu1 %v37_v9 }
   0xb   :  { %373 = vmatpush3.msra.mxu0 %v37_v9  ;;  %392 = vmatpush3.msra.mxu1 %v37_v9 }
   0xc   :  { %374 = vmatprep.subr.mxu0 %v36_v14  ;;  %387 = vmatprep.subr.mxu1 %v36_v14 }
   0xd   :  { %375 = vmatpush3.msra.mxu0 %v36_v14  ;;  %393 = vmatpush3.msra.mxu1 %v36_v14 }
   0xe   :  { %376 = vmatprep.mubr.msk.f32.mxu0 %vm49_vm4, %v32_v15  ;;  %379 = vmatprep.mubr.msk.f32.mxu1 %vm49_vm4, %v34_v16 }
   0xf   :  { %377 = vmatmul.mubr.msk.f32.vlgmr.msra.gmra.mxu0 %vm49_vm4, %v33_v17  ;;  %380 = vmatmul.mubr.msk.f32.vlgmr.msra.gmra.mxu1 %vm49_vm4, %v35_v18 }
  0x10   :  { %247 = vadd.xlane.f32.xlu1 %v399_v2  ;;  %270 = vadd.xlane.f32.xlu0 %v399_v2 }
  0x14   :  { %273 = vadd.xlane.f32.xlu1 %v399_v2  ;;  %179 = vadd.xlane.f32.xlu0 %v399_v2 }
  0x18   :  { %202 = vadd.xlane.f32.xlu1 %v399_v2 }
  0x8a   :  { %v245_v40 = vpop.xlane.xlu1 %244  ;;  %v177_v41 = vpop.xlane.xlu0 %176 }
  0x99   :  { %v248_v42 = vpop.xlane.xlu1 %247  ;;  %v271_v43 = vpop.xlane.xlu0 %270 }
  0x9a   :  { %v255_v48 = vadd.f32 %v248_v42, %v245_v40 }
  0x9d   :  { %v274_v44 = vpop.xlane.xlu1 %273  ;;  %v180_v45 = vpop.xlane.xlu0 %179 }
  0x9e   :  { %v281_v59 = vadd.f32 %v274_v44, %v271_v43 }
  0xa1   :  { %v203_v46 = vpop.xlane.xlu1 %202 }
  0xcf   :  { %v378_v20 = vpop.f32.mrf.mxu0  ;;  %v381_v21 = vpop.f32.mrf.mxu1 }
  0xd0   :  { %v470_v22 = vadd.f32 %v378_v20, %v347_v19  ;;  %v472_v25 = vadd.f32 %v381_v21, %v347_v19 }
  0xd1   :  { %v128_v23 = vpop.f32.mrf.mxu0  ;;  %v138_v24 = vpop.f32.mrf.mxu1 }
  0xd2   :  { %v474_v26 = vadd.f32 %v347_v19, %v128_v23  ;;  %v476_v27 = vadd.f32 %v347_v19, %v138_v24  ;;  %v172_v28 = vsel %vm168_vm5, %v470_v22, 0.0  ;;  %v252_v31 = vsel %vm168_vm5, %v472_v25, 0.0 }
  0xd3   :  { %173 = vadd.xlane.f32.xlu0 %v172_v28  ;;  %v192_v35 = vmul.f32 %v470_v22, %v470_v22  ;;  %v268_v37 = vmul.f32 %v472_v25, %v472_v25 }
  0xd4   :  { %v249_v29 = vsel %vm168_vm5, %v476_v27, 0.0  ;;  %v191_v30 = vmul.f32 %v474_v26, %v474_v26  ;;  %v267_v33 = vmul.f32 %v476_v27, %v476_v27  ;;  %v169_v34 = vsel %vm168_vm5, %v474_v26, 0.0 }
  0xd5   :  { %250 = vadd.xlane.f32.xlu1 %v249_v29  ;;  %v198_v38 = vsel %vm168_vm5, %v192_v35, 0.0  ;;  %v278_v39 = vsel %vm168_vm5, %v268_v37, 0.0 }
  0xd6   :  { %v195_v32 = vsel %vm168_vm5, %v191_v30, 0.0  ;;  %v275_v36 = vsel %vm168_vm5, %v267_v33, 0.0 }
  0xd7   :  { %253 = vadd.xlane.f32.xlu0 %v252_v31 }
  0xd9   :  { %196 = vadd.xlane.f32.xlu1 %v195_v32 }
  0xdb   :  { %170 = vadd.xlane.f32.xlu0 %v169_v34 }
  0xdd   :  { %276 = vadd.xlane.f32.xlu1 %v275_v36 }
  0xdf   :  { %199 = vadd.xlane.f32.xlu0 %v198_v38 }
  0xe1   :  { %279 = vadd.xlane.f32.xlu1 %v278_v39 }
  0xe3   :  { %205 = vadd.xlane.f32.xlu0 %v399_v2 }
 0x15c   :  { %v174_v47 = vpop.xlane.xlu0 %173 }
 0x15e   :  { %v251_v49 = vpop.xlane.xlu1 %250 }
 0x15f   :  { %v256_v50 = vadd.f32 %v255_v48, %v251_v49 }
 0x160   :  { %v254_v51 = vpop.xlane.xlu0 %253 }
 0x161   :  { %v257_v52 = vadd.f32 %v256_v50, %v254_v51  ;;  %v353_v51 = vld [vmem:[%s529_s4] ss:$0 sm:$0xff] }
 0x162   :  { %v197_v53 = vpop.xlane.xlu1 %196 }
 0x163   :  { %v258_v54 = vrot.slane %v257_v52, 4 }
 0x164   :  { %v171_v55 = vpop.xlane.xlu0 %170 }
 0x165   :  { %v259_v56 = vadd.f32 %v258_v54, %v257_v52  ;;  %v181_v57 = vadd.f32 %v174_v47, %v171_v55 }
 0x166   :  { %v277_v58 = vpop.xlane.xlu1 %276 }
 0x167   :  { %v260_v60 = vrot.slane %v259_v56, 2  ;;  %v182_v61 = vadd.f32 %v181_v57, %v177_v41  ;;  %v282_v0 = vadd.f32 %v281_v59, %v277_v58 }
 0x168   :  { %v200_v62 = vpop.xlane.xlu0 %199 }
 0x169   :  { %v183_v63 = vadd.f32 %v182_v61, %v180_v45  ;;  %v207_v1 = vadd.f32 %v200_v62, %v197_v53  ;;  %v261_v2 = vadd.f32 %v260_v60, %v259_v56  ;;  %v352_v45 = vld [vmem:[%s528_s3] ss:$0 sm:$0xff] }
 0x16a   :  { %v280_v3 = vpop.xlane.xlu1 %279 }
 0x16b   :  { %v184_v4 = vrot.slane %v183_v63, 4  ;;  %v283_v5 = vadd.f32 %v282_v0, %v280_v3  ;;  %v208_v6 = vadd.f32 %v207_v1, %v203_v46  ;;  %v262_v11 = vrot.slane %v261_v2, 1 }
 0x16c   :  { %v206_v7 = vpop.xlane.xlu0 %205 }
 0x16d   :  { %v185_v8 = vadd.f32 %v184_v4, %v183_v63  ;;  %v284_v9 = vrot.slane %v283_v5, 4  ;;  %v209_v10 = vadd.f32 %v208_v6, %v206_v7  ;;  %v263_v16 = vadd.f32 %v262_v11, %v261_v2 }
 0x16f   :  { %v186_v12 = vrot.slane %v185_v8, 2  ;;  %v285_v13 = vadd.f32 %v284_v9, %v283_v5  ;;  %v210_v14 = vrot.slane %v209_v10, 4  ;;  %v264_v24 = vmul.f32 0.00390625, %v263_v16 }
 0x171   :  { %v187_v15 = vadd.f32 %v186_v12, %v185_v8  ;;  %v286_v17 = vrot.slane %v285_v13, 2  ;;  %v211_v18 = vadd.f32 %v210_v14, %v209_v10  ;;  %v291_v33 = vmul.f32 %v264_v24, %v264_v24 }
 0x172   :  { %v303_v42 = vsub.f32 %v476_v27, %v264_v24  ;;  %v304_v43 = vsub.f32 %v472_v25, %v264_v24 }
 0x173   :  { %v188_v19 = vrot.slane %v187_v15, 1  ;;  %v287_v20 = vadd.f32 %v286_v17, %v285_v13  ;;  %v212_v21 = vrot.slane %v211_v18, 2 }
 0x175   :  { %v189_v23 = vadd.f32 %v188_v19, %v187_v15  ;;  %v288_v28 = vrot.slane %v287_v20, 1  ;;  %v213_v29 = vadd.f32 %v212_v21, %v211_v18 }
 0x177   :  { %v190_v30 = vmul.f32 0.00390625, %v189_v23  ;;  %v289_v31 = vadd.f32 %v288_v28, %v287_v20  ;;  %v214_v32 = vrot.slane %v213_v29, 1 }
 0x179   :  { %v290_v34 = vmul.f32 0.00390625, %v289_v31  ;;  %v215_v35 = vadd.f32 %v214_v32, %v213_v29  ;;  %v217_v37 = vmul.f32 %v190_v30, %v190_v30  ;;  %v301_v46 = vsub.f32 %v474_v26, %v190_v30 }
 0x17a   :  { %v302_v47 = vsub.f32 %v470_v22, %v190_v30 }
 0x17b   :  { %v292_v36 = vsub.f32 %v290_v34, %v291_v33  ;;  %v216_v38 = vmul.f32 0.00390625, %v215_v35 }
 0x17d   :  { %v307_v39 = vadd.f32 1e-05, %v292_v36  ;;  %v218_v40 = vsub.f32 %v216_v38, %v217_v37 }
 0x17f   :  { %395 = vrsqrt.f32 %v307_v39  ;;  %v305_v41 = vadd.f32 1e-05, %v218_v40 }
 0x181   :  { %397 = vrsqrt.f32 %v305_v41 }
 0x18c   :  { %v396_v44 = vpop.eup %395 }
 0x18d   :  { %v315_v48 = vmul.f32 %v396_v44, %v303_v42  ;;  %v316_v49 = vmul.f32 %v396_v44, %v304_v43 }
 0x18e   :  { %v398_v50 = vpop.eup %397 }
 0x18f   :  { %v326_v52 = vmul.f32 %v352_v45, %v315_v48  ;;  %v327_v27 = vmul.f32 %v352_v45, %v316_v49  ;;  %v313_v53 = vmul.f32 %v398_v50, %v301_v46  ;;  %v314_v25 = vmul.f32 %v398_v50, %v302_v47 }
 0x191   :  { %v337_v54 = vadd.f32 %v353_v51, %v326_v52  ;;  %v338_v55 = vadd.f32 %v353_v51, %v327_v27  ;;  %v324_v56 = vmul.f32 %v352_v45, %v313_v53  ;;  %v325_v57 = vmul.f32 %v352_v45, %v314_v25 }
 0x193   :  { %341 = vst.msk [vmem:[%s530_s5 + $0x10] sm:$0xff] %vm168_vm5, %v337_v54  ;;  %342 = vst.msk [vmem:[%s530_s5 + $0x18] sm:$0xff] %vm168_vm5, %v338_v55  ;;  %v335_v22 = vadd.f32 %v353_v51, %v324_v56  ;;  %v336_v26 = vadd.f32 %v353_v51, %v325_v57 }
 0x195   :  { %339 = vst.msk [vmem:[%s530_s5] sm:$0xff] %vm168_vm5, %v335_v22  ;;  %340 = vst.msk [vmem:[%s530_s5 + $0x8] sm:$0xff] %vm168_vm5, %v336_v26 }

// kernel: model_forward.19
= control target key start
LH: loop header
LB: loop body
LE: loop exit
PB: predicated region body
PF: predicated region fallthrough
CT: control target
= control target key end

     0   :  { %vm45_vm0 = vcmask 130048   ;;  %vm151_vm1 = vcmask 64512   ;;  %vm294_vm6 = vcmask 261120   ;;  %v292_v60 = vlaneseq  ;;  %s700_s1 = inlined_call_operand.vmem [shape: f32[16,8], index: 1, kind: input, shape index: {}]   ;;  %s701_s0 = inlined_call_operand.vmem [shape: f32[32,16], index: 0, kind: input, shape index: {}]   ;;  %s702_s3 = inlined_call_operand.vmem [shape: f32[32,8], index: 3, kind: input, shape index: {}]   ;;  %s703_s2 = inlined_call_operand.vmem [shape: f32[1,8], index: 2, kind: input, shape index: {}]   ;;  %s704_s4 = inlined_call_operand.vmem [shape: f32[1,32], index: 4, kind: input, shape index: {}]   ;;  %s705_s5 = inlined_call_operand.vmem [shape: f32[32,8], index: 5, kind: output, shape index: {}]  }
   0x1   :  { %v37_v0 = vld [vmem:[%s700_s1 + $0x8] sm:$0xff]  ;;  %v36_v1 = vld [vmem:[%s700_s1] sm:$0xff]  ;;  %v22_v5 = vld [vmem:[%s701_s0 + $0x10] sm:$0xff] }
   0x2   :  { %v20_v2 = vld [vmem:[%s701_s0] sm:$0xff]  ;;  %536 = vmatprep.subr.mxu0 %v37_v0  ;;  %v21_v4 = vld [vmem:[%s701_s0 + $0x8] sm:$0xff]  ;;  %v23_v6 = vld [vmem:[%s701_s0 + $0x18] sm:$0xff]  ;;  %vm26_vm4 = vcmp.ge.f32.partialorder %v22_v5, 0.0  ;;  %v30_v8 = vmul.f32 0.2, %v22_v5 }
   0x3   :  { %vm24_vm2 = vcmp.ge.f32.partialorder %v20_v2, 0.0  ;;  %v28_v3 = vmul.f32 0.2, %v20_v2  ;;  %537 = vmatpush3.msra.mxu0 %v37_v0  ;;  %vm25_vm3 = vcmp.ge.f32.partialorder %v21_v4, 0.0  ;;  %v29_v7 = vmul.f32 0.2, %v21_v4 }
   0x4   :  { %538 = vmatprep.subr.mxu0 %v36_v1  ;;  %vm27_vm5 = vcmp.ge.f32.partialorder %v23_v6, 0.0  ;;  %v31_v10 = vmul.f32 0.2, %v23_v6  ;;  %v146_v11 = vld [vmem:[%s702_s3 + $0x18] sm:$0xff]  ;;  %v34_v13 = vsel %vm26_vm4, %v22_v5, %v30_v8  ;;  %v145_v14 = vld [vmem:[%s702_s3 + $0x10] sm:$0xff]  ;;  %v144_v16 = vld [vmem:[%s702_s3 + $0x8] sm:$0xff] }
   0x5   :  { %v32_v9 = vsel %vm24_vm2, %v20_v2, %v28_v3  ;;  %539 = vmatpush3.msra.mxu0 %v36_v1  ;;  %v33_v12 = vsel %vm25_vm3, %v21_v4, %v29_v7  ;;  %546 = vmatprep.subr.msk.mxu1 %vm151_vm1, %v146_v11  ;;  %v143_v17 = vld [vmem:[%s702_s3] sm:$0xff]  ;;  %v666_v61 = vand.u32 127, %v292_v60 }
   0x6   :  { %540 = vmatprep.mubr.msk.f32.mxu0 %vm45_vm0, %v32_v9  ;;  %v35_v15 = vsel %vm27_vm5, %v23_v6, %v31_v10  ;;  %547 = vmatpush3.xpose.msk.msra.mxu1 %vm151_vm1, %v146_v11  ;;  %v492_v19 = vld [vmem:[%s703_s2] ss:$0 sm:$0xff] }
   0x7   :  { %541 = vmatmul.mubr.msk.f32.vlgmr.msra.gmra.mxu0 %vm45_vm0, %v33_v12  ;;  %548 = vmatprep.subr.msk.mxu1 %vm151_vm1, %v145_v14  ;;  %v505_v41 = vld [vmem:[%s704_s4] ss:$0 sm:$0xff] }
   0x8   :  { %543 = vmatprep.mubr.msk.f32.mxu0 %vm45_vm0, %v34_v13  ;;  %560 = vmatprep.subr.mxu0 %v146_v11 }
   0x9   :  { %561 = vmatpush3.msra.mxu0 %v146_v11 }
   0xa   :  { %562 = vmatprep.subr.mxu0 %v145_v14  ;;  %549 = vmatpush3.xpose.msk.msra.mxu1 %vm151_vm1, %v145_v14 }
   0xb   :  { %544 = vmatmul.mubr.msk.f32.gmra.mxu0 %vm45_vm0, %v35_v15  ;;  %550 = vmatprep.subr.msk.mxu1 %vm151_vm1, %v144_v16 }
   0xc   :  { %563 = vmatpush3.msra.mxu0 %v145_v14 }
   0xd   :  { %564 = vmatprep.subr.mxu0 %v144_v16 }
   0xe   :  { %565 = vmatpush3.msra.mxu0 %v144_v16  ;;  %551 = vmatpush3.xpose.msk.msra.mxu1 %vm151_vm1, %v144_v16 }
   0xf   :  { %552 = vmatprep.subr.msk.mxu1 %vm151_vm1, %v143_v17  ;;  %566 = vmatprep.subr.mxu0 %v143_v17 }
  0x10   :  { %567 = vmatpush3.msra.mxu0 %v143_v17 }
  0x12   :  { %553 = vmatpush3.xpose.msk.msra.mxu1 %vm151_vm1, %v143_v17 }
  0xc7   :  { %v542_v18 = vpop.f32.mrf.mxu0 }
  0xc8   :  { %v130_v21 = vadd.f32 %v542_v18, %v492_v19 }
  0xc9   :  { %v124_v20 = vpop.f32.mrf.mxu0 }
  0xca   :  { %v125_v22 = vadd.f32 %v492_v19, %v124_v20  ;;  %v148_v29 = vmul.f32 %v130_v21, %v130_v21 }
  0xcb   :  { %v545_v23 = vpop.f32.mrf.mxu0 }
  0xcc   :  { %554 = vmatprep.mubr.msk.f32.mxu1 %vm151_vm1, %v125_v22  ;;  %v147_v24 = vmul.f32 %v125_v22, %v125_v22  ;;  %v140_v26 = vadd.f32 %v545_v23, %v492_v19  ;;  %v155_v32 = vsel %vm151_vm1, %v148_v29, 0.0 }
  0xcd   :  { %v134_v25 = vpop.f32.mrf.mxu0  ;;  %555 = vmatmul.mubr.msk.f32.vlgmr.msra.gmra.mxu1 %vm151_vm1, %v130_v21 }
  0xce   :  { %v135_v27 = vadd.f32 %v492_v19, %v134_v25  ;;  %v152_v28 = vsel %vm151_vm1, %v147_v24, 0.0  ;;  %v150_v33 = vmul.f32 %v140_v26, %v140_v26 }
  0xcf   :  { %153 = vadd.xlane.f32.xlu0 %v152_v28 }
  0xd0   :  { %557 = vmatprep.mubr.msk.f32.mxu1 %vm151_vm1, %v135_v27  ;;  %v149_v30 = vmul.f32 %v135_v27, %v135_v27  ;;  %v161_v34 = vsel %vm151_vm1, %v150_v33, 0.0 }
  0xd1   :  { %558 = vmatmul.mubr.msk.f32.gmra.mxu1 %vm151_vm1, %v140_v26 }
  0xd2   :  { %v158_v31 = vsel %vm151_vm1, %v149_v30, 0.0 }
  0xd3   :  { %159 = vadd.xlane.f32.xlu1 %v158_v31  ;;  %156 = vadd.xlane.f32.xlu0 %v155_v32 }
  0xd7   :  { %162 = vadd.xlane.f32.xlu1 %v161_v34 }
 0x158   :  { %v154_v35 = vpop.xlane.xlu0 %153 }
 0x15c   :  { %v160_v36 = vpop.xlane.xlu1 %159  ;;  %v157_v39 = vpop.xlane.xlu0 %156 }
 0x160   :  { %v163_v48 = vpop.xlane.xlu1 %162 }
 0x18d   :  { %v556_v37 = vpop.f32.mrf.mxu1 }
 0x18e   :  { %v274_v38 = vmul.f32 2.0, %v556_v37 }
 0x18f   :  { %v254_v40 = vpop.f32.mrf.mxu1 }
 0x190   :  { %v278_v42 = vsub.f32 %v157_v39, %v274_v38  ;;  %v273_v43 = vmul.f32 2.0, %v254_v40 }
 0x191   :  { %v559_v44 = vpop.f32.mrf.mxu1 }
 0x192   :  { %v277_v45 = vsub.f32 %v154_v35, %v273_v43  ;;  %v276_v46 = vmul.f32 2.0, %v559_v44  ;;  %v289_v47 = vadd.f32 %v505_v41, %v278_v42 }
 0x193   :  { %v264_v49 = vpop.f32.mrf.mxu1 }
 0x194   :  { %v280_v50 = vsub.f32 %v163_v48, %v276_v46  ;;  %v275_v51 = vmul.f32 2.0, %v264_v49  ;;  %v298_v52 = vsel %vm294_vm6, %v289_v47, inf  ;;  %v288_v53 = vadd.f32 %v505_v41, %v277_v45 }
 0x195   :  { %299 = vmin.xlane.f32.xlu1 %v298_v52 }
 0x196   :  { %v279_v54 = vsub.f32 %v160_v36, %v275_v51  ;;  %v295_v55 = vsel %vm294_vm6, %v288_v53, inf  ;;  %v291_v56 = vadd.f32 %v505_v41, %v280_v50 }
 0x197   :  { %296 = vmin.xlane.f32.xlu0 %v295_v55 }
 0x198   :  { %v304_v57 = vsel %vm294_vm6, %v291_v56, inf  ;;  %v290_v58 = vadd.f32 %v505_v41, %v279_v54 }
 0x199   :  { %305 = vmin.xlane.f32.xlu1 %v304_v57 }
 0x19a   :  { %v301_v59 = vsel %vm294_vm6, %v290_v58, inf }
 0x19b   :  { %302 = vmin.xlane.f32.xlu0 %v301_v59 }
 0x21e   :  { %v300_v62 = vpop.xlane.xlu1 %299 }
 0x21f   :  { %vm308_vm7 = vcmp.le.f32.partialorder %v289_v47, %v300_v62 }
 0x220   :  { %v312_v63 = vsel %vm308_vm7, %v666_v61, 32  ;;  %v297_v0 = vpop.xlane.xlu0 %296 }
 0x221   :  { %v330_v1 = vsel %vm294_vm6, %v312_v63, 2147483647  ;;  %vm307_vm8 = vcmp.le.f32.partialorder %v288_v53, %v297_v0  ;;  %v575_v53 = vmov 0.0  }
 0x222   :  { %v311_v2 = vsel %vm307_vm8, %v666_v61, 32  ;;  %v306_v3 = vpop.xlane.xlu1 %305  ;;  %v332_v4 = vshra.s32 %v330_v1, 16  ;;  %v331_v18 = vand.u32 65535, %v330_v1 }
 0x223   :  { %v315_v5 = vsel %vm294_vm6, %v311_v2, 2147483647  ;;  %vm310_vm9 = vcmp.le.f32.partialorder %v291_v56, %v306_v3 }
 0x224   :  { %v314_v6 = vsel %vm310_vm9, %v666_v61, 32  ;;  %v303_v7 = vpop.xlane.xlu0 %302  ;;  %v334_v8 = vcvt.s32.f32 %v332_v4  ;;  %v317_v9 = vshra.s32 %v315_v5, 16  ;;  %v316_v19 = vand.u32 65535, %v315_v5 }
 0x225   :  { %v360_v10 = vsel %vm294_vm6, %v314_v6, 2147483647  ;;  %vm309_vm10 = vcmp.le.f32.partialorder %v290_v58, %v303_v7  ;;  %v333_v21 = vcvt.s32.f32 %v331_v18 }
 0x226   :  { %v313_v11 = vsel %vm309_vm10, %v666_v61, 32  ;;  %335 = vmin.xlane.f32.xlu1 %v334_v8  ;;  %v319_v12 = vcvt.s32.f32 %v317_v9  ;;  %v362_v13 = vshra.s32 %v360_v10, 16  ;;  %v361_v22 = vand.u32 65535, %v360_v10 }
 0x227   :  { %v345_v14 = vsel %vm294_vm6, %v313_v11, 2147483647  ;;  %v318_v25 = vcvt.s32.f32 %v316_v19 }
 0x228   :  { %320 = vmin.xlane.f32.xlu0 %v319_v12  ;;  %v364_v15 = vcvt.s32.f32 %v362_v13  ;;  %v347_v16 = vshra.s32 %v345_v14, 16  ;;  %v346_v26 = vand.u32 65535, %v345_v14  ;;  %v363_v29 = vcvt.s32.f32 %v361_v22 }
 0x22a   :  { %365 = vmin.xlane.f32.xlu1 %v364_v15  ;;  %v349_v17 = vcvt.s32.f32 %v347_v16  ;;  %v348_v32 = vcvt.s32.f32 %v346_v26 }
 0x22c   :  { %350 = vmin.xlane.f32.xlu0 %v349_v17 }
 0x2af   :  { %v336_v20 = vpop.xlane.xlu1 %335 }
 0x2b0   :  { %vm337_vm11 = vcmp.eq.f32.partialorder %v334_v8, %v336_v20  ;;  %v342_v34 = vcvt.f32.s32 %v336_v20 }
 0x2b1   :  { %v321_v23 = vpop.xlane.xlu0 %320  ;;  %v338_v24 = vsel %vm337_vm11, %v333_v21, inf }
 0x2b2   :  { %339 = vmin.xlane.f32.xlu1 %v338_v24  ;;  %vm322_vm12 = vcmp.eq.f32.partialorder %v319_v12, %v321_v23  ;;  %v327_v35 = vcvt.f32.s32 %v321_v23  ;;  %v343_v37 = vshll.u32 %v342_v34, 16 }
 0x2b3   :  { %v366_v27 = vpop.xlane.xlu1 %365  ;;  %v323_v28 = vsel %vm322_vm12, %v318_v25, inf }
 0x2b4   :  { %324 = vmin.xlane.f32.xlu0 %v323_v28  ;;  %vm367_vm13 = vcmp.eq.f32.partialorder %v364_v15, %v366_v27  ;;  %v372_v38 = vcvt.f32.s32 %v366_v27  ;;  %v328_v41 = vshll.u32 %v327_v35, 16 }
 0x2b5   :  { %v351_v30 = vpop.xlane.xlu0 %350  ;;  %v368_v31 = vsel %vm367_vm13, %v363_v29, inf }
 0x2b6   :  { %369 = vmin.xlane.f32.xlu1 %v368_v31  ;;  %vm352_vm14 = vcmp.eq.f32.partialorder %v349_v17, %v351_v30  ;;  %v357_v42 = vcvt.f32.s32 %v351_v30  ;;  %v373_v46 = vshll.u32 %v372_v38, 16 }
 0x2b7   :  { %v353_v33 = vsel %vm352_vm14, %v348_v32, inf }
 0x2b8   :  { %354 = vmin.xlane.f32.xlu0 %v353_v33  ;;  %v358_v50 = vshll.u32 %v357_v42, 16 }
 0x33b   :  { %v340_v36 = vpop.xlane.xlu1 %339 }
 0x33c   :  { %v341_v39 = vcvt.f32.s32 %v340_v36 }
 0x33d   :  { %v325_v40 = vpop.xlane.xlu0 %324 }
 0x33e   :  { %v344_v43 = vadd.s32 %v343_v37, %v341_v39  ;;  %v326_v44 = vcvt.f32.s32 %v325_v40 }
 0x33f   :  { %v370_v45 = vpop.xlane.xlu1 %369 }
 0x340   :  { %v329_v47 = vadd.s32 %v328_v41, %v326_v44  ;;  %v371_v48 = vcvt.f32.s32 %v370_v45  ;;  %vm376_vm15 = vcmp.eq.s32.totalorder %v666_v61, %v344_v43 }
 0x341   :  { %v355_v49 = vpop.xlane.xlu0 %354  ;;  %v507_v55 = vsel %vm376_vm15, 1.0, %v575_v53 }
 0x342   :  { %v374_v51 = vadd.s32 %v373_v46, %v371_v48  ;;  %v356_v52 = vcvt.f32.s32 %v355_v49  ;;  %vm375_vm0 = vcmp.eq.s32.totalorder %v666_v61, %v329_v47 }
 0x343   :  { %v506_v54 = vsel %vm375_vm0, 1.0, %v575_v53 }
 0x344   :  { %v359_v56 = vadd.s32 %v358_v50, %v356_v52  ;;  %568 = vmatprep.mubr.msk.f32.mxu0 %vm294_vm6, %v506_v54  ;;  %vm378_vm2 = vcmp.eq.s32.totalorder %v666_v61, %v374_v51 }
 0x345   :  { %569 = vmatmul.mubr.msk.f32.vlgmr.msra.gmra.mxu0 %vm294_vm6, %v507_v55  ;;  %v509_v58 = vsel %vm378_vm2, 1.0, %v575_v53 }
 0x346   :  { %vm377_vm3 = vcmp.eq.s32.totalorder %v666_v61, %v359_v56 }
 0x347   :  { %v508_v57 = vsel %vm377_vm3, 1.0, %v575_v53 }
 0x348   :  { %571 = vmatprep.mubr.msk.f32.mxu0 %vm294_vm6, %v508_v57 }
 0x349   :  { %572 = vmatmul.mubr.msk.f32.gmra.mxu0 %vm294_vm6, %v509_v58 }
 0x405   :  { %v570_v59 = vpop.f32.mrf.mxu0 }
 0x406   :  { %485 = vst.msk [vmem:[%s705_s5 + $0x8] sm:$0xff] %vm151_vm1, %v570_v59 }
 0x407   :  { %v465_v60 = vpop.f32.mrf.mxu0 }
 0x408   :  { %484 = vst.msk [vmem:[%s705_s5] sm:$0xff] %vm151_vm1, %v465_v60 }
 0x409   :  { %v573_v62 = vpop.f32.mrf.mxu0 }
 0x40a   :  { %487 = vst.msk [vmem:[%s705_s5 + $0x18] sm:$0xff] %vm151_vm1, %v573_v62 }
 0x40b   :  { %v475_v61 = vpop.f32.mrf.mxu0 }
 0x40c   :  { %486 = vst.msk [vmem:[%s705_s5 + $0x10] sm:$0xff] %vm151_vm1, %v475_v61 }

// kernel: model_forward.21
= control target key start
LH: loop header
LB: loop body
LE: loop exit
PB: predicated region body
PF: predicated region fallthrough
CT: control target
= control target key end

     0   :  { %vm30_vm0 = vcmask 326656   ;;  %vm128_vm1 = vcmask 195584   ;;  %s239_s1 = inlined_call_operand.vmem [shape: f32[40,24], index: 1, kind: input, shape index: {}]   ;;  %s240_s0 = inlined_call_operand.vmem [shape: f32[32,40], index: 0, kind: input, shape index: {}]   ;;  %s241_s2 = inlined_call_operand.vmem [shape: f32[1,24], index: 2, kind: input, shape index: {}]   ;;  %s242_s3 = inlined_call_operand.vmem [shape: f32[32,24], index: 3, kind: output, shape index: {}]  }
   0x1   :  { %v22_v0 = vld [vmem:[%s239_s1 + $0x20] sm:$0xff]  ;;  %v21_v1 = vld [vmem:[%s239_s1 + $0x18] sm:$0xff]  ;;  %v20_v2 = vld [vmem:[%s239_s1 + $0x10] sm:$0xff] }
   0x2   :  { %151 = vmatprep.subr.mxu0 %v22_v0  ;;  %167 = vmatprep.subr.mxu1 %v22_v0  ;;  %v19_v3 = vld [vmem:[%s239_s1 + $0x8] sm:$0xff]  ;;  %v18_v4 = vld [vmem:[%s239_s1] sm:$0xff]  ;;  %v16_v6 = vld [vmem:[%s240_s0 + $0x10] sm:$0xff] }
   0x3   :  { %152 = vmatpush3.msra.mxu0 %v22_v0  ;;  %172 = vmatpush3.msra.mxu1 %v22_v0  ;;  %v14_v5 = vld [vmem:[%s240_s0] sm:$0xff]  ;;  %v15_v7 = vld [vmem:[%s240_s0 + $0x8] sm:$0xff]  ;;  %v17_v8 = vld [vmem:[%s240_s0 + $0x18] sm:$0xff] }
   0x4   :  { %153 = vmatprep.subr.mxu0 %v21_v1  ;;  %168 = vmatprep.subr.mxu1 %v21_v1  ;;  %v137_v9 = vld [vmem:[%s241_s2] ss:$0 sm:$0xff] }
   0x5   :  { %154 = vmatpush3.msra.mxu0 %v21_v1  ;;  %173 = vmatpush3.msra.mxu1 %v21_v1 }
   0x6   :  { %155 = vmatprep.subr.mxu0 %v20_v2  ;;  %169 = vmatprep.subr.mxu1 %v20_v2 }
   0x7   :  { %156 = vmatpush3.msra.mxu0 %v20_v2  ;;  %174 = vmatpush3.msra.mxu1 %v20_v2 }
   0x8   :  { %157 = vmatprep.subr.mxu0 %v19_v3  ;;  %170 = vmatprep.subr.mxu1 %v19_v3 }
   0x9   :  { %158 = vmatpush3.msra.mxu0 %v19_v3  ;;  %175 = vmatpush3.msra.mxu1 %v19_v3 }
   0xa   :  { %159 = vmatprep.subr.mxu0 %v18_v4  ;;  %171 = vmatprep.subr.mxu1 %v18_v4 }
   0xb   :  { %160 = vmatpush3.msra.mxu0 %v18_v4  ;;  %176 = vmatpush3.msra.mxu1 %v18_v4 }
   0xc   :  { %161 = vmatprep.mubr.msk.f32.mxu0 %vm30_vm0, %v14_v5  ;;  %164 = vmatprep.mubr.msk.f32.mxu1 %vm30_vm0, %v16_v6 }
   0xd   :  { %162 = vmatmul.mubr.msk.f32.vlgmr.msra.gmra.mxu0 %vm30_vm0, %v15_v7  ;;  %165 = vmatmul.mubr.msk.f32.vlgmr.msra.gmra.mxu1 %vm30_vm0, %v17_v8 }
  0xcd   :  { %v163_v10 = vpop.f32.mrf.mxu0  ;;  %v166_v11 = vpop.f32.mrf.mxu1 }
  0xce   :  { %v115_v12 = vadd.f32 %v163_v10, %v137_v9  ;;  %v125_v13 = vadd.f32 %v166_v11, %v137_v9 }
  0xcf   :  { %v109_v14 = vpop.f32.mrf.mxu0  ;;  %v119_v15 = vpop.f32.mrf.mxu1 }
  0xd0   :  { %130 = vst.msk [vmem:[%s242_s3 + $0x8] sm:$0xff] %vm128_vm1, %v115_v12  ;;  %132 = vst.msk [vmem:[%s242_s3 + $0x18] sm:$0xff] %vm128_vm1, %v125_v13  ;;  %v110_v16 = vadd.f32 %v137_v9, %v109_v14  ;;  %v120_v17 = vadd.f32 %v137_v9, %v119_v15 }
  0xd2   :  { %129 = vst.msk [vmem:[%s242_s3] sm:$0xff] %vm128_vm1, %v110_v16  ;;  %131 = vst.msk [vmem:[%s242_s3 + $0x10] sm:$0xff] %vm128_vm1, %v120_v17 }

// kernel: model_forward.20
= control target key start
LH: loop header
LB: loop body
LE: loop exit
PB: predicated region body
PF: predicated region fallthrough
CT: control target
= control target key end

     0   :  { %vm23_vm0 = vcmask 64512   ;;  %v114_v0 = vmov 0.0   ;;  %vm115_vm1 = vmmov 0   ;;  %vm97_vm2 = vcmask 648192   ;;  %s148_s1 = inlined_call_operand.vmem [shape: f32[8,80], index: 1, kind: input, shape index: {}]   ;;  %s149_s0 = inlined_call_operand.vmem [shape: f32[2,8], index: 0, kind: input, shape index: {}]   ;;  %s150_s2 = inlined_call_operand.vmem [shape: f32[1,80], index: 2, kind: input, shape index: {}]   ;;  %s151_s3 = inlined_call_operand.vmem [shape: f32[2,80], index: 3, kind: output, shape index: {}]  }
   0x1   :  { %107 = vmatprep.subr.mxu0 %v114_v0  ;;  %v15_v1 = vld [vmem:[%s148_s1] sm:$0xff]  ;;  %109 = vmatprep.mubr.msk.f32.mxu0 %vm115_vm1, %v114_v0 }
   0x2   :  { %v14_v2 = vld [vmem:[%s149_s0] sm:$0x3]  ;;  %108 = vmatpush3.msra.mxu0 %v15_v1 }
   0x3   :  { %110 = vmatmul.mubr.msk.f32.vlgmr.msra.gmra.mxu0 %vm23_vm0, %v14_v2  ;;  %v103_v3 = vld [vmem:[%s150_s2] ss:$0 sm:$0xff] }
  0xc3   :  { %v93_v4 = vpop.f32.mrf.mxu0 }
  0xc4   :  { %v94_v5 = vadd.f32 %v103_v3, %v93_v4 }
  0xc5   :  { %v111_v6 = vpop.f32.mrf.mxu0 }
  0xc6   :  { %98 = vst.msk [vmem:[%s151_s3] sm:$0x3] %vm97_vm2, %v94_v5 }

// kernel: model_forward.23
= control target key start
LH: loop header
LB: loop body
LE: loop exit
PB: predicated region body
PF: predicated region fallthrough
CT: control target
= control target key end

     0   :  { %vm40_vm0 = vcmask 982016   ;;  %vm138_vm1 = vcmask 130048   ;;  %s329_s1 = inlined_call_operand.vmem [shape: f32[120,16], index: 1, kind: input, shape index: {}]   ;;  %s330_s0 = inlined_call_operand.vmem [shape: f32[32,120], index: 0, kind: input, shape index: {}]   ;;  %s331_s2 = inlined_call_operand.vmem [shape: f32[1,16], index: 2, kind: input, shape index: {}]   ;;  %s332_s3 = inlined_call_operand.vmem [shape: f32[32,16], index: 3, kind: output, shape index: {}]  }
   0x1   :  { %v32_v0 = vld [vmem:[%s329_s1 + $0x70] sm:$0xff]  ;;  %v31_v1 = vld [vmem:[%s329_s1 + $0x68] sm:$0xff]  ;;  %v30_v2 = vld [vmem:[%s329_s1 + $0x60] sm:$0xff] }
   0x2   :  { %171 = vmatprep.subr.mxu0 %v32_v0  ;;  %207 = vmatprep.subr.mxu1 %v32_v0  ;;  %v29_v3 = vld [vmem:[%s329_s1 + $0x58] sm:$0xff]  ;;  %v28_v4 = vld [vmem:[%s329_s1 + $0x50] sm:$0xff]  ;;  %v27_v5 = vld [vmem:[%s329_s1 + $0x48] sm:$0xff] }
   0x3   :  { %172 = vmatpush3.msra.mxu0 %v32_v0  ;;  %222 = vmatpush3.msra.mxu1 %v32_v0  ;;  %v26_v6 = vld [vmem:[%s329_s1 + $0x40] sm:$0xff]  ;;  %v25_v7 = vld [vmem:[%s329_s1 + $0x38] sm:$0xff]  ;;  %v24_v8 = vld [vmem:[%s329_s1 + $0x30] sm:$0xff] }
   0x4   :  { %173 = vmatprep.subr.mxu0 %v31_v1  ;;  %208 = vmatprep.subr.mxu1 %v31_v1  ;;  %v23_v9 = vld [vmem:[%s329_s1 + $0x28] sm:$0xff]  ;;  %v22_v10 = vld [vmem:[%s329_s1 + $0x20] sm:$0xff]  ;;  %v21_v11 = vld [vmem:[%s329_s1 + $0x18] sm:$0xff] }
   0x5   :  { %174 = vmatpush3.msra.mxu0 %v31_v1  ;;  %223 = vmatpush3.msra.mxu1 %v31_v1  ;;  %v20_v12 = vld [vmem:[%s329_s1 + $0x10] sm:$0xff]  ;;  %v19_v13 = vld [vmem:[%s329_s1 + $0x8] sm:$0xff]  ;;  %v18_v14 = vld [vmem:[%s329_s1] sm:$0xff] }
   0x6   :  { %175 = vmatprep.subr.mxu0 %v30_v2  ;;  %209 = vmatprep.subr.mxu1 %v30_v2  ;;  %v14_v15 = vld [vmem:[%s330_s0] sm:$0xff]  ;;  %v16_v16 = vld [vmem:[%s330_s0 + $0x10] sm:$0xff]  ;;  %v15_v17 = vld [vmem:[%s330_s0 + $0x8] sm:$0xff] }
   0x7   :  { %176 = vmatpush3.msra.mxu0 %v30_v2  ;;  %224 = vmatpush3.msra.mxu1 %v30_v2  ;;  %v17_v18 = vld [vmem:[%s330_s0 + $0x18] sm:$0xff]  ;;  %v147_v19 = vld [vmem:[%s331_s2] ss:$0 sm:$0xff] }
   0x8   :  { %177 = vmatprep.subr.mxu0 %v29_v3  ;;  %210 = vmatprep.subr.mxu1 %v29_v3 }
   0x9   :  { %178 = vmatpush3.msra.mxu0 %v29_v3  ;;  %225 = vmatpush3.msra.mxu1 %v29_v3 }
   0xa   :  { %179 = vmatprep.subr.mxu0 %v28_v4  ;;  %211 = vmatprep.subr.mxu1 %v28_v4 }
   0xb   :  { %180 = vmatpush3.msra.mxu0 %v28_v4  ;;  %226 = vmatpush3.msra.mxu1 %v28_v4 }
   0xc   :  { %181 = vmatprep.subr.mxu0 %v27_v5  ;;  %212 = vmatprep.subr.mxu1 %v27_v5 }
   0xd   :  { %182 = vmatpush3.msra.mxu0 %v27_v5  ;;  %227 = vmatpush3.msra.mxu1 %v27_v5 }
   0xe   :  { %183 = vmatprep.subr.mxu0 %v26_v6  ;;  %213 = vmatprep.subr.mxu1 %v26_v6 }
   0xf   :  { %184 = vmatpush3.msra.mxu0 %v26_v6  ;;  %228 = vmatpush3.msra.mxu1 %v26_v6 }
  0x10   :  { %185 = vmatprep.subr.mxu0 %v25_v7  ;;  %214 = vmatprep.subr.mxu1 %v25_v7 }
  0x11   :  { %186 = vmatpush3.msra.mxu0 %v25_v7  ;;  %229 = vmatpush3.msra.mxu1 %v25_v7 }
  0x12   :  { %187 = vmatprep.subr.mxu0 %v24_v8  ;;  %215 = vmatprep.subr.mxu1 %v24_v8 }
  0x13   :  { %188 = vmatpush3.msra.mxu0 %v24_v8  ;;  %230 = vmatpush3.msra.mxu1 %v24_v8 }
  0x14   :  { %189 = vmatprep.subr.mxu0 %v23_v9  ;;  %216 = vmatprep.subr.mxu1 %v23_v9 }
  0x15   :  { %190 = vmatpush3.msra.mxu0 %v23_v9  ;;  %231 = vmatpush3.msra.mxu1 %v23_v9 }
  0x16   :  { %191 = vmatprep.subr.mxu0 %v22_v10  ;;  %217 = vmatprep.subr.mxu1 %v22_v10 }
  0x17   :  { %192 = vmatpush3.msra.mxu0 %v22_v10  ;;  %232 = vmatpush3.msra.mxu1 %v22_v10 }
  0x18   :  { %193 = vmatprep.subr.mxu0 %v21_v11  ;;  %218 = vmatprep.subr.mxu1 %v21_v11 }
  0x19   :  { %194 = vmatpush3.msra.mxu0 %v21_v11  ;;  %233 = vmatpush3.msra.mxu1 %v21_v11 }
  0x1a   :  { %195 = vmatprep.subr.mxu0 %v20_v12  ;;  %219 = vmatprep.subr.mxu1 %v20_v12 }
  0x1b   :  { %196 = vmatpush3.msra.mxu0 %v20_v12  ;;  %234 = vmatpush3.msra.mxu1 %v20_v12 }
  0x1c   :  { %197 = vmatprep.subr.mxu0 %v19_v13  ;;  %220 = vmatprep.subr.mxu1 %v19_v13 }
  0x1d   :  { %198 = vmatpush3.msra.mxu0 %v19_v13  ;;  %235 = vmatpush3.msra.mxu1 %v19_v13 }
  0x1e   :  { %199 = vmatprep.subr.mxu0 %v18_v14  ;;  %221 = vmatprep.subr.mxu1 %v18_v14 }
  0x1f   :  { %200 = vmatpush3.msra.mxu0 %v18_v14  ;;  %236 = vmatpush3.msra.mxu1 %v18_v14 }
  0x20   :  { %201 = vmatprep.mubr.msk.f32.mxu0 %vm40_vm0, %v14_v15  ;;  %204 = vmatprep.mubr.msk.f32.mxu1 %vm40_vm0, %v16_v16 }
  0x21   :  { %202 = vmatmul.mubr.msk.f32.vlgmr.msra.gmra.mxu0 %vm40_vm0, %v15_v17  ;;  %205 = vmatmul.mubr.msk.f32.vlgmr.msra.gmra.mxu1 %vm40_vm0, %v17_v18 }
  0xe1   :  { %v203_v20 = vpop.f32.mrf.mxu0  ;;  %v206_v21 = vpop.f32.mrf.mxu1 }
  0xe2   :  { %v125_v22 = vadd.f32 %v203_v20, %v147_v19  ;;  %v135_v23 = vadd.f32 %v206_v21, %v147_v19 }
  0xe3   :  { %v119_v24 = vpop.f32.mrf.mxu0  ;;  %v129_v25 = vpop.f32.mrf.mxu1 }
  0xe4   :  { %140 = vst.msk [vmem:[%s332_s3 + $0x8] sm:$0xff] %vm138_vm1, %v125_v22  ;;  %142 = vst.msk [vmem:[%s332_s3 + $0x18] sm:$0xff] %vm138_vm1, %v135_v23  ;;  %v120_v26 = vadd.f32 %v147_v19, %v119_v24  ;;  %v130_v27 = vadd.f32 %v147_v19, %v129_v25 }
  0xe6   :  { %139 = vst.msk [vmem:[%s332_s3] sm:$0xff] %vm138_vm1, %v120_v26  ;;  %141 = vst.msk [vmem:[%s332_s3 + $0x10] sm:$0xff] %vm138_vm1, %v130_v27 }

// kernel: model_forward.22
= control target key start
LH: loop header
LB: loop body
LE: loop exit
PB: predicated region body
PF: predicated region fallthrough
CT: control target
= control target key end

     0   :  { %vm57_vm0 = vcmask 588800   ;;  %vm291_vm1 = vcmask 195584   ;;  %vm508_vm2 = vcmask 130048   ;;  %s922_s2 = inlined_call_operand.vmem [shape: f32[72,24], index: 2, kind: input, shape index: {}]   ;;  %s923_s0 = inlined_call_operand.vmem [shape: f32[32,72], index: 0, kind: input, shape index: {}]   ;;  %s924_s1 = inlined_call_operand.vmem [shape: f32[72,24], index: 1, kind: input, shape index: {}]   ;;  %s925_s7 = inlined_call_operand.vmem [shape: f32[24,24], index: 7, kind: input, shape index: {}]   ;;  %s926_s5 = inlined_call_operand.vmem [shape: f32[24,16], index: 5, kind: input, shape index: {}]   ;;  %s927_s4 = inlined_call_operand.vmem [shape: f32[32,24], index: 4, kind: input, shape index: {}]   ;;  %s928_s3 = inlined_call_operand.vmem [shape: f32[32,24], index: 3, kind: input, shape index: {}]   ;;  %s929_s6 = inlined_call_operand.vmem [shape: f32[1,16], index: 6, kind: input, shape index: {}]   ;;  %s930_s8 = inlined_call_operand.vmem [shape: f32[1,24], index: 8, kind: input, shape index: {}]   ;;  %s931_s10 = inlined_call_operand.vmem [shape: f32[32,16], index: 10, kind: input, shape index: {}]   ;;  %s932_s9 = inlined_call_operand.vmem [shape: f32[32,24], index: 9, kind: input, shape index: {}]   ;;  %s933_s12 = inlined_call_operand.vmem [shape: f32[32,16], index: 12, kind: output, shape index: {1}]   ;;  %s934_s11 = inlined_call_operand.vmem [shape: f32[32,24], index: 11, kind: output, shape index: {0}]  }
   0x1   :  { %v163_v0 = vld [vmem:[%s922_s2 + $0x40] sm:$0xff]  ;;  %v162_v1 = vld [vmem:[%s922_s2 + $0x38] sm:$0xff]  ;;  %v161_v2 = vld [vmem:[%s922_s2 + $0x30] sm:$0xff] }
   0x2   :  { %607 = vmatprep.subr.mxu1 %v163_v0  ;;  %v40_v3 = vld [vmem:[%s923_s0] sm:$0xff]  ;;  %v160_v4 = vld [vmem:[%s922_s2 + $0x28] sm:$0xff]  ;;  %v51_v6 = vld [vmem:[%s924_s1 + $0x38] sm:$0xff] }
   0x3   :  { %608 = vmatpush3.msra.mxu1 %v163_v0  ;;  %625 = vmatprep.mubr.msk.f32.mxu1 %vm57_vm0, %v40_v3  ;;  %v52_v5 = vld [vmem:[%s924_s1 + $0x40] sm:$0xff]  ;;  %v50_v8 = vld [vmem:[%s924_s1 + $0x30] sm:$0xff]  ;;  %v158_v9 = vld [vmem:[%s922_s2 + $0x18] sm:$0xff] }
   0x4   :  { %609 = vmatprep.subr.mxu1 %v162_v1  ;;  %583 = vmatprep.subr.mxu0 %v52_v5  ;;  %v159_v7 = vld [vmem:[%s922_s2 + $0x20] sm:$0xff]  ;;  %v49_v10 = vld [vmem:[%s924_s1 + $0x28] sm:$0xff]  ;;  %v157_v11 = vld [vmem:[%s922_s2 + $0x10] sm:$0xff] }
   0x5   :  { %610 = vmatpush3.msra.mxu1 %v162_v1  ;;  %584 = vmatpush3.msra.mxu0 %v52_v5  ;;  %v48_v12 = vld [vmem:[%s924_s1 + $0x20] sm:$0xff]  ;;  %v156_v13 = vld [vmem:[%s922_s2 + $0x8] sm:$0xff]  ;;  %v47_v14 = vld [vmem:[%s924_s1 + $0x18] sm:$0xff] }
   0x6   :  { %611 = vmatprep.subr.mxu1 %v161_v2  ;;  %585 = vmatprep.subr.mxu0 %v51_v6  ;;  %v155_v15 = vld [vmem:[%s922_s2] sm:$0xff]  ;;  %v46_v16 = vld [vmem:[%s924_s1 + $0x10] sm:$0xff]  ;;  %v41_v17 = vld [vmem:[%s923_s0 + $0x8] sm:$0xff] }
   0x7   :  { %612 = vmatpush3.msra.mxu1 %v161_v2  ;;  %586 = vmatpush3.msra.mxu0 %v51_v6  ;;  %v45_v18 = vld [vmem:[%s924_s1 + $0x8] sm:$0xff]  ;;  %v42_v19 = vld [vmem:[%s923_s0 + $0x10] sm:$0xff]  ;;  %v44_v20 = vld [vmem:[%s924_s1] sm:$0xff] }
   0x8   :  { %613 = vmatprep.subr.mxu1 %v160_v4  ;;  %587 = vmatprep.subr.mxu0 %v50_v8  ;;  %v43_v21 = vld [vmem:[%s923_s0 + $0x18] sm:$0xff]  ;;  %v391_v22 = vld [vmem:[%s925_s7 + $0x10] sm:$0xff]  ;;  %v390_v24 = vld [vmem:[%s925_s7 + $0x8] sm:$0xff] }
   0x9   :  { %614 = vmatpush3.msra.mxu1 %v160_v4  ;;  %588 = vmatpush3.msra.mxu0 %v50_v8  ;;  %v283_v23 = vld [vmem:[%s926_s5 + $0x10] sm:$0xff]  ;;  %v282_v25 = vld [vmem:[%s926_s5 + $0x8] sm:$0xff]  ;;  %v389_v26 = vld [vmem:[%s925_s7] sm:$0xff] }
   0xa   :  { %615 = vmatprep.subr.mxu1 %v159_v7  ;;  %589 = vmatprep.subr.mxu0 %v49_v10  ;;  %v281_v27 = vld [vmem:[%s926_s5] sm:$0xff]  ;;  %v165_v28 = vld [vmem:[%s927_s4 + $0x8] sm:$0xff]  ;;  %v167_v33 = vld [vmem:[%s927_s4 + $0x18] sm:$0xff] }
   0xb   :  { %616 = vmatpush3.msra.mxu1 %v159_v7  ;;  %590 = vmatpush3.msra.mxu0 %v49_v10  ;;  %v164_v30 = vld [vmem:[%s927_s4] sm:$0xff]  ;;  %v166_v37 = vld [vmem:[%s927_s4 + $0x10] sm:$0xff]  ;;  %v54_v54 = vld [vmem:[%s928_s3 + $0x8] sm:$0xff] }
   0xc   :  { %617 = vmatprep.subr.mxu1 %v158_v9  ;;  %591 = vmatprep.subr.mxu0 %v48_v12  ;;  %v53_v55 = vld [vmem:[%s928_s3] sm:$0xff]  ;;  %v56_v60 = vld [vmem:[%s928_s3 + $0x18] sm:$0xff]  ;;  %v55_v63 = vld [vmem:[%s928_s3 + $0x10] sm:$0xff] }
   0xd   :  { %618 = vmatpush3.msra.mxu1 %v158_v9  ;;  %592 = vmatpush3.msra.mxu0 %v48_v12  ;;  %v533_v8 = vld [vmem:[%s929_s6] ss:$0 sm:$0xff] }
   0xe   :  { %619 = vmatprep.subr.mxu1 %v157_v11  ;;  %593 = vmatprep.subr.mxu0 %v47_v14  ;;  %v538_v9 = vld [vmem:[%s930_s8] ss:$0 sm:$0xff] }
   0xf   :  { %620 = vmatpush3.msra.mxu1 %v157_v11  ;;  %594 = vmatpush3.msra.mxu0 %v47_v14  ;;  %v501_v11 = vld [vmem:[%s931_s10 + $0x8] sm:$0xff] }
  0x10   :  { %621 = vmatprep.subr.mxu1 %v156_v13  ;;  %595 = vmatprep.subr.mxu0 %v46_v16 }
  0x11   :  { %622 = vmatpush3.msra.mxu1 %v156_v13  ;;  %596 = vmatpush3.msra.mxu0 %v46_v16  ;;  %v485_v13 = vld [vmem:[%s932_s9 + $0x8] sm:$0xff] }
  0x12   :  { %623 = vmatprep.subr.mxu1 %v155_v15  ;;  %597 = vmatprep.subr.mxu0 %v45_v18 }
  0x13   :  { %624 = vmatpush3.msra.mxu1 %v155_v15  ;;  %598 = vmatpush3.msra.mxu0 %v45_v18 }
  0x14   :  { %626 = vmatmul.mubr.msk.f32.vlgmr.msra.gmra.mxu1 %vm57_vm0, %v41_v17  ;;  %599 = vmatprep.subr.mxu0 %v44_v20 }
  0x15   :  { %628 = vmatprep.mubr.msk.f32.mxu1 %vm57_vm0, %v42_v19  ;;  %601 = vmatprep.mubr.msk.f32.mxu0 %vm57_vm0, %v40_v3 }
  0x16   :  { %600 = vmatpush3.msra.mxu0 %v44_v20  ;;  %643 = vmatprep.subr.mxu1 %v391_v22 }
  0x17   :  { %602 = vmatmul.mubr.msk.f32.vlgmr.msra.gmra.mxu0 %vm57_vm0, %v41_v17  ;;  %631 = vmatprep.subr.mxu0 %v283_v23  ;;  %v500_v17 = vld [vmem:[%s931_s10] sm:$0xff] }
  0x18   :  { %629 = vmatmul.mubr.msk.f32.gmra.mxu1 %vm57_vm0, %v43_v21  ;;  %604 = vmatprep.mubr.msk.f32.mxu0 %vm57_vm0, %v42_v19  ;;  %v484_v19 = vld [vmem:[%s932_s9] sm:$0xff] }
  0x19   :  { %644 = vmatpush3.msra.mxu1 %v391_v22  ;;  %632 = vmatpush3.msra.mxu0 %v283_v23 }
  0x1a   :  { %645 = vmatprep.subr.mxu1 %v390_v24  ;;  %633 = vmatprep.subr.mxu0 %v282_v25 }
  0x1b   :  { %605 = vmatmul.mubr.msk.f32.gmra.mxu0 %vm57_vm0, %v43_v21  ;;  %646 = vmatpush3.msra.mxu1 %v390_v24 }
  0x1c   :  { %634 = vmatpush3.msra.mxu0 %v282_v25  ;;  %647 = vmatprep.subr.mxu1 %v389_v26  ;;  %v503_v25 = vld [vmem:[%s931_s10 + $0x18] sm:$0xff] }
  0x1d   :  { %635 = vmatprep.subr.mxu0 %v281_v27  ;;  %648 = vmatpush3.msra.mxu1 %v389_v26 }
  0x1e   :  { %636 = vmatpush3.msra.mxu0 %v281_v27 }
  0xd4   :  { %v627_v29 = vpop.f32.mrf.mxu1 }
  0xd5   :  { %v240_v31 = vadd.f32 %v627_v29, %v165_v28 }
  0xd6   :  { %v234_v32 = vpop.f32.mrf.mxu1 }
  0xd7   :  { %v530_v34 = vmul.f32 -1.442695, %v240_v31  ;;  %v235_v35 = vadd.f32 %v234_v32, %v164_v30  ;;  %v603_v51 = vpop.f32.mrf.mxu0  ;;  %v487_v31 = vld [vmem:[%s932_s9 + $0x18] sm:$0xff] }
  0xd8   :  { %v630_v36 = vpop.f32.mrf.mxu1  ;;  %v142_v57 = vadd.f32 %v603_v51, %v54_v54 }
  0xd9   :  { %655 = vpow2.f32 %v530_v34  ;;  %v529_v38 = vmul.f32 -1.442695, %v235_v35  ;;  %v250_v39 = vadd.f32 %v630_v36, %v167_v33  ;;  %v136_v53 = vpop.f32.mrf.mxu0  ;;  %v502_v34 = vld [vmem:[%s931_s10 + $0x10] sm:$0xff] }
  0xda   :  { %v244_v40 = vpop.f32.mrf.mxu1  ;;  %v137_v59 = vadd.f32 %v136_v53, %v53_v55  ;;  %v486_v36 = vld [vmem:[%s932_s9 + $0x10] sm:$0xff] }
  0xdb   :  { %657 = vpow2.f32 %v529_v38  ;;  %v532_v41 = vmul.f32 -1.442695, %v250_v39  ;;  %v245_v42 = vadd.f32 %v244_v40, %v166_v37  ;;  %v606_v56 = vpop.f32.mrf.mxu0 }
  0xdc   :  { %v152_v2 = vadd.f32 %v606_v56, %v56_v60 }
  0xdd   :  { %659 = vpow2.f32 %v532_v41  ;;  %v531_v43 = vmul.f32 -1.442695, %v245_v42  ;;  %v146_v62 = vpop.f32.mrf.mxu0 }
  0xde   :  { %v147_v4 = vadd.f32 %v146_v62, %v55_v63 }
  0xdf   :  { %661 = vpow2.f32 %v531_v43 }
  0xe6   :  { %v656_v44 = vpop.eup %655 }
  0xe7   :  { %v266_v45 = vadd.f32 1.0, %v656_v44 }
  0xe8   :  { %v658_v46 = vpop.eup %657 }
  0xe9   :  { %v265_v47 = vadd.f32 1.0, %v658_v46  ;;  %663 = vrcp.f32 %v266_v45 }
  0xea   :  { %v660_v48 = vpop.eup %659 }
  0xeb   :  { %665 = vrcp.f32 %v265_v47  ;;  %v268_v49 = vadd.f32 1.0, %v660_v48 }
  0xec   :  { %v662_v50 = vpop.eup %661 }
  0xed   :  { %v267_v52 = vadd.f32 1.0, %v662_v50  ;;  %667 = vrcp.f32 %v268_v49 }
  0xef   :  { %669 = vrcp.f32 %v267_v52 }
  0xf6   :  { %v664_v58 = vpop.eup %663 }
  0xf7   :  { %v278_v1 = vmul.f32 %v664_v58, %v142_v57 }
  0xf8   :  { %v666_v61 = vpop.eup %665 }
  0xf9   :  { %v277_v0 = vmul.f32 %v666_v61, %v137_v59 }
  0xfa   :  { %v668_v3 = vpop.eup %667 }
  0xfb   :  { %637 = vmatprep.mubr.msk.f32.mxu0 %vm291_vm1, %v277_v0  ;;  %649 = vmatprep.mubr.msk.f32.mxu1 %vm291_vm1, %v277_v0  ;;  %v280_v7 = vmul.f32 %v668_v3, %v152_v2 }
  0xfc   :  { %v670_v5 = vpop.eup %669  ;;  %638 = vmatmul.mubr.msk.f32.vlgmr.msra.gmra.mxu0 %vm291_vm1, %v278_v1  ;;  %650 = vmatmul.mubr.msk.f32.vlgmr.msra.gmra.mxu1 %vm291_vm1, %v278_v1 }
  0xfd   :  { %v279_v6 = vmul.f32 %v670_v5, %v147_v4 }
  0xff   :  { %640 = vmatprep.mubr.msk.f32.mxu0 %vm291_vm1, %v279_v6  ;;  %652 = vmatprep.mubr.msk.f32.mxu1 %vm291_vm1, %v279_v6 }
 0x100   :  { %641 = vmatmul.mubr.msk.f32.gmra.mxu0 %vm291_vm1, %v280_v7  ;;  %653 = vmatmul.mubr.msk.f32.gmra.mxu1 %vm291_vm1, %v280_v7 }
 0x1bc   :  { %v639_v10 = vpop.f32.mrf.mxu0  ;;  %v651_v12 = vpop.f32.mrf.mxu1 }
 0x1bd   :  { %v376_v14 = vadd.f32 %v639_v10, %v533_v8  ;;  %v471_v15 = vadd.f32 %v651_v12, %v538_v9 }
 0x1be   :  { %v370_v16 = vpop.f32.mrf.mxu0  ;;  %v465_v18 = vpop.f32.mrf.mxu1 }
 0x1bf   :  { %v505_v20 = vadd.f32 %v501_v11, %v376_v14  ;;  %v489_v21 = vadd.f32 %v485_v13, %v471_v15  ;;  %v371_v22 = vadd.f32 %v533_v8, %v370_v16  ;;  %v466_v23 = vadd.f32 %v538_v9, %v465_v18 }
 0x1c0   :  { %v642_v24 = vpop.f32.mrf.mxu0  ;;  %v654_v26 = vpop.f32.mrf.mxu1 }
 0x1c1   :  { %510 = vst.msk [vmem:[%s933_s12 + $0x8] sm:$0xff] %vm508_vm2, %v505_v20  ;;  %v493_v27 = vmul.f32 0.70710677, %v489_v21  ;;  %v504_v28 = vadd.f32 %v500_v17, %v371_v22  ;;  %v488_v29 = vadd.f32 %v484_v19, %v466_v23  ;;  %v386_v30 = vadd.f32 %v642_v24, %v533_v8 }
 0x1c2   :  { %v481_v32 = vadd.f32 %v654_v26, %v538_v9  ;;  %v380_v33 = vpop.f32.mrf.mxu0  ;;  %v475_v35 = vpop.f32.mrf.mxu1 }
 0x1c3   :  { %497 = vst.msk [vmem:[%s934_s11 + $0x8] sm:$0xff] %vm291_vm1, %v493_v27  ;;  %v492_v37 = vmul.f32 0.70710677, %v488_v29  ;;  %v507_v38 = vadd.f32 %v503_v25, %v386_v30  ;;  %v381_v39 = vadd.f32 %v533_v8, %v380_v33  ;;  %v476_v40 = vadd.f32 %v538_v9, %v475_v35 }
 0x1c4   :  { %509 = vst.msk [vmem:[%s933_s12] sm:$0xff] %vm508_vm2, %v504_v28  ;;  %v491_v41 = vadd.f32 %v487_v31, %v481_v32 }
 0x1c5   :  { %496 = vst.msk [vmem:[%s934_s11] sm:$0xff] %vm291_vm1, %v492_v37  ;;  %v506_v42 = vadd.f32 %v502_v34, %v381_v39  ;;  %v490_v43 = vadd.f32 %v486_v36, %v476_v40 }
 0x1c6   :  { %512 = vst.msk [vmem:[%s933_s12 + $0x18] sm:$0xff] %vm508_vm2, %v507_v38  ;;  %v495_v44 = vmul.f32 0.70710677, %v491_v41 }
 0x1c7   :  { %511 = vst.msk [vmem:[%s933_s12 + $0x10] sm:$0xff] %vm508_vm2, %v506_v42  ;;  %v494_v45 = vmul.f32 0.70710677, %v490_v43 }
 0x1c8   :  { %499 = vst.msk [vmem:[%s934_s11 + $0x18] sm:$0xff] %vm291_vm1, %v495_v44 }
 0x1c9   :  { %498 = vst.msk [vmem:[%s934_s11 + $0x10] sm:$0xff] %vm291_vm1, %v494_v45 }

// kernel: model_forward.24
= control target key start
LH: loop header
LB: loop body
LE: loop exit
PB: predicated region body
PF: predicated region fallthrough
CT: control target
= control target key end

     0   :  { %vm55_vm0 = vcmask 392192   ;;  %s897_s0 = inlined_call_operand.vmem [shape: f32[32,48], index: 0, kind: input, shape index: {}]   ;;  %s898_s1 = inlined_call_operand.vmem [shape: f32[48,16], index: 1, kind: input, shape index: {}]   ;;  %s899_s2 = inlined_call_operand.vmem [shape: f32[48,16], index: 2, kind: input, shape index: {}]   ;;  %s900_s3 = inlined_call_operand.vmem [shape: f32[32,16], index: 3, kind: input, shape index: {}]   ;;  %s901_s4 = inlined_call_operand.vmem [shape: f32[32,16], index: 4, kind: input, shape index: {}]   ;;  %s902_s5 = inlined_call_operand.vmem [shape: f32[16,16], index: 5, kind: input, shape index: {}]   ;;  %s903_s6 = inlined_call_operand.vmem [shape: f32[1,16], index: 6, kind: input, shape index: {}]   ;;  %s904_s7 = inlined_call_operand.vmem [shape: f32[16,16], index: 7, kind: input, shape index: {}]   ;;  %s905_s8 = inlined_call_operand.vmem [shape: f32[1,16], index: 8, kind: input, shape index: {}]   ;;  %s906_s9 = inlined_call_operand.vmem [shape: f32[32,16], index: 9, kind: input, shape index: {}]   ;;  %s907_s10 = inlined_call_operand.vmem [shape: f32[32,16], index: 10, kind: input, shape index: {}]   ;;  %s908_s11 = inlined_call_operand.hbm [shape: f32[32,16], index: 11, kind: output, shape index: {0}]   ;;  %s909_s12 = inlined_call_operand.vmem [shape: f32[32,16], index: 12, kind: output, shape index: {1}]  }
   0x1   :  { %v158_v0 = vld [vmem:[%s899_s2 + $0x28] sm:$0xff]  ;;  %v157_v1 = vld [vmem:[%s899_s2 + $0x20] sm:$0xff]  ;;  %v156_v2 = vld [vmem:[%s899_s2 + $0x18] sm:$0xff] }
   0x2   :  { %597 = vmatprep.subr.mxu1 %v158_v0  ;;  %v41_v3 = vld [vmem:[%s897_s0] sm:$0xff]  ;;  %v50_v4 = vld [vmem:[%s898_s1 + $0x28] sm:$0xff]  ;;  %v155_v6 = vld [vmem:[%s899_s2 + $0x10] sm:$0xff] }
   0x3   :  { %598 = vmatpush3.msra.mxu1 %v158_v0  ;;  %609 = vmatprep.mubr.msk.f32.mxu1 %vm55_vm0, %v41_v3  ;;  %v49_v5 = vld [vmem:[%s898_s1 + $0x20] sm:$0xff]  ;;  %v48_v7 = vld [vmem:[%s898_s1 + $0x18] sm:$0xff] }
   0x4   :  { %599 = vmatprep.subr.mxu1 %v157_v1  ;;  %579 = vmatprep.subr.mxu0 %v50_v4 }
   0x5   :  { %600 = vmatpush3.msra.mxu1 %v157_v1  ;;  %580 = vmatpush3.msra.mxu0 %v50_v4 }
   0x6   :  { %601 = vmatprep.subr.mxu1 %v156_v2 }
   0x7   :  { %18 = vsyncpa [#allocation3], 0  ;;  %602 = vmatpush3.msra.mxu1 %v156_v2  ;;  %v154_v8 = vld [vmem:[%s899_s2 + $0x8] sm:$0xff]  ;;  %581 = vmatprep.subr.mxu0 %v49_v5  ;;  %v47_v9 = vld [vmem:[%s898_s1 + $0x10] sm:$0xff]  ;;  %vm285_vm1 = vcmask 130048   ;;  %s676_s13 = smov [#allocation2]  }
   0x8   :  { %603 = vmatprep.subr.mxu1 %v155_v6  ;;  %582 = vmatpush3.msra.mxu0 %v49_v5  ;;  %v153_v10 = vld [vmem:[%s899_s2] sm:$0xff]  ;;  %v46_v11 = vld [vmem:[%s898_s1 + $0x8] sm:$0xff]  ;;  %v43_v13 = vld [vmem:[%s897_s0 + $0x10] sm:$0xff]  ;;  %s510_s14 = sshll.u32 %s676_s13, 4  ;;  %s511_s14 = int_to_ptr.vmem [resolvable:$true] %s510_s14 }
   0x9   :  { %604 = vmatpush3.msra.mxu1 %v155_v6  ;;  %583 = vmatprep.subr.mxu0 %v48_v7  ;;  %v42_v12 = vld [vmem:[%s897_s0 + $0x8] sm:$0xff]  ;;  %v45_v14 = vld [vmem:[%s898_s1] sm:$0xff]  ;;  %v44_v15 = vld [vmem:[%s897_s0 + $0x18] sm:$0xff]  ;;  %s654_s1 = scalar_lea.vmem %s511_s14, 512  ;;  %p659_p1 = scmp.lt.s32.totalorder %s511_s14, %s511_s14 }
   0xa   :  { %605 = vmatprep.subr.mxu1 %v154_v8  ;;  %584 = vmatpush3.msra.mxu0 %v48_v7  ;;  %v384_v16 = vld [vmem:[%s904_s7 + $0x8] sm:$0xff]  ;;  %v383_v18 = vld [vmem:[%s904_s7] sm:$0xff]  ;;  %v162_v25 = vld [vmem:[%s901_s4 + $0x18] sm:$0xff]  ;;  %p655_p0 = scmp.ne.s32.totalorder %s511_s14, %s654_s1  ;;  %p660_p2 = scmp.lt.s32.totalorder %s654_s1, %s654_s1 }
   0xb   :  { %606 = vmatpush3.msra.mxu1 %v154_v8  ;;  %585 = vmatprep.subr.mxu0 %v47_v9  ;;  %v277_v17 = vld [vmem:[%s902_s5 + $0x8] sm:$0xff]  ;;  %v276_v19 = vld [vmem:[%s902_s5] sm:$0xff]  ;;  %v161_v29 = vld [vmem:[%s901_s4 + $0x10] sm:$0xff] }
   0xc   :  { %607 = vmatprep.subr.mxu1 %v153_v10  ;;  %586 = vmatpush3.msra.mxu0 %v47_v9  ;;  %v160_v20 = vld [vmem:[%s901_s4 + $0x8] sm:$0xff]  ;;  %v159_v22 = vld [vmem:[%s901_s4] sm:$0xff]  ;;  %v54_v52 = vld [vmem:[%s900_s3 + $0x18] sm:$0xff]  ;;  %p661_p3 = por %p660_p2, %p659_p1 }
   0xd   :  { %608 = vmatpush3.msra.mxu1 %v153_v10  ;;  %587 = vmatprep.subr.mxu0 %v46_v11  ;;  %v52_v46 = vld [vmem:[%s900_s3 + $0x8] sm:$0xff]  ;;  %v51_v47 = vld [vmem:[%s900_s3] sm:$0xff]  ;;  %v53_v55 = vld [vmem:[%s900_s3 + $0x10] sm:$0xff] }
   0xe   :  { %610 = vmatmul.mubr.msk.f32.vlgmr.msra.gmra.mxu1 %vm55_vm0, %v42_v12  ;;  %588 = vmatpush3.msra.mxu0 %v46_v11  ;;  %v537_v0 = vld [vmem:[%s903_s6] ss:$0 sm:$0xff]  ;;  %v478_v5 = vld [vmem:[%s906_s9 + $0x8] sm:$0xff]  ;;  %p662_p4 = pnand %p661_p3, %p655_p0 }
   0xf   :  { %612 = vmatprep.mubr.msk.f32.mxu1 %vm55_vm0, %v43_v13  ;;  %589 = vmatprep.subr.mxu0 %v45_v14  ;;  %v542_v1 = vld [vmem:[%s905_s8] ss:$0 sm:$0xff] }
  0x10   :  { %590 = vmatpush3.msra.mxu0 %v45_v14  ;;  %591 = vmatprep.mubr.msk.f32.mxu0 %vm55_vm0, %v41_v3  ;;  %v494_v3 = vld [vmem:[%s907_s10 + $0x8] sm:$0xff]  ;;  %v493_v9 = vld [vmem:[%s907_s10] sm:$0xff] }
  0x11   :  { %592 = vmatmul.mubr.msk.f32.vlgmr.msra.gmra.mxu0 %vm55_vm0, %v42_v12  ;;  %625 = vmatprep.subr.mxu1 %v384_v16  ;;  %v477_v11 = vld [vmem:[%s906_s9] sm:$0xff] }
  0x12   :  { %613 = vmatmul.mubr.msk.f32.gmra.mxu1 %vm55_vm0, %v44_v15  ;;  %594 = vmatprep.mubr.msk.f32.mxu0 %vm55_vm0, %v43_v13 }
  0x13   :  { %615 = vmatprep.subr.mxu0 %v277_v17  ;;  %626 = vmatpush3.msra.mxu1 %v384_v16 }
  0x14   :  { %616 = vmatpush3.msra.mxu0 %v277_v17  ;;  %627 = vmatprep.subr.mxu1 %v383_v18  ;;  %v496_v17 = vld [vmem:[%s907_s10 + $0x18] sm:$0xff] }
  0x15   :  { %595 = vmatmul.mubr.msk.f32.gmra.mxu0 %vm55_vm0, %v44_v15  ;;  %617 = vmatprep.subr.mxu0 %v276_v19 }
  0x16   :  { %628 = vmatpush3.msra.mxu1 %v383_v18  ;;  %618 = vmatpush3.msra.mxu0 %v276_v19 }
  0xce   :  { %v611_v21 = vpop.f32.mrf.mxu1 }
  0xcf   :  { %v235_v23 = vadd.f32 %v611_v21, %v160_v20 }
  0xd0   :  { %v229_v24 = vpop.f32.mrf.mxu1 }
  0xd1   :  { %v534_v26 = vmul.f32 -1.442695, %v235_v23  ;;  %v230_v27 = vadd.f32 %v229_v24, %v159_v22  ;;  %v593_v43 = vpop.f32.mrf.mxu0  ;;  %v480_v23 = vld [vmem:[%s906_s9 + $0x18] sm:$0xff] }
  0xd2   :  { %v614_v28 = vpop.f32.mrf.mxu1  ;;  %v140_v49 = vadd.f32 %v593_v43, %v52_v46 }
  0xd3   :  { %638 = vpow2.f32 %v534_v26  ;;  %v533_v30 = vmul.f32 -1.442695, %v230_v27  ;;  %v245_v31 = vadd.f32 %v614_v28, %v162_v25  ;;  %v134_v45 = vpop.f32.mrf.mxu0  ;;  %v495_v26 = vld [vmem:[%s907_s10 + $0x10] sm:$0xff] }
  0xd4   :  { %v239_v32 = vpop.f32.mrf.mxu1  ;;  %v135_v51 = vadd.f32 %v134_v45, %v51_v47  ;;  %v479_v28 = vld [vmem:[%s906_s9 + $0x10] sm:$0xff] }
  0xd5   :  { %640 = vpow2.f32 %v533_v30  ;;  %v536_v33 = vmul.f32 -1.442695, %v245_v31  ;;  %v240_v34 = vadd.f32 %v239_v32, %v161_v29  ;;  %v596_v48 = vpop.f32.mrf.mxu0 }
  0xd6   :  { %v150_v58 = vadd.f32 %v596_v48, %v54_v52 }
  0xd7   :  { %642 = vpow2.f32 %v536_v33  ;;  %v535_v35 = vmul.f32 -1.442695, %v240_v34  ;;  %v144_v54 = vpop.f32.mrf.mxu0 }
  0xd8   :  { %v145_v60 = vadd.f32 %v144_v54, %v53_v55 }
  0xd9   :  { %644 = vpow2.f32 %v535_v35 }
  0xe0   :  { %v639_v36 = vpop.eup %638 }
  0xe1   :  { %v261_v37 = vadd.f32 1.0, %v639_v36 }
  0xe2   :  { %v641_v38 = vpop.eup %640 }
  0xe3   :  { %v260_v39 = vadd.f32 1.0, %v641_v38  ;;  %646 = vrcp.f32 %v261_v37 }
  0xe4   :  { %v643_v40 = vpop.eup %642 }
  0xe5   :  { %648 = vrcp.f32 %v260_v39  ;;  %v263_v41 = vadd.f32 1.0, %v643_v40 }
  0xe6   :  { %v645_v42 = vpop.eup %644 }
  0xe7   :  { %v262_v44 = vadd.f32 1.0, %v645_v42  ;;  %650 = vrcp.f32 %v263_v41 }
  0xe9   :  { %652 = vrcp.f32 %v262_v44 }
  0xf0   :  { %v647_v50 = vpop.eup %646 }
  0xf1   :  { %v273_v57 = vmul.f32 %v647_v50, %v140_v49 }
  0xf2   :  { %v649_v53 = vpop.eup %648 }
  0xf3   :  { %v272_v56 = vmul.f32 %v649_v53, %v135_v51 }
  0xf4   :  { %v651_v59 = vpop.eup %650 }
  0xf5   :  { %619 = vmatprep.mubr.msk.f32.mxu0 %vm285_vm1, %v272_v56  ;;  %629 = vmatprep.mubr.msk.f32.mxu1 %vm285_vm1, %v272_v56  ;;  %v275_v63 = vmul.f32 %v651_v59, %v150_v58 }
  0xf6   :  { %v653_v61 = vpop.eup %652  ;;  %620 = vmatmul.mubr.msk.f32.vlgmr.msra.gmra.mxu0 %vm285_vm1, %v273_v57  ;;  %630 = vmatmul.mubr.msk.f32.vlgmr.msra.gmra.mxu1 %vm285_vm1, %v273_v57 }
  0xf7   :  { %v274_v62 = vmul.f32 %v653_v61, %v145_v60 }
  0xf9   :  { %622 = vmatprep.mubr.msk.f32.mxu0 %vm285_vm1, %v274_v62  ;;  %632 = vmatprep.mubr.msk.f32.mxu1 %vm285_vm1, %v274_v62 }
  0xfa   :  { %623 = vmatmul.mubr.msk.f32.gmra.mxu0 %vm285_vm1, %v275_v63  ;;  %633 = vmatmul.mubr.msk.f32.gmra.mxu1 %vm285_vm1, %v275_v63 }
 0x1b6   :  { %v621_v2 = vpop.f32.mrf.mxu0  ;;  %v631_v4 = vpop.f32.mrf.mxu1 }
 0x1b7   :  { %v370_v6 = vadd.f32 %v621_v2, %v537_v0  ;;  %v464_v7 = vadd.f32 %v631_v4, %v542_v1 }
 0x1b8   :  { %v364_v8 = vpop.f32.mrf.mxu0  ;;  %v458_v10 = vpop.f32.mrf.mxu1 }
 0x1b9   :  { %v498_v12 = vadd.f32 %v494_v3, %v370_v6  ;;  %v482_v13 = vadd.f32 %v478_v5, %v464_v7  ;;  %v365_v14 = vadd.f32 %v537_v0, %v364_v8  ;;  %v459_v15 = vadd.f32 %v542_v1, %v458_v10 }
 0x1ba   :  { %v624_v16 = vpop.f32.mrf.mxu0  ;;  %v634_v18 = vpop.f32.mrf.mxu1 }
 0x1bb   :  { %502 = vst.msk [vmem:[%s909_s12 + $0x8] sm:$0xff] %vm285_vm1, %v498_v12  ;;  %v486_v19 = vmul.f32 0.70710677, %v482_v13  ;;  %v497_v20 = vadd.f32 %v493_v9, %v365_v14  ;;  %v481_v21 = vadd.f32 %v477_v11, %v459_v15  ;;  %v380_v22 = vadd.f32 %v624_v16, %v537_v0 }
 0x1bc   :  { %v474_v24 = vadd.f32 %v634_v18, %v542_v1  ;;  %v374_v25 = vpop.f32.mrf.mxu0  ;;  %v468_v27 = vpop.f32.mrf.mxu1 }
 0x1bd   :  { %490 = vst.msk [vmem:[#allocation2 + $0x8] sm:$0xff] %vm285_vm1, %v486_v19  ;;  %501 = vst.msk [vmem:[%s909_s12] sm:$0xff] %vm285_vm1, %v497_v20  ;;  %v485_v29 = vmul.f32 0.70710677, %v481_v21  ;;  %v500_v30 = vadd.f32 %v496_v17, %v380_v22  ;;  %v375_v31 = vadd.f32 %v537_v0, %v374_v25  ;;  %v469_v32 = vadd.f32 %v542_v1, %v468_v27 }
 0x1be   :  { %v484_v33 = vadd.f32 %v480_v23, %v474_v24 }
 0x1bf   :  { %489 = vst.msk [vmem:[#allocation2] sm:$0xff] %vm285_vm1, %v485_v29  ;;  %504 = vst.msk [vmem:[%s909_s12 + $0x18] sm:$0xff] %vm285_vm1, %v500_v30  ;;  %v499_v34 = vadd.f32 %v495_v26, %v375_v31  ;;  %v483_v35 = vadd.f32 %v479_v28, %v469_v32 }
 0x1c0   :  { %v488_v36 = vmul.f32 0.70710677, %v484_v33 }
 0x1c1   :  { %503 = vst.msk [vmem:[%s909_s12 + $0x10] sm:$0xff] %vm285_vm1, %v499_v34  ;;  %v487_v37 = vmul.f32 0.70710677, %v483_v35 }
 0x1c2   :  { %492 = vst.msk [vmem:[#allocation2 + $0x18] sm:$0xff] %vm285_vm1, %v488_v36 }
 0x1c3   :  { %491 = vst.msk [vmem:[#allocation2 + $0x10] sm:$0xff] %vm285_vm1, %v487_v37 }
 0x1c4   :  { %665 = shalt.err (!%p662_p4)
}
 0x1c5   :  { %s677_s16 = smov 128   ;;  %s678_s17 = smov 8  }
 0x1c6   :  { %516 = dma.vmem_to_hbm [thread:$0]  %s511_s14, 512, %s908_s11, [#allocation3], %s677_s16, %s677_s16, %s678_s17  }
 0x1c7   :  { %674 = dma.done.wait [#allocation3], 512  }
 0x1c8   :  { %675 = vsyncadd [#allocation3], 4294966784 }
 0x1c9   :  { %524 = vsyncpa [#allocation3], 1 }

// kernel: model_forward.25
= control target key start
LH: loop header
LB: loop body
LE: loop exit
PB: predicated region body
PF: predicated region fallthrough
CT: control target
= control target key end

     0   :  { %vm41_vm0 = vcmask 130048   ;;  %s383_s1 = inlined_call_operand.vmem [shape: f32[16,16], index: 1, kind: input, shape index: {}]   ;;  %s384_s0 = inlined_call_operand.vmem [shape: f32[32,16], index: 0, kind: input, shape index: {}]   ;;  %s385_s3 = inlined_call_operand.vmem [shape: f32[16,16], index: 3, kind: input, shape index: {}]   ;;  %s386_s2 = inlined_call_operand.vmem [shape: f32[1,16], index: 2, kind: input, shape index: {}]   ;;  %s387_s4 = inlined_call_operand.vmem [shape: f32[1,16], index: 4, kind: input, shape index: {}]   ;;  %s388_s5 = inlined_call_operand.vmem [shape: f32[32,16], index: 5, kind: output, shape index: {}]  }
   0x1   :  { %v33_v0 = vld [vmem:[%s383_s1 + $0x8] sm:$0xff]  ;;  %v32_v1 = vld [vmem:[%s383_s1] sm:$0xff]  ;;  %v22_v5 = vld [vmem:[%s384_s0 + $0x10] sm:$0xff] }
   0x2   :  { %v20_v2 = vld [vmem:[%s384_s0] sm:$0xff]  ;;  %279 = vmatprep.subr.mxu0 %v33_v0  ;;  %v21_v4 = vld [vmem:[%s384_s0 + $0x8] sm:$0xff]  ;;  %v23_v6 = vld [vmem:[%s384_s0 + $0x18] sm:$0xff]  ;;  %v26_v8 = vmul.f32 0.5, %v22_v5 }
   0x3   :  { %v24_v3 = vmul.f32 0.5, %v20_v2  ;;  %280 = vmatpush3.msra.mxu0 %v33_v0  ;;  %v25_v7 = vmul.f32 0.5, %v21_v4  ;;  %v27_v9 = vmul.f32 0.5, %v23_v6  ;;  %v144_v14 = vld [vmem:[%s385_s3 + $0x8] sm:$0xff]  ;;  %v143_v15 = vld [vmem:[%s385_s3] sm:$0xff] }
   0x4   :  { %281 = vmatprep.subr.mxu0 %v32_v1  ;;  %v30_v12 = vmax.f32 %v26_v8, 0.0  ;;  %289 = vmatprep.subr.mxu1 %v144_v14  ;;  %v257_v16 = vld [vmem:[%s386_s2] ss:$0 sm:$0xff] }
   0x5   :  { %v28_v10 = vmax.f32 %v24_v3, 0.0  ;;  %282 = vmatpush3.msra.mxu0 %v32_v1  ;;  %v29_v11 = vmax.f32 %v25_v7, 0.0  ;;  %v31_v13 = vmax.f32 %v27_v9, 0.0  ;;  %290 = vmatpush3.msra.mxu1 %v144_v14  ;;  %v262_v29 = vld [vmem:[%s387_s4] ss:$0 sm:$0xff] }
   0x6   :  { %291 = vmatprep.subr.mxu1 %v143_v15 }
   0x7   :  { %283 = vmatprep.mubr.msk.f32.mxu0 %vm41_vm0, %v28_v10  ;;  %292 = vmatpush3.msra.mxu1 %v143_v15 }
   0x8   :  { %284 = vmatmul.mubr.msk.f32.vlgmr.msra.gmra.mxu0 %vm41_vm0, %v29_v11 }
   0x9   :  { %286 = vmatprep.mubr.msk.f32.mxu0 %vm41_vm0, %v30_v12 }
   0xc   :  { %287 = vmatmul.mubr.msk.f32.gmra.mxu0 %vm41_vm0, %v31_v13 }
  0xc8   :  { %v285_v17 = vpop.f32.mrf.mxu0 }
  0xc9   :  { %v126_v18 = vadd.f32 %v285_v17, %v257_v16 }
  0xca   :  { %v120_v19 = vpop.f32.mrf.mxu0 }
  0xcb   :  { %v121_v20 = vadd.f32 %v257_v16, %v120_v19  ;;  %v140_v23 = vmax.f32 %v126_v18, 0.0 }
  0xcc   :  { %v288_v21 = vpop.f32.mrf.mxu0 }
  0xcd   :  { %v139_v22 = vmax.f32 %v121_v20, 0.0  ;;  %v136_v24 = vadd.f32 %v288_v21, %v257_v16 }
  0xce   :  { %v130_v25 = vpop.f32.mrf.mxu0 }
  0xcf   :  { %v131_v26 = vadd.f32 %v257_v16, %v130_v25  ;;  %293 = vmatprep.mubr.msk.f32.mxu1 %vm41_vm0, %v139_v22  ;;  %v142_v28 = vmax.f32 %v136_v24, 0.0 }
  0xd0   :  { %294 = vmatmul.mubr.msk.f32.vlgmr.msra.gmra.mxu1 %vm41_vm0, %v140_v23 }
  0xd1   :  { %v141_v27 = vmax.f32 %v131_v26, 0.0 }
  0xd3   :  { %296 = vmatprep.mubr.msk.f32.mxu1 %vm41_vm0, %v141_v27 }
  0xd4   :  { %297 = vmatmul.mubr.msk.f32.gmra.mxu1 %vm41_vm0, %v142_v28 }
 0x190   :  { %v295_v30 = vpop.f32.mrf.mxu1 }
 0x191   :  { %v236_v31 = vadd.f32 %v295_v30, %v262_v29 }
 0x192   :  { %v230_v32 = vpop.f32.mrf.mxu1 }
 0x193   :  { %250 = vst.msk [vmem:[%s388_s5 + $0x8] sm:$0xff] %vm41_vm0, %v236_v31  ;;  %v231_v33 = vadd.f32 %v262_v29, %v230_v32 }
 0x194   :  { %v298_v34 = vpop.f32.mrf.mxu1 }
 0x195   :  { %249 = vst.msk [vmem:[%s388_s5] sm:$0xff] %vm41_vm0, %v231_v33  ;;  %v246_v35 = vadd.f32 %v298_v34, %v262_v29 }
 0x196   :  { %v240_v36 = vpop.f32.mrf.mxu1 }
 0x197   :  { %252 = vst.msk [vmem:[%s388_s5 + $0x18] sm:$0xff] %vm41_vm0, %v246_v35  ;;  %v241_v37 = vadd.f32 %v262_v29, %v240_v36 }
 0x199   :  { %251 = vst.msk [vmem:[%s388_s5 + $0x10] sm:$0xff] %vm41_vm0, %v241_v37 }

</bundles_post_ra>
